<compile_context>
chip_gen: v5e
topology: v5e:2x2
jax: 0.10.0
libtpu: 0.0.40
codegen_flags: <defaults>
</compile_context>

<pallas_src>
import math

import jax
import jax.numpy as jnp
from jax.experimental import pallas as pl
from jax.experimental.pallas import tpu as pltpu


# ----------------------------- Stage A: tiled attention + out-proj + stats -----------------------------

def _attention_kernel(x_ref, wq_ref, bq_ref, wk_ref, bk_ref, wv_ref, bv_ref,
                      wo_ref, bo_ref, h_ref, s1_ref, s2_ref, k_sc, v_sc):
    # x_ref:  (1, C, N)  full batch element (block index constant across q tiles -> fetched once per b)
    # h_ref:  (1, C, TQ) pre-GroupNorm output tile (channel-major, lane-dense stores)
    # s1/s2:  (1, C, 1)  per-channel sum / sum-of-squares accumulators (revisited across q tiles)
    # k_sc/v_sc: (C, N) bf16 persistent VMEM scratch
    qi = pl.program_id(1)
    tq = h_ref.shape[2]

    # --- once per batch element: K / V 1x1-conv projections into persistent scratch + stat init ---
    @pl.when(qi == 0)
    def _():
        x_full = x_ref[0]                                                          # (C, N) f32
        k_t = jnp.dot(wk_ref[...], x_full, preferred_element_type=jnp.float32) + bk_ref[...]
        v_t = jnp.dot(wv_ref[...], x_full, preferred_element_type=jnp.float32) + bv_ref[...]
        k_sc[...] = k_t.astype(k_sc.dtype)
        v_sc[...] = v_t.astype(v_sc.dtype)
        s1_ref[...] = jnp.zeros_like(s1_ref)
        s2_ref[...] = jnp.zeros_like(s2_ref)

    # --- Q projection for this query tile (fp32) ---
    start = pl.multiple_of(qi * tq, tq)
    x_tile = x_ref[0, :, pl.ds(start, tq)]                                         # (C, TQ) f32
    q_t = jnp.dot(wq_ref[...], x_tile, preferred_element_type=jnp.float32) + bq_ref[...]  # (C, TQ)
    q_nc = jnp.transpose(q_t).astype(jnp.bfloat16)                                 # (TQ, C) bf16

    # --- scores[n, m] = sum_c q[c, n] k[c, m]  (no 1/sqrt(C) scaling, as in the torch module) ---
    s = jnp.dot(q_nc, k_sc[...], preferred_element_type=jnp.float32)               # (TQ, N) f32

    # --- softmax over keys ---
    m = jnp.max(s, axis=-1, keepdims=True)
    e = jnp.exp(s - m)
    inv_l = pl.reciprocal(jnp.sum(e, axis=-1, keepdims=True), approx=True)
    p = (e * inv_l).astype(jnp.bfloat16)                                           # (TQ, N) bf16

    # --- h_att[c, n] = sum_m v[c, m] * p[n, m]  (channel-major, matches torch v @ w^T) ---
    h_att = jax.lax.dot_general(v_sc[...], p, (((1,), (1,)), ((), ())),
                                preferred_element_type=jnp.float32)                # (C, TQ) f32

    # --- output 1x1 conv (fp32) ---
    h_o = jnp.dot(wo_ref[...], h_att, preferred_element_type=jnp.float32) + bo_ref[...]   # (C, TQ)
    h_ref[0] = h_o.astype(h_ref.dtype)

    # --- per-channel partial sums for GroupNorm, accumulated across q tiles ---
    s1 = jnp.sum(h_o, axis=1, keepdims=True)                                       # (C, 1)
    s2 = jnp.sum(h_o * h_o, axis=1, keepdims=True)                                 # (C, 1)
    s1_ref[...] += s1[None]
    s2_ref[...] += s2[None]


# ----------------------------- Stage B: GroupNorm apply + Swish + residual -----------------------------

def _norm_swish_residual_kernel(h_ref, x_ref, mean_ref, rstd_ref, gamma_ref, beta_ref, o_ref):
    h = h_ref[0]                                   # (C, TN) f32
    y = (h - mean_ref[0]) * rstd_ref[0]            # per-channel stats broadcast over lanes
    y = y * gamma_ref[...] + beta_ref[...]
    y = y * jax.nn.sigmoid(y)                      # Swish
    o_ref[0] = (y + x_ref[0]).astype(o_ref.dtype)  # residual


# ----------------------------- wrapper -----------------------------

def _pick_tile(n):
    # prefer 256 (fits the v7x 64 MiB VMEM budget with fp32 scores), else 512/128, else whole extent
    for t in (256, 512, 128):
        if n % t == 0:
            return t
    return n


def _vmem_limit_bytes(C, N, TQ):
    f32, bf16 = 4, 2
    est = (2 * C * N * f32          # x block (double-buffered)
           + 8 * C * C * f32        # weight blocks (double-buffered)
           + 2 * C * N * bf16       # K/V scratch
           + 2 * C * TQ * f32       # h output block (double-buffered)
           + 4 * TQ * N * f32       # scores + softmax temporaries
           + 2 * TQ * N * bf16      # probabilities
           + 4 * C * TQ * f32)      # q / attention-out temporaries
    # 2x headroom; cap kept below v5e/v6e physical VMEM (lower it to ~48 MiB when targeting v7x).
    return int(min(max(2 * est, 32 * 1024 * 1024), 96 * 1024 * 1024))


def self_attention_pallas(x_ncdhw, params, num_groups, eps=1e-5):
    """x_ncdhw: (B, C, *spatial) float32.  Returns same shape/dtype."""
    orig_dtype = x_ncdhw.dtype
    B, C = x_ncdhw.shape[:2]
    spatial = x_ncdhw.shape[2:]
    N = math.prod(spatial)

    x = x_ncdhw.reshape(B, C, N).astype(jnp.float32)          # free reshape, no transpose

    wq, wk, wv, wo = params["wq"], params["wk"], params["wv"], params["wo"]   # (C_out, C_in)
    bq = params["bq"].reshape(C, 1)
    bk = params["bk"].reshape(C, 1)
    bv = params["bv"].reshape(C, 1)
    bo = params["bo"].reshape(C, 1)
    gamma = params["gamma"].reshape(C, 1)
    beta = params["beta"].reshape(C, 1)

    tq = _pick_tile(N)
    w_spec = pl.BlockSpec((C, C), lambda b, i: (0, 0))
    b_spec = pl.BlockSpec((C, 1), lambda b, i: (0, 0))

    cost = pl.CostEstimate(
        flops=int(B * (8 * C * C * N + 4 * N * N * C)),
        transcendentals=int(B * N * (N + 1)),
        bytes_accessed=int(4 * (2 * B * C * N + 4 * C * C + 6 * C)),
    )

    h, s1, s2 = pl.pallas_call(
        _attention_kernel,
        out_shape=(
            jax.ShapeDtypeStruct((B, C, N), jnp.float32),      # pre-GroupNorm activations
            jax.ShapeDtypeStruct((B, C, 1), jnp.float32),      # per-channel sum
            jax.ShapeDtypeStruct((B, C, 1), jnp.float32),      # per-channel sum of squares
        ),
        grid_spec=pltpu.PrefetchScalarGridSpec(
            num_scalar_prefetch=0,
            grid=(B, N // tq),
            in_specs=[
                pl.BlockSpec((1, C, N), lambda b, i: (b, 0, 0)),   # x (constant block across q tiles)
                w_spec, b_spec,   # wq, bq
                w_spec, b_spec,   # wk, bk
                w_spec, b_spec,   # wv, bv
                w_spec, b_spec,   # wo, bo
            ],
            out_specs=(
                pl.BlockSpec((1, C, tq), lambda b, i: (b, 0, i)),
                pl.BlockSpec((1, C, 1), lambda b, i: (b, 0, 0)),
                pl.BlockSpec((1, C, 1), lambda b, i: (b, 0, 0)),
            ),
            scratch_shapes=[
                pltpu.VMEM((C, N), jnp.bfloat16),   # K (channel-major)
                pltpu.VMEM((C, N), jnp.bfloat16),   # V (channel-major)
            ],
        ),
        compiler_params=pltpu.CompilerParams(
            dimension_semantics=("parallel", "arbitrary"),
            vmem_limit_bytes=_vmem_limit_bytes(C, N, tq),
        ),
        cost_estimate=cost,
    )(x, wq, bq, wk, bk, wv, bv, wo, bo)

    # --- finalize GroupNorm statistics on tiny (B, C)-sized arrays (negligible XLA work) ---
    G = num_groups
    Cg = C // G
    cnt = jnp.float32(N * Cg)
    sum_g = s1[..., 0].reshape(B, G, Cg).sum(axis=-1)
    sumsq_g = s2[..., 0].reshape(B, G, Cg).sum(axis=-1)
    mean_g = sum_g / cnt
    var_g = jnp.maximum(sumsq_g / cnt - mean_g * mean_g, 0.0)
    rstd_g = jax.lax.rsqrt(var_g + jnp.float32(eps))
    mean_c = jnp.repeat(mean_g, Cg, axis=1).reshape(B, C, 1)
    rstd_c = jnp.repeat(rstd_g, Cg, axis=1).reshape(B, C, 1)

    tn = tq
    out = pl.pallas_call(
        _norm_swish_residual_kernel,
        out_shape=jax.ShapeDtypeStruct((B, C, N), jnp.float32),
        grid_spec=pltpu.PrefetchScalarGridSpec(
            num_scalar_prefetch=0,
            grid=(B, N // tn),
            in_specs=[
                pl.BlockSpec((1, C, tn), lambda b, i: (b, 0, i)),   # h
                pl.BlockSpec((1, C, tn), lambda b, i: (b, 0, i)),   # x (residual)
                pl.BlockSpec((1, C, 1), lambda b, i: (b, 0, 0)),    # mean per channel
                pl.BlockSpec((1, C, 1), lambda b, i: (b, 0, 0)),    # rstd per channel
                pl.BlockSpec((C, 1), lambda b, i: (0, 0)),          # gamma
                pl.BlockSpec((C, 1), lambda b, i: (0, 0)),          # beta
            ],
            out_specs=pl.BlockSpec((1, C, tn), lambda b, i: (b, 0, i)),
        ),
        compiler_params=pltpu.CompilerParams(
            dimension_semantics=("parallel", "parallel"),
            vmem_limit_bytes=32 * 1024 * 1024,
        ),
    )(h, x, mean_c, rstd_c, gamma, beta)

    return out.reshape(B, C, *spatial).astype(orig_dtype)


# ----------------------------- pure-JAX reference (mirrors the PyTorch forward, fp32) -----------------------------

def _reference_jax(x_ncdhw, params, num_groups, eps=1e-5):
    B, C = x_ncdhw.shape[:2]
    spatial = x_ncdhw.shape[2:]
    N = math.prod(spatial)
    G = num_groups
    Cg = C // G
    x = x_ncdhw.reshape(B, C, N).astype(jnp.float32)

    def conv(t, w, b):
        return jnp.einsum("oi,bin->bon", w, t) + b[None, :, None]

    q = conv(x, params["wq"], params["bq"])
    k = conv(x, params["wk"], params["bk"])
    v = conv(x, params["wv"], params["bv"])
    qk = jnp.einsum("bcn,bcm->bnm", q, k)
    w = jax.nn.softmax(qk, axis=-1)
    h = jnp.einsum("bcm,bnm->bcn", v, w)
    h = conv(h, params["wo"], params["bo"])
    hg = h.reshape(B, G, Cg, N)
    mean = hg.mean(axis=(2, 3), keepdims=True)
    var = ((hg - mean) ** 2).mean(axis=(2, 3), keepdims=True)
    hg = (hg - mean) / jnp.sqrt(var + eps)
    h = hg.reshape(B, C, N) * params["gamma"][None, :, None] + params["beta"][None, :, None]
    h = h * jax.nn.sigmoid(h)
    out = h + x
    return out.reshape(B, C, *spatial)


if __name__ == "__main__":
    # Small shapes consistent with the module (Conv3d path): B=2, C=8, spatial 8x8x8 (N=512), 2 groups.
    B, C, D1, D2, D3 = 2, 8, 8, 8, 8
    num_groups = 2

    key = jax.random.PRNGKey(0)
    keys = jax.random.split(key, 11)
    x = jax.random.normal(keys[0], (B, C, D1, D2, D3), dtype=jnp.float32)

    # Synthetic parameters. 1x1 conv weights stored in PyTorch conv layout (C_out, C_in).
    s = 0.2
    params = {
        "wq": s * jax.random.normal(keys[1], (C, C), jnp.float32),
        "bq": s * jax.random.normal(keys[2], (C,), jnp.float32),
        "wk": s * jax.random.normal(keys[3], (C, C), jnp.float32),
        "bk": s * jax.random.normal(keys[4], (C,), jnp.float32),
        "wv": s * jax.random.normal(keys[5], (C, C), jnp.float32),
        "bv": s * jax.random.normal(keys[6], (C,), jnp.float32),
        "wo": s * jax.random.normal(keys[7], (C, C), jnp.float32),
        "bo": s * jax.random.normal(keys[8], (C,), jnp.float32),
        "gamma": 1.0 + 0.1 * jax.random.normal(keys[9], (C,), jnp.float32),
        "beta": 0.1 * jax.random.normal(keys[10], (C,), jnp.float32),
    }

    out = jax.block_until_ready(self_attention_pallas(x, params, num_groups))
    ref = jax.block_until_ready(_reference_jax(x, params, num_groups))

    assert out.shape == (B, C, D1, D2, D3)
    err = float(jnp.max(jnp.abs(out - ref)))
    # The two big attention matmuls use bf16 MXU inputs (fp32 accumulation), so compare
    # against the fp32 reference with a bf16-appropriate tolerance.
    assert jnp.allclose(out, ref, atol=3e-2, rtol=3e-2), f"mismatch vs JAX reference (max abs err {err:.2e})"
    print("KERNEL_OK")
</pallas_src>

<mosaic_0001>
module attributes {stable_mosaic.version = 11 : i64} {
  func.func @_attention_kernel(%arg0: i32, %arg1: i32, %arg2: memref<1x8x512xf32, #tpu.memory_space<vmem>>, %arg3: memref<8x8xf32, #tpu.memory_space<vmem>>, %arg4: memref<8x1xf32, #tpu.memory_space<vmem>>, %arg5: memref<8x8xf32, #tpu.memory_space<vmem>>, %arg6: memref<8x1xf32, #tpu.memory_space<vmem>>, %arg7: memref<8x8xf32, #tpu.memory_space<vmem>>, %arg8: memref<8x1xf32, #tpu.memory_space<vmem>>, %arg9: memref<8x8xf32, #tpu.memory_space<vmem>>, %arg10: memref<8x1xf32, #tpu.memory_space<vmem>>, %arg11: memref<1x8x256xf32, #tpu.memory_space<vmem>>, %arg12: memref<1x8x1xf32, #tpu.memory_space<vmem>>, %arg13: memref<1x8x1xf32, #tpu.memory_space<vmem>>, %arg14: memref<8x512xbf16, #tpu.memory_space<vmem>>, %arg15: memref<8x512xbf16, #tpu.memory_space<vmem>>) attributes {dimension_semantics = [#tpu.dimension_semantics<parallel>, #tpu.dimension_semantics<arbitrary>], iteration_bounds = array<i64: 2, 2>, scalar_prefetch = 0 : i64, scratch_operands = 2 : i64, tpu.core_type = #tpu.core_type<tc>, window_params = [{transform_indices = @transform_0, window_bounds = array<i64: 1, 8, 512>}, {pipeline_mode = #tpu.pipeline_mode<synchronous>, transform_indices = @transform_1, window_bounds = array<i64: 8, 8>}, {pipeline_mode = #tpu.pipeline_mode<synchronous>, transform_indices = @transform_2, window_bounds = array<i64: 8, 1>}, {pipeline_mode = #tpu.pipeline_mode<synchronous>, transform_indices = @transform_3, window_bounds = array<i64: 8, 8>}, {pipeline_mode = #tpu.pipeline_mode<synchronous>, transform_indices = @transform_4, window_bounds = array<i64: 8, 1>}, {pipeline_mode = #tpu.pipeline_mode<synchronous>, transform_indices = @transform_5, window_bounds = array<i64: 8, 8>}, {pipeline_mode = #tpu.pipeline_mode<synchronous>, transform_indices = @transform_6, window_bounds = array<i64: 8, 1>}, {pipeline_mode = #tpu.pipeline_mode<synchronous>, transform_indices = @transform_7, window_bounds = array<i64: 8, 8>}, {pipeline_mode = #tpu.pipeline_mode<synchronous>, transform_indices = @transform_8, window_bounds = array<i64: 8, 1>}, {transform_indices = @transform_9, window_bounds = array<i64: 1, 8, 256>}, {transform_indices = @transform_10, window_bounds = array<i64: 1, 8, 1>}, {transform_indices = @transform_11, window_bounds = array<i64: 1, 8, 1>}]} {
    %c0_i32 = arith.constant 0 : i32
    %0 = arith.cmpi eq, %arg1, %c0_i32 : i32
    %1 = arith.extui %0 : i1 to i32
    %c0_i32_0 = arith.constant 0 : i32
    %2 = arith.cmpi ne, %1, %c0_i32_0 : i32
    scf.if %2 {
      %c0_36 = arith.constant 0 : index
      %c0_37 = arith.constant 0 : index
      %c0_38 = arith.constant 0 : index
      %51 = vector.load %arg2[%c0_36, %c0_37, %c0_38] : memref<1x8x512xf32, #tpu.memory_space<vmem>>, vector<1x8x512xf32>
      %52 = vector.shape_cast %51 : vector<1x8x512xf32> to vector<8x512xf32>
      %c0_39 = arith.constant 0 : index
      %c0_40 = arith.constant 0 : index
      %53 = vector.load %arg5[%c0_39, %c0_40] : memref<8x8xf32, #tpu.memory_space<vmem>>, vector<8x8xf32>
      %cst_41 = arith.constant dense<0.000000e+00> : vector<8x512xf32>
      %54 = tpu.matmul %53, %52, %cst_41 {dimension_numbers = #tpu.dot_dimension_numbers<[1], [0], [0], [1], [0, 0, 1, 1], [], []>} : vector<8x8xf32>, vector<8x512xf32>, vector<8x512xf32> -> vector<8x512xf32>
      %c0_42 = arith.constant 0 : index
      %c0_43 = arith.constant 0 : index
      %55 = vector.load %arg6[%c0_42, %c0_43] : memref<8x1xf32, #tpu.memory_space<vmem>>, vector<8x1xf32>
      %56 = vector.broadcast %55 : vector<8x1xf32> to vector<8x512xf32>
      %57 = arith.addf %54, %56 : vector<8x512xf32>
      %c0_44 = arith.constant 0 : index
      %c0_45 = arith.constant 0 : index
      %58 = vector.load %arg7[%c0_44, %c0_45] : memref<8x8xf32, #tpu.memory_space<vmem>>, vector<8x8xf32>
      %cst_46 = arith.constant dense<0.000000e+00> : vector<8x512xf32>
      %59 = tpu.matmul %58, %52, %cst_46 {dimension_numbers = #tpu.dot_dimension_numbers<[1], [0], [0], [1], [0, 0, 1, 1], [], []>} : vector<8x8xf32>, vector<8x512xf32>, vector<8x512xf32> -> vector<8x512xf32>
      %c0_47 = arith.constant 0 : index
      %c0_48 = arith.constant 0 : index
      %60 = vector.load %arg8[%c0_47, %c0_48] : memref<8x1xf32, #tpu.memory_space<vmem>>, vector<8x1xf32>
      %61 = vector.broadcast %60 : vector<8x1xf32> to vector<8x512xf32>
      %62 = arith.addf %59, %61 : vector<8x512xf32>
      %63 = arith.truncf %57 : vector<8x512xf32> to vector<8x512xbf16>
      %c0_49 = arith.constant 0 : index
      %c0_50 = arith.constant 0 : index
      %64 = vector.load %arg14[%c0_49, %c0_50] : memref<8x512xbf16, #tpu.memory_space<vmem>>, vector<8x512xbf16>
      tpu.vector_store %arg14[%c0_49, %c0_50], %63 {strides = array<i32>} : memref<8x512xbf16, #tpu.memory_space<vmem>>, vector<8x512xbf16>,
      %65 = arith.truncf %62 : vector<8x512xf32> to vector<8x512xbf16>
      %c0_51 = arith.constant 0 : index
      %c0_52 = arith.constant 0 : index
      %66 = vector.load %arg15[%c0_51, %c0_52] : memref<8x512xbf16, #tpu.memory_space<vmem>>, vector<8x512xbf16>
      tpu.vector_store %arg15[%c0_51, %c0_52], %65 {strides = array<i32>} : memref<8x512xbf16, #tpu.memory_space<vmem>>, vector<8x512xbf16>,
      %cst_53 = arith.constant 0.000000e+00 : f32
      %67 = vector.broadcast %cst_53 : f32 to vector<1x8x1xf32>
      %c0_54 = arith.constant 0 : index
      %c0_55 = arith.constant 0 : index
      %c0_56 = arith.constant 0 : index
      %68 = vector.load %arg12[%c0_54, %c0_55, %c0_56] : memref<1x8x1xf32, #tpu.memory_space<vmem>>, vector<1x8x1xf32>
      tpu.vector_store %arg12[%c0_54, %c0_55, %c0_56], %67 {strides = array<i32>} : memref<1x8x1xf32, #tpu.memory_space<vmem>>, vector<1x8x1xf32>,
      %cst_57 = arith.constant 0.000000e+00 : f32
      %69 = vector.broadcast %cst_57 : f32 to vector<1x8x1xf32>
      %c0_58 = arith.constant 0 : index
      %c0_59 = arith.constant 0 : index
      %c0_60 = arith.constant 0 : index
      %70 = vector.load %arg13[%c0_58, %c0_59, %c0_60] : memref<1x8x1xf32, #tpu.memory_space<vmem>>, vector<1x8x1xf32>
      tpu.vector_store %arg13[%c0_58, %c0_59, %c0_60], %69 {strides = array<i32>} : memref<1x8x1xf32, #tpu.memory_space<vmem>>, vector<1x8x1xf32>,
    } else {
    }
    %c256_i32 = arith.constant 256 : i32
    %3 = arith.muli %arg1, %c256_i32 : i32
    %4 = tpu.assume_multiple %3, 256 : i32
    %c0 = arith.constant 0 : index
    %c0_1 = arith.constant 0 : index
    %5 = arith.index_cast %4 : i32 to index
    %6 = vector.load %arg2[%c0, %c0_1, %5] : memref<1x8x512xf32, #tpu.memory_space<vmem>>, vector<1x8x256xf32>
    %7 = vector.shape_cast %6 : vector<1x8x256xf32> to vector<8x256xf32>
    %c0_2 = arith.constant 0 : index
    %c0_3 = arith.constant 0 : index
    %8 = vector.load %arg3[%c0_2, %c0_3] : memref<8x8xf32, #tpu.memory_space<vmem>>, vector<8x8xf32>
    %cst = arith.constant dense<0.000000e+00> : vector<8x256xf32>
    %9 = tpu.matmul %8, %7, %cst {dimension_numbers = #tpu.dot_dimension_numbers<[1], [0], [0], [1], [0, 0, 1, 1], [], []>} : vector<8x8xf32>, vector<8x256xf32>, vector<8x256xf32> -> vector<8x256xf32>
    %c0_4 = arith.constant 0 : index
    %c0_5 = arith.constant 0 : index
    %10 = vector.load %arg4[%c0_4, %c0_5] : memref<8x1xf32, #tpu.memory_space<vmem>>, vector<8x1xf32>
    %11 = vector.broadcast %10 : vector<8x1xf32> to vector<8x256xf32>
    %12 = arith.addf %9, %11 : vector<8x256xf32>
    %13 = tpu.transpose %12, [1, 0] : vector<8x256xf32> -> vector<256x8xf32>
    %14 = arith.truncf %13 : vector<256x8xf32> to vector<256x8xbf16>
    %c0_6 = arith.constant 0 : index
    %c0_7 = arith.constant 0 : index
    %15 = vector.load %arg14[%c0_6, %c0_7] : memref<8x512xbf16, #tpu.memory_space<vmem>>, vector<8x512xbf16>
    %cst_8 = arith.constant dense<0.000000e+00> : vector<256x512xf32>
    %16 = tpu.matmul %14, %15, %cst_8 {dimension_numbers = #tpu.dot_dimension_numbers<[1], [0], [0], [1], [0, 0, 1, 1], [], []>} : vector<256x8xbf16>, vector<8x512xbf16>, vector<256x512xf32> -> vector<256x512xf32>
    %cst_9 = arith.constant dense<0xFF800000> : vector<256xf32>
    %17 = vector.multi_reduction <maximumf>, %16, %cst_9 [1] : vector<256x512xf32> to vector<256xf32>
    %18 = vector.shape_cast %17 : vector<256xf32> to vector<256x1xf32>
    %19 = vector.broadcast %18 : vector<256x1xf32> to vector<256x512xf32>
    %20 = arith.subf %16, %19 : vector<256x512xf32>
    %21 = math.exp %20 : vector<256x512xf32>
    %cst_10 = arith.constant dense<0.000000e+00> : vector<256xf32>
    %22 = vector.multi_reduction <add>, %21, %cst_10 [1] : vector<256x512xf32> to vector<256xf32>
    %23 = vector.shape_cast %22 : vector<256xf32> to vector<256x1xf32>
    %24 = tpu.reciprocal %23 {approx = true} : vector<256x1xf32> -> vector<256x1xf32>
    %25 = vector.broadcast %24 : vector<256x1xf32> to vector<256x512xf32>
    %26 = arith.mulf %21, %25 : vector<256x512xf32>
    %27 = arith.truncf %26 : vector<256x512xf32> to vector<256x512xbf16>
    %c0_11 = arith.constant 0 : index
    %c0_12 = arith.constant 0 : index
    %28 = vector.load %arg15[%c0_11, %c0_12] : memref<8x512xbf16, #tpu.memory_space<vmem>>, vector<8x512xbf16>
    %cst_13 = arith.constant dense<0.000000e+00> : vector<8x256xf32>
    %29 = tpu.matmul %28, %27, %cst_13 {dimension_numbers = #tpu.dot_dimension_numbers<[1], [1], [0], [0], [0, 0, 1, 0], [], []>} : vector<8x512xbf16>, vector<256x512xbf16>, vector<8x256xf32> -> vector<8x256xf32>
    %c0_14 = arith.constant 0 : index
    %c0_15 = arith.constant 0 : index
    %30 = vector.load %arg9[%c0_14, %c0_15] : memref<8x8xf32, #tpu.memory_space<vmem>>, vector<8x8xf32>
    %cst_16 = arith.constant dense<0.000000e+00> : vector<8x256xf32>
    %31 = tpu.matmul %30, %29, %cst_16 {dimension_numbers = #tpu.dot_dimension_numbers<[1], [0], [0], [1], [0, 0, 1, 1], [], []>} : vector<8x8xf32>, vector<8x256xf32>, vector<8x256xf32> -> vector<8x256xf32>
    %c0_17 = arith.constant 0 : index
    %c0_18 = arith.constant 0 : index
    %32 = vector.load %arg10[%c0_17, %c0_18] : memref<8x1xf32, #tpu.memory_space<vmem>>, vector<8x1xf32>
    %33 = vector.broadcast %32 : vector<8x1xf32> to vector<8x256xf32>
    %34 = arith.addf %31, %33 : vector<8x256xf32>
    %c0_19 = arith.constant 0 : index
    %c0_20 = arith.constant 0 : index
    %c0_21 = arith.constant 0 : index
    %35 = vector.load %arg11[%c0_19, %c0_20, %c0_21] : memref<1x8x256xf32, #tpu.memory_space<vmem>>, vector<1x8x256xf32>
    %36 = vector.shape_cast %35 : vector<1x8x256xf32> to vector<8x256xf32>
    %37 = vector.shape_cast %34 : vector<8x256xf32> to vector<1x8x256xf32>
    tpu.vector_store %arg11[%c0_19, %c0_20, %c0_21], %37 {strides = array<i32>} : memref<1x8x256xf32, #tpu.memory_space<vmem>>, vector<1x8x256xf32>,
    %cst_22 = arith.constant dense<0.000000e+00> : vector<8xf32>
    %38 = vector.multi_reduction <add>, %34, %cst_22 [1] : vector<8x256xf32> to vector<8xf32>
    %39 = vector.shape_cast %38 : vector<8xf32> to vector<8x1xf32>
    %40 = arith.mulf %34, %34 : vector<8x256xf32>
    %cst_23 = arith.constant dense<0.000000e+00> : vector<8xf32>
    %41 = vector.multi_reduction <add>, %40, %cst_23 [1] : vector<8x256xf32> to vector<8xf32>
    %42 = vector.shape_cast %41 : vector<8xf32> to vector<8x1xf32>
    %c0_24 = arith.constant 0 : index
    %c0_25 = arith.constant 0 : index
    %c0_26 = arith.constant 0 : index
    %43 = vector.load %arg12[%c0_24, %c0_25, %c0_26] : memref<1x8x1xf32, #tpu.memory_space<vmem>>, vector<1x8x1xf32>
    %44 = vector.shape_cast %39 : vector<8x1xf32> to vector<1x8x1xf32>
    %45 = arith.addf %43, %44 : vector<1x8x1xf32>
    %c0_27 = arith.constant 0 : index
    %c0_28 = arith.constant 0 : index
    %c0_29 = arith.constant 0 : index
    %46 = vector.load %arg12[%c0_27, %c0_28, %c0_29] : memref<1x8x1xf32, #tpu.memory_space<vmem>>, vector<1x8x1xf32>
    tpu.vector_store %arg12[%c0_27, %c0_28, %c0_29], %45 {strides = array<i32>} : memref<1x8x1xf32, #tpu.memory_space<vmem>>, vector<1x8x1xf32>,
    %c0_30 = arith.constant 0 : index
    %c0_31 = arith.constant 0 : index
    %c0_32 = arith.constant 0 : index
    %47 = vector.load %arg13[%c0_30, %c0_31, %c0_32] : memref<1x8x1xf32, #tpu.memory_space<vmem>>, vector<1x8x1xf32>
    %48 = vector.shape_cast %42 : vector<8x1xf32> to vector<1x8x1xf32>
    %49 = arith.addf %47, %48 : vector<1x8x1xf32>
    %c0_33 = arith.constant 0 : index
    %c0_34 = arith.constant 0 : index
    %c0_35 = arith.constant 0 : index
    %50 = vector.load %arg13[%c0_33, %c0_34, %c0_35] : memref<1x8x1xf32, #tpu.memory_space<vmem>>, vector<1x8x1xf32>
    tpu.vector_store %arg13[%c0_33, %c0_34, %c0_35], %49 {strides = array<i32>} : memref<1x8x1xf32, #tpu.memory_space<vmem>>, vector<1x8x1xf32>,
    return
  }
  func.func @transform_0(%arg0: i32, %arg1: i32) -> (i32, i32, i32) {
    %c0_i32 = arith.constant 0 : i32
    %c0_i32_0 = arith.constant 0 : i32
    %c0_i32_1 = arith.constant 0 : i32
    return %arg0, %c0_i32, %c0_i32_0 : i32, i32, i32
  }
  func.func @transform_1(%arg0: i32, %arg1: i32) -> (i32, i32) {
    %c0_i32 = arith.constant 0 : i32
    %c0_i32_0 = arith.constant 0 : i32
    %c0_i32_1 = arith.constant 0 : i32
    return %c0_i32, %c0_i32_0 : i32, i32
  }
  func.func @transform_2(%arg0: i32, %arg1: i32) -> (i32, i32) {
    %c0_i32 = arith.constant 0 : i32
    %c0_i32_0 = arith.constant 0 : i32
    %c0_i32_1 = arith.constant 0 : i32
    return %c0_i32, %c0_i32_0 : i32, i32
  }
  func.func @transform_3(%arg0: i32, %arg1: i32) -> (i32, i32) {
    %c0_i32 = arith.constant 0 : i32
    %c0_i32_0 = arith.constant 0 : i32
    %c0_i32_1 = arith.constant 0 : i32
    return %c0_i32, %c0_i32_0 : i32, i32
  }
  func.func @transform_4(%arg0: i32, %arg1: i32) -> (i32, i32) {
    %c0_i32 = arith.constant 0 : i32
    %c0_i32_0 = arith.constant 0 : i32
    %c0_i32_1 = arith.constant 0 : i32
    return %c0_i32, %c0_i32_0 : i32, i32
  }
  func.func @transform_5(%arg0: i32, %arg1: i32) -> (i32, i32) {
    %c0_i32 = arith.constant 0 : i32
    %c0_i32_0 = arith.constant 0 : i32
    %c0_i32_1 = arith.constant 0 : i32
    return %c0_i32, %c0_i32_0 : i32, i32
  }
  func.func @transform_6(%arg0: i32, %arg1: i32) -> (i32, i32) {
    %c0_i32 = arith.constant 0 : i32
    %c0_i32_0 = arith.constant 0 : i32
    %c0_i32_1 = arith.constant 0 : i32
    return %c0_i32, %c0_i32_0 : i32, i32
  }
  func.func @transform_7(%arg0: i32, %arg1: i32) -> (i32, i32) {
    %c0_i32 = arith.constant 0 : i32
    %c0_i32_0 = arith.constant 0 : i32
    %c0_i32_1 = arith.constant 0 : i32
    return %c0_i32, %c0_i32_0 : i32, i32
  }
  func.func @transform_8(%arg0: i32, %arg1: i32) -> (i32, i32) {
    %c0_i32 = arith.constant 0 : i32
    %c0_i32_0 = arith.constant 0 : i32
    %c0_i32_1 = arith.constant 0 : i32
    return %c0_i32, %c0_i32_0 : i32, i32
  }
  func.func @transform_9(%arg0: i32, %arg1: i32) -> (i32, i32, i32) {
    %c0_i32 = arith.constant 0 : i32
    %c0_i32_0 = arith.constant 0 : i32
    return %arg0, %c0_i32, %arg1 : i32, i32, i32
  }
  func.func @transform_10(%arg0: i32, %arg1: i32) -> (i32, i32, i32) {
    %c0_i32 = arith.constant 0 : i32
    %c0_i32_0 = arith.constant 0 : i32
    %c0_i32_1 = arith.constant 0 : i32
    return %arg0, %c0_i32, %c0_i32_0 : i32, i32, i32
  }
  func.func @transform_11(%arg0: i32, %arg1: i32) -> (i32, i32, i32) {
    %c0_i32 = arith.constant 0 : i32
    %c0_i32_0 = arith.constant 0 : i32
    %c0_i32_1 = arith.constant 0 : i32
    return %arg0, %c0_i32, %c0_i32_0 : i32, i32, i32
  }
}

</mosaic_0001>

<bundles_post_ra>
// kernel: tpu_custom_call.1
= control target key start
LH: loop header
LB: loop body
LE: loop exit
PB: predicated region body
PF: predicated region fallthrough
CT: control target
= control target key end

     0   :  { %s4676_s0 = inlined_call_operand.hbm [shape: f32[2,8,512], index: 0, kind: input, shape index: {}]   ;;  %s4677_s1 = inlined_call_operand.vmem [shape: f32[8,8], index: 1, kind: input, shape index: {}]   ;;  %s4678_s2 = inlined_call_operand.vmem [shape: f32[8,1], index: 2, kind: input, shape index: {}]   ;;  %s4679_s3 = inlined_call_operand.vmem [shape: f32[8,8], index: 3, kind: input, shape index: {}]   ;;  %s4680_s4 = inlined_call_operand.vmem [shape: f32[8,1], index: 4, kind: input, shape index: {}]   ;;  %s4681_s5 = inlined_call_operand.vmem [shape: f32[8,8], index: 5, kind: input, shape index: {}]   ;;  %s4682_s6 = inlined_call_operand.vmem [shape: f32[8,1], index: 6, kind: input, shape index: {}]   ;;  %s4683_s7 = inlined_call_operand.vmem [shape: f32[8,8], index: 7, kind: input, shape index: {}]   ;;  %s4684_s8 = inlined_call_operand.vmem [shape: f32[8,1], index: 8, kind: input, shape index: {}]   ;;  %s4685_s9 = inlined_call_operand.hbm [shape: f32[2,8,512], index: 9, kind: output, shape index: {0}]   ;;  %s4686_s10 = inlined_call_operand.vmem [shape: f32[2,8,1], index: 10, kind: output, shape index: {1}]   ;;  %s4687_s11 = inlined_call_operand.vmem [shape: f32[2,8,1], index: 11, kind: output, shape index: {2}]  }
   0x1   :  { %4860 = sst [smem:[#allocation105_spill]] %s4677_s1 }
   0x2   :  { %4861 = sst [smem:[#allocation106_spill]] %s4678_s2 }
   0x3   :  { %4862 = sst [smem:[#allocation107_spill]] %s4683_s7 }
   0x4   :  { %4863 = sst [smem:[#allocation108_spill]] %s4684_s8 }
   0x5   :  { %4864 = sst [smem:[#allocation109_spill]] %s4685_s9 }
   0x6   :  { %17 = vsyncpa [#allocation5], 0 }
   0x7   :  { %19 = vsyncpa [#allocation5 + $0x1], 0 }
   0x8   :  { %20 = vsyncpa [#allocation6], 0 }
   0x9   :  { %22 = vsyncpa [#allocation6 + $0x1], 0  ;;  %s3235_s17 = smov 0   ;;  %s3237_s18 = smov 0  }
   0xa   :  { %s3239_s19 = smov 0   ;;  %s3241_s20 = smov 0  }
   0xb   :  { %s3243_s21 = smov 0   ;;  %s3245_s22 = smov 0  }
   0xc   :  { %s3247_s23 = smov 0   ;;  %s3249_s24 = smov 0  }
   0xd   :  { %s3251_s25 = smov 0   ;;  %s3253_s26 = smov 0  }
   0xe   :  { %s3255_s27 = smov 0  }
   0xf LB: > { %4865 = sst [smem:[#allocation10_spill]] %s3150_s22  ;;  %s2491_s28 = sadd.s32 4294967295, %s3170_s27   ;;  %s3170_s27 = sphi %s3255_s27, %s28_s27   ;;  %s3166_s26 = sphi %s3253_s26, %s5253_s26   ;;  %s3162_s25 = sphi %s3251_s25, %s5252_s25   ;;  %s3158_s24 = sphi %s3249_s24, %s5244_s24   ;;  %s3154_s23 = sphi %s3247_s23, %s5243_s23   ;;  %s3150_s22 = sphi %s3245_s22, %s5242_s22   ;;  %s3146_s21 = sphi %s3243_s21, %s5251_s21   ;;  %s3142_s20 = sphi %s3241_s20, %s5250_s20   ;;  %s3138_s19 = sphi %s3239_s19, %s5249_s19   ;;  %s3134_s18 = sphi %s3237_s18, %s5248_s18   ;;  %s3130_s17 = sphi %s3235_s17, %s5247_s17  }
  0x10   : > { %4866 = sst [smem:[#allocation11_spill]] %s3162_s25  ;;  %s2492_s29 = sadd.s32 4294967294, %s3170_s27  }
  0x11   : > { %4867 = sst [smem:[#allocation12_spill]] %s3166_s26  ;;  %s37_s30 = sadd.s32 1, %s3162_s25 }
  0x12   : > { %s40_s12 = sadd.s32 1, %s3166_s26  ;;  %p38_p0 = scmp.ge.s32.totalorder %s37_s30, 2 }
  0x13   : > { %s47_s13 = sadd.s32 1, %s3150_s22  ;;  %p54_p1 = scmp.ne.s32.totalorder %s3150_s22, %s3146_s21 }
  0x14   : > { %p55_p2 = scmp.eq.s32.totalorder %s3170_s27, 0  ;;  %s5255_s30 = smov (%p38_p0, %s37_s30), 0 }
  0x15   : > { %4868 = sst [smem:[#allocation13_spill]] %s5255_s30  ;;  %s5257_s12 = smov (!%p38_p0, %s40_s12), %s3166_s26 }
  0x16   : > { %p3299_p3 = por %p55_p2, %p54_p1  ;;  %p60_p4 = scmp.ne.s32.totalorder %s3146_s21, %s3142_s20 }
  0x17   : > { %p42_p5 = scmp.ge.s32.totalorder %s5257_s12, 2  ;;  %p61_p6 = scmp.eq.s32.totalorder %s2491_s28, 0 }
  0x18   : > { %s239_s15 = ssub.s32 %s3162_s25, %s5255_s30  ;;  %s243_s16 = sadd.s32 1, %s3138_s19 }
  0x19   : > { %s5259_s12 = smov (%p42_p5, %s5257_s12), 0  ;;  %p3309_p7 = por %p61_p6, %p60_p4 }
  0x1a   : > { %4870 = sst [smem:[#allocation14_spill]] %s5259_s12  ;;  %p253_p8 = scmp.ne.s32.totalorder %s3138_s19, %s3134_s18 }
  0x1b   : > { %s44_s8 = ssub.s32 %s3166_s26, %s5259_s12  ;;  %p254_p9 = scmp.eq.s32.totalorder %s2491_s28, 3 }
  0x1c   : > { %p45_p10 = scmp.eq.s32.totalorder %s44_s8, 0  ;;  %s240_s20 = sor.u32 %s239_s15, %s44_s8 }
  0x1d   : > { %p241_p11 = scmp.eq.s32.totalorder %s240_s20, 0  ;;  %p3317_p12 = por %p254_p9, %p253_p8 }
  0x1e   : > { %s3322_s30 = scalar_select %p45_p10, %s3150_s22, %s47_s13  }
  0x1f   : > { %s4872_s7 = scalar_select %p3317_p12, 1, 0 }
  0x20   : > { %4874 = sst [smem:[#allocation16_spill]] %s3322_s30  ;;  %p259_p13 = scmp.ne.s32.totalorder %s3134_s18, %s3130_s17 }
  0x21   : > { %4873 = sst [smem:[#allocation15_spill]] %s4872_s7  ;;  %p260_p0 = scmp.eq.s32.totalorder %s2492_s29, 3 }
  0x22   : > { %s3325_s25 = scalar_select %p241_p11, %s3138_s19, %s243_s16  }
  0x23   : > { %p2601_p1 = scmp.lt.s32.totalorder %s3170_s27, 4  ;;  %p3330_p2 = por %p260_p0, %p259_p13 }
  0x24   : > { %s356_s8 = sand.u32 1, %s3150_s22   ;;  %s2588_s15 = sshll.u32 %s3166_s26, 5 }
  0x25   : > { %s2495_s28 = sshll.u32 %s356_s8, 5  ;;  %s365_s7 = scalar_lea.hbm %s4676_s0, %s2588_s15 }
  0x26   : > { %s360_s13 = scalar_lea.vmem [#allocation4], %s2495_s28  ;;  %s367_s2 = sshll.u32 %s365_s7, 4  ;;  %s368_s2 = int_to_ptr.hbm [resolvable:$true] %s367_s2 }
  0x27   : > { %s369_s30 = sshll.u32 %s360_s13, 4  ;;  %p2594_p4 = pnand %p2601_p1, %p3299_p3  ;;  %s370_s30 = int_to_ptr.vmem [resolvable:$true] %s369_s30 }
  0x28   : > { %p2498_p5 = scmp.ge.s32.totalorder %s3170_s27, 1  ;;  %p374_p6 = scmp.lt.s32.totalorder %s3170_s27, 5 }
  0x29   : > { %s357_s29 = scalar_lea.sflag [#allocation5], %s356_s8 }
  0x2a   : > { %2596 = dma.hbm_to_vmem [thread:$0]  (!%p2594_p4), %s368_s2, 512, %s370_s30, %s357_s29  }
  0x2b   : > { %p375_p8 = pnand %p2498_p5, %p374_p6 }
  0x2d   : > { %378 = sbr.rel (%p375_p8) target bundleno = 1773 (0x6ed), region = 56 }
  0x32   : > { %s380_s16 = sand.u32 1, %s3146_s21  }
  0x33   : > { %s2499_s26 = sshll.u32 %s380_s16, 5  ;;  %s381_s22 = scalar_lea.sflag [#allocation5], %s380_s16 }
  0x34   : > { %s3344_s1 = scalar_lea.vmem [#allocation4], %s2499_s26 }
  0x35   : > { %3121 = dma.done.wait (%p3309_p7), %s381_s22, 512  }
  0x36   : > { %3123 = vsyncadd (%p3309_p7), %s381_s22, 4294966784  ;;  %s417_s7 = sand.u32 1, %s3134_s18   ;;  %p433_p3 = scmp.lt.s32.totalorder %s3158_s24, 1 }
  0x37   : > { %s2500_s2 = sshll.u32 %s417_s7, 4  ;;  %p2503_p7 = scmp.ne.s32.totalorder %s3154_s23, 0 }
  0x38   : > { %s434_s30 = scalar_select %p433_p3, %s3158_s24, 1 }
  0x39   : > { %s3365_s22 = scalar_lea.vmem [#allocation7], %s2500_s2  ;;  %445 = sbr.rel (%p2503_p7) target bundleno = 211 (0xd3), region = 64 }
  0x3a   : > { %s2501_s14 = sshll.u32 %s434_s30, 3 }
  0x3b   : > { %s3358_s26 = scalar_lea.vmem %s4686_s10, %s2501_s14  ;;  %s3363_s9 = scalar_lea.vmem %s4687_s11, %s2501_s14 }
  0x3e   : > { %v446_v0 = vld [vmem:[%s3344_s1] sm:$0xff]  ;;  %v447_v1 = vld [vmem:[%s3344_s1 + $0x8] sm:$0xff]  ;;  %v448_v2 = vld [vmem:[%s3344_s1 + $0x10] sm:$0xff]  ;;  %vm457_vm0 = vcmask 64512   ;;  %v3172_v6 = vmov 0   ;;  %vm639_vm1 = vcmask 7168  }
  0x3f   : > { %476 = vmatpush.msra.mxu0 %v446_v0  ;;  %496 = vmatpush.msra.mxu1 %v447_v1  ;;  %v449_v3 = vld [vmem:[%s3344_s1 + $0x18] sm:$0xff]  ;;  %v450_v4 = vld [vmem:[%s4679_s3] sm:$0xff]  ;;  %v3173_v9 = vmov 0.0  }
  0x40   : > { %516 = vmatpush.msra.mxu2 %v448_v2  ;;  %536 = vmatpush.msra.mxu3 %v449_v3  ;;  %v451_v5 = vld [vmem:[%s4680_s4] sm:$0xff]  ;;  %640 = vst.msk [vmem:[%s3358_s26] sm:$0xff] %vm639_vm1, %v3173_v9 }
  0x41   : > { %2504 = vmatmul.msk.f32.vlgmr.msra.gmra.mxu0 %vm457_vm0, %v450_v4  ;;  %2505 = vmatmul.msk.f32.vlgmr.msra.gmra.mxu1 %vm457_vm0, %v450_v4  ;;  %v541_v7 = vld [vmem:[%s4681_s5] sm:$0xff]  ;;  %641 = vst.msk [vmem:[%s3363_s9] sm:$0xff] %vm639_vm1, %v3173_v9 }
  0x42   : > { %2506 = vmatmul.msk.f32.vlgmr.msra.gmra.mxu2 %vm457_vm0, %v450_v4  ;;  %2507 = vmatmul.msk.f32.vlgmr.msra.gmra.mxu3 %vm457_vm0, %v450_v4  ;;  %v542_v8 = vld [vmem:[%s4682_s6] sm:$0xff] }
  0x43   : > { %606 = vmatpush.msrb.mxu2 %v448_v2  ;;  %626 = vmatpush.msrb.mxu3 %v449_v3 }
  0x44   : > { %566 = vmatpush.msrb.mxu0 %v446_v0  ;;  %586 = vmatpush.msrb.mxu1 %v447_v1 }
  0x45   : > { %2695 = vset.pattern.permute.xlu0 %v3172_v6 }
  0x46   : > { %454 = vperm.xlu0 %2695, %v451_v5  }
  0x49   : > { %2508 = vmatmul.msk.f32.vlgmr.msrb.gmra.mxu0 %vm457_vm0, %v541_v7  ;;  %2509 = vmatmul.msk.f32.vlgmr.msrb.gmra.mxu1 %vm457_vm0, %v541_v7 }
  0x4a   : > { %2510 = vmatmul.msk.f32.vlgmr.msrb.gmra.mxu2 %vm457_vm0, %v541_v7  ;;  %2511 = vmatmul.msk.f32.vlgmr.msrb.gmra.mxu3 %vm457_vm0, %v541_v7 }
  0x4e   : > { %545 = vperm.xlu0 %2695, %v542_v8  }
  0xb8   : > { %v455_v10 = vpop.permute.xlu0 %454 }
  0xbe   : > { %v478_v11 = vpop.f32.mrf.mxu0  ;;  %v498_v12 = vpop.f32.mrf.mxu1 }
  0xbf   : > { %v479_v13 = vadd.f32 %v478_v11, %v455_v10  ;;  %v499_v14 = vadd.f32 %v498_v12, %v455_v10 }
  0xc0   : > { %v546_v16 = vpop.permute.xlu0 %545 }
  0xc1   : > { %v631_v15 = vpack.c.bf16 %v499_v14, %v479_v13 }
  0xc3   : > { %633 = vst [vmem:[#allocation2] sm:$0xff] %v631_v15 }
  0xc5   : > { %v518_v17 = vpop.f32.mrf.mxu2  ;;  %v538_v18 = vpop.f32.mrf.mxu3 }
  0xc6   : > { %v519_v19 = vadd.f32 %v518_v17, %v455_v10  ;;  %v539_v20 = vadd.f32 %v538_v18, %v455_v10  ;;  %v568_v21 = vpop.f32.mrf.mxu0  ;;  %v588_v22 = vpop.f32.mrf.mxu1 }
  0xc7   : > { %v569_v23 = vadd.f32 %v568_v21, %v546_v16  ;;  %v589_v24 = vadd.f32 %v588_v22, %v546_v16 }
  0xc8   : > { %v632_v25 = vpack.c.bf16 %v539_v20, %v519_v19 }
  0xc9   : > { %v635_v26 = vpack.c.bf16 %v589_v24, %v569_v23 }
  0xca   : > { %634 = vst [vmem:[#allocation2 + $0x8] sm:$0xff] %v632_v25 }
  0xcb   : > { %637 = vst [vmem:[#allocation3 + $0x8] sm:$0xff] %v635_v26 }
  0xcd   : > { %v608_v27 = vpop.f32.mrf.mxu2  ;;  %v628_v28 = vpop.f32.mrf.mxu3 }
  0xce   : > { %v609_v29 = vadd.f32 %v608_v27, %v546_v16  ;;  %v629_v30 = vadd.f32 %v628_v28, %v546_v16 }
  0xd0   : > { %v636_v31 = vpack.c.bf16 %v629_v30, %v609_v29 }
  0xd2   : > { %638 = vst [vmem:[#allocation3] sm:$0xff] %v636_v31 }
  0xd3 PF: > { %s2512_s15 = sshll.u32 %s3154_s23, 8  ;;  %s4876_s29 = sld [smem:[#allocation106_spill]]  ;;  %v3174_v33 = vmov 0   ;;  %vm656_vm2 = vcmask 64512   ;;  %v780_v42 = vld [vmem:[#allocation2] sm:$0xff]  ;;  %v781_v43 = vld [vmem:[#allocation2 + $0x8] sm:$0xff] }
  0xd4   : > { %s643_s16 = sshra.s32 %s2512_s15, 7  ;;  %2696 = vset.pattern.permute.xlu0 %v3174_v33  ;;  %2697 = vset.pattern.permute.xlu2 %v3174_v33  ;;  %s4877_s28 = sld [smem:[#allocation105_spill]]  ;;  %v784_v44 = vunpack.c.l.b16 %v780_v42  ;;  %v785_v45 = vunpack.c.h.b16 %v780_v42  ;;  %v786_v46 = vunpack.c.l.b16 %v781_v43  ;;  %v787_v47 = vunpack.c.h.b16 %v781_v43 }
  0xd5   : > { %s2513_s2 = sshll.u32 %s643_s16, 3  ;;  %vm840_vm3 = vcmask 1043456   ;;  %s5237_s20 = sld [smem:[#allocation107_spill]] }
  0xd6   : > { %s646_s30 = scalar_lea.vmem %s3344_s1, %s2513_s2 [#allocation4]  ;;  %v788_v48 = vpack.c.b16 %v784_v44, %v784_v44  ;;  %v789_v49 = vpack.c.b16 %v785_v45, %v785_v45  ;;  %v790_v50 = vpack.c.b16 %v786_v46, %v786_v46  ;;  %v791_v51 = vpack.c.b16 %v787_v47, %v787_v47  ;;  %s5238_s16 = sld [smem:[#allocation108_spill]] }
  0xd7   : > { %v647_v35 = vld [vmem:[%s646_s30] sm:$0xff]  ;;  %v648_v36 = vld [vmem:[%s646_s30 + $0x8] sm:$0xff]  ;;  %s2583_s2 = sshll.u32 %s3154_s23, 1  ;;  %s2584_s30 = sshll.u32 %s3158_s24, 2 }
  0xd8   : > { %675 = vmatpush.msra.mxu0 %v647_v35  ;;  %695 = vmatpush.msra.mxu1 %v648_v36  ;;  %v842_v52 = vsel %vm840_vm3, %v788_v48, 0  ;;  %v845_v53 = vsel %vm840_vm3, %v789_v49, 0  ;;  %v848_v54 = vsel %vm840_vm3, %v790_v50, 0  ;;  %v851_v55 = vsel %vm840_vm3, %v791_v51, 0  ;;  %s2348_s14 = sshll.u32 %s3365_s22, 4  ;;  %s2344_s8 = sadd.s32 %s2584_s30, %s2583_s2  ;;  %s2349_s14 = int_to_ptr.vmem [resolvable:$true] %s2348_s14 }
  0xd9   : > { %v650_v32 = vld [vmem:[%s4876_s29] sm:$0xff]  ;;  %860 = vmatpush.bf16.msra.mxu2 %v842_v52  ;;  %949 = vmatpush.bf16.msra.mxu3 %v845_v53  ;;  %s2585_s1 = sshll.u32 %s2344_s8, 3  ;;  %s5240_s13 = sld [smem:[#allocation109_spill]] }
  0xda   : > { %653 = vperm.xlu0 %2696, %v650_v32   ;;  %v649_v34 = vld [vmem:[%s4877_s28] sm:$0xff]  ;;  %1038 = vmatpush.bf16.msrb.mxu0 %v848_v54  ;;  %s2325_s23 = scalar_lea.sflag [#allocation6], %s417_s7 }
  0xdb   : > { %2514 = vmatmul.msk.f32.vlgmr.msra.gmra.mxu0 %vm656_vm2, %v649_v34  ;;  %2515 = vmatmul.msk.f32.vlgmr.msra.gmra.mxu1 %vm656_vm2, %v649_v34 }
  0xdc   : > { %1127 = vmatpush.bf16.msrb.mxu1 %v851_v55 }
  0xdf   : > { %s2346_s29 = scalar_lea.hbm %s5240_s13, %s2585_s1  ;;  %s3068_s15 = scalar_lea.hbm %s5240_s13, 64 }
 0x14c   : > { %v654_v37 = vpop.permute.xlu0 %653 }
 0x158   : > { %v677_v38 = vpop.f32.mrf.mxu0  ;;  %v697_v39 = vpop.f32.mrf.mxu1 }
 0x159   : > { %v678_v40 = vadd.f32 %v677_v38, %v654_v37  ;;  %v698_v41 = vadd.f32 %v697_v39, %v654_v37 }
 0x15b   : > { %732 = vxpose.xlu1.b32.start.end [1/1] (short) %v698_v41, 128  ;;  %700 = vxpose.xlu0.b32.start.end [1/1] (short) %v678_v40, 128 }
 0x1ff   : > { %v716_v56 = vpop.trf.xlu0  ;;  %v748_v10 = vpop.trf.xlu1 }
 0x207   : > { %v717_v57 = vpop.trf.xlu0  ;;  %v749_v12 = vpop.trf.xlu1 }
 0x208   : > { %v764_v58 = vpack.c.bf16 %v717_v57, %v716_v56  ;;  %v772_v21 = vpack.c.bf16 %v749_v12, %v748_v10 }
 0x20a   : > { %2516 = vmatmul.msk.bf16.vlgmr.msra.gmra.mxu2 %vm656_vm2, %v764_v58  ;;  %2532 = vmatmul.msk.bf16.vlgmr.msra.gmra.mxu3 %vm656_vm2, %v764_v58 }
 0x20b   : > { %2548 = vmatmul.msk.bf16.vlgmr.msrb.gmra.mxu0 %vm656_vm2, %v764_v58  ;;  %2564 = vmatmul.msk.bf16.vlgmr.msrb.gmra.mxu1 %vm656_vm2, %v764_v58 }
 0x20f   : > { %v718_v59 = vpop.trf.xlu0  ;;  %v750_v15 = vpop.trf.xlu1 }
 0x217   : > { %v719_v60 = vpop.trf.xlu0  ;;  %v751_v17 = vpop.trf.xlu1 }
 0x218   : > { %v765_v61 = vpack.c.bf16 %v719_v60, %v718_v59  ;;  %v773_v32 = vpack.c.bf16 %v751_v17, %v750_v15 }
 0x21a   : > { %2517 = vmatmul.msk.bf16.gmra.mxu2 %vm656_vm2, %v765_v61  ;;  %2533 = vmatmul.msk.bf16.gmra.mxu3 %vm656_vm2, %v765_v61 }
 0x21b   : > { %2549 = vmatmul.msk.bf16.gmra.mxu0 %vm656_vm2, %v765_v61  ;;  %2565 = vmatmul.msk.bf16.gmra.mxu1 %vm656_vm2, %v765_v61 }
 0x21f   : > { %v720_v62 = vpop.trf.xlu0  ;;  %v752_v20 = vpop.trf.xlu1 }
 0x227   : > { %v721_v63 = vpop.trf.xlu0  ;;  %v753_v24 = vpop.trf.xlu1 }
 0x228   : > { %v766_v0 = vpack.c.bf16 %v721_v63, %v720_v62  ;;  %v774_v42 = vpack.c.bf16 %v753_v24, %v752_v20 }
 0x22a   : > { %2518 = vmatmul.msk.bf16.gmra.mxu2 %vm656_vm2, %v766_v0  ;;  %2534 = vmatmul.msk.bf16.gmra.mxu3 %vm656_vm2, %v766_v0 }
 0x22b   : > { %2550 = vmatmul.msk.bf16.gmra.mxu0 %vm656_vm2, %v766_v0  ;;  %2566 = vmatmul.msk.bf16.gmra.mxu1 %vm656_vm2, %v766_v0 }
 0x22f   : > { %v722_v1 = vpop.trf.xlu0  ;;  %v754_v29 = vpop.trf.xlu1 }
 0x237   : > { %v723_v2 = vpop.trf.xlu0  ;;  %v755_v37 = vpop.trf.xlu1 }
 0x238   : > { %v767_v3 = vpack.c.bf16 %v723_v2, %v722_v1  ;;  %v775_v53 = vpack.c.bf16 %v755_v37, %v754_v29 }
 0x23a   : > { %2519 = vmatmul.msk.bf16.gmra.mxu2 %vm656_vm2, %v767_v3  ;;  %2535 = vmatmul.msk.bf16.gmra.mxu3 %vm656_vm2, %v767_v3 }
 0x23b   : > { %2551 = vmatmul.msk.bf16.gmra.mxu0 %vm656_vm2, %v767_v3  ;;  %2567 = vmatmul.msk.bf16.gmra.mxu1 %vm656_vm2, %v767_v3 }
 0x23f   : > { %v724_v4 = vpop.trf.xlu0  ;;  %v756_v45 = vpop.trf.xlu1 }
 0x247   : > { %v725_v5 = vpop.trf.xlu0  ;;  %v757_v50 = vpop.trf.xlu1 }
 0x248   : > { %v768_v6 = vpack.c.bf16 %v725_v5, %v724_v4  ;;  %v776_v63 = vpack.c.bf16 %v757_v50, %v756_v45 }
 0x24a   : > { %2520 = vmatmul.msk.bf16.gmra.mxu2 %vm656_vm2, %v768_v6  ;;  %2536 = vmatmul.msk.bf16.gmra.mxu3 %vm656_vm2, %v768_v6 }
 0x24b   : > { %2552 = vmatmul.msk.bf16.gmra.mxu0 %vm656_vm2, %v768_v6  ;;  %2568 = vmatmul.msk.bf16.gmra.mxu1 %vm656_vm2, %v768_v6 }
 0x24f   : > { %v726_v7 = vpop.trf.xlu0  ;;  %v758_v58 = vpop.trf.xlu1 }
 0x257   : > { %v727_v8 = vpop.trf.xlu0  ;;  %v759_v2 = vpop.trf.xlu1 }
 0x258   : > { %v769_v9 = vpack.c.bf16 %v727_v8, %v726_v7  ;;  %v777_v10 = vpack.c.bf16 %v759_v2, %v758_v58 }
 0x25a   : > { %2521 = vmatmul.msk.bf16.gmra.mxu2 %vm656_vm2, %v769_v9  ;;  %2537 = vmatmul.msk.bf16.gmra.mxu3 %vm656_vm2, %v769_v9 }
 0x25b   : > { %2553 = vmatmul.msk.bf16.gmra.mxu0 %vm656_vm2, %v769_v9  ;;  %2569 = vmatmul.msk.bf16.gmra.mxu1 %vm656_vm2, %v769_v9 }
 0x25f   : > { %v728_v11 = vpop.trf.xlu0  ;;  %v760_v7 = vpop.trf.xlu1 }
 0x267   : > { %v729_v13 = vpop.trf.xlu0  ;;  %v761_v15 = vpop.trf.xlu1 }
 0x268   : > { %v770_v14 = vpack.c.bf16 %v729_v13, %v728_v11  ;;  %v778_v20 = vpack.c.bf16 %v761_v15, %v760_v7 }
 0x26a   : > { %2522 = vmatmul.msk.bf16.gmra.mxu2 %vm656_vm2, %v770_v14  ;;  %2538 = vmatmul.msk.bf16.gmra.mxu3 %vm656_vm2, %v770_v14 }
 0x26b   : > { %2554 = vmatmul.msk.bf16.gmra.mxu0 %vm656_vm2, %v770_v14  ;;  %2570 = vmatmul.msk.bf16.gmra.mxu1 %vm656_vm2, %v770_v14 }
 0x26f   : > { %v730_v16 = vpop.trf.xlu0  ;;  %v762_v29 = vpop.trf.xlu1 }
 0x277   : > { %v731_v18 = vpop.trf.xlu0 }
 0x278   : > { %v771_v19 = vpack.c.bf16 %v731_v18, %v730_v16 }
 0x27a   : > { %2523 = vmatmul.msk.bf16.gmra.mxu2 %vm656_vm2, %v771_v19  ;;  %2539 = vmatmul.msk.bf16.gmra.mxu3 %vm656_vm2, %v771_v19 }
 0x27b   : > { %2555 = vmatmul.msk.bf16.gmra.mxu0 %vm656_vm2, %v771_v19  ;;  %2571 = vmatmul.msk.bf16.gmra.mxu1 %vm656_vm2, %v771_v19 }
 0x288   : > { %v3436_v22 = vpop.f32.mrf.mxu0  ;;  %v3438_v23 = vpop.f32.mrf.mxu1 }
 0x289   : > { %4878 = vst [vmem:[#allocation17_spill] sm:$0xff] %v3436_v22 }
 0x28a   : > { %4879 = vst [vmem:[#allocation18_spill] sm:$0xff] %v3438_v23  ;;  %2524 = vmatmul.msk.bf16.gmra.mxu2 %vm656_vm2, %v772_v21  ;;  %2540 = vmatmul.msk.bf16.gmra.mxu3 %vm656_vm2, %v772_v21 }
 0x28b   : > { %2556 = vmatmul.msk.bf16.gmra.mxu0 %vm656_vm2, %v772_v21  ;;  %2572 = vmatmul.msk.bf16.gmra.mxu1 %vm656_vm2, %v772_v21 }
 0x28d   : > { %v3444_v25 = vpop.f32.mrf.mxu2  ;;  %v3446_v26 = vpop.f32.mrf.mxu3 }
 0x28e   : > { %4880 = vst [vmem:[#allocation19_spill] sm:$0xff] %v3444_v25 }
 0x28f   : > { %4881 = vst [vmem:[#allocation20_spill] sm:$0xff] %v3446_v26 }
 0x290   : > { %v3448_v27 = vpop.f32.mrf.mxu0  ;;  %v3450_v28 = vpop.f32.mrf.mxu1 }
 0x291   : > { %4882 = vst [vmem:[#allocation21_spill] sm:$0xff] %v3448_v27 }
 0x292   : > { %4883 = vst [vmem:[#allocation22_spill] sm:$0xff] %v3450_v28 }
 0x295   : > { %v3452_v30 = vpop.f32.mrf.mxu2  ;;  %v3454_v31 = vpop.f32.mrf.mxu3 }
 0x296   : > { %4884 = vst [vmem:[#allocation23_spill] sm:$0xff] %v3452_v30 }
 0x297   : > { %4885 = vst [vmem:[#allocation24_spill] sm:$0xff] %v3454_v31 }
 0x298   : > { %v3456_v33 = vpop.f32.mrf.mxu0  ;;  %v3458_v34 = vpop.f32.mrf.mxu1 }
 0x299   : > { %4886 = vst [vmem:[#allocation25_spill] sm:$0xff] %v3456_v33 }
 0x29a   : > { %4887 = vst [vmem:[#allocation26_spill] sm:$0xff] %v3458_v34  ;;  %2525 = vmatmul.msk.bf16.gmra.mxu2 %vm656_vm2, %v773_v32  ;;  %2541 = vmatmul.msk.bf16.gmra.mxu3 %vm656_vm2, %v773_v32 }
 0x29b   : > { %2557 = vmatmul.msk.bf16.gmra.mxu0 %vm656_vm2, %v773_v32  ;;  %2573 = vmatmul.msk.bf16.gmra.mxu1 %vm656_vm2, %v773_v32 }
 0x29d   : > { %v3464_v35 = vpop.f32.mrf.mxu2  ;;  %v3466_v36 = vpop.f32.mrf.mxu3 }
 0x29e   : > { %4888 = vst [vmem:[#allocation27_spill] sm:$0xff] %v3464_v35 }
 0x29f   : > { %4889 = vst [vmem:[#allocation28_spill] sm:$0xff] %v3466_v36 }
 0x2a0   : > { %v3468_v38 = vpop.f32.mrf.mxu0  ;;  %v3470_v39 = vpop.f32.mrf.mxu1 }
 0x2a1   : > { %4890 = vst [vmem:[#allocation29_spill] sm:$0xff] %v3468_v38 }
 0x2a2   : > { %4891 = vst [vmem:[#allocation30_spill] sm:$0xff] %v3470_v39 }
 0x2a5   : > { %v3472_v40 = vpop.f32.mrf.mxu2  ;;  %v3474_v41 = vpop.f32.mrf.mxu3 }
 0x2a6   : > { %4892 = vst [vmem:[#allocation31_spill] sm:$0xff] %v3472_v40 }
 0x2a7   : > { %4893 = vst [vmem:[#allocation32_spill] sm:$0xff] %v3474_v41 }
 0x2a8   : > { %v3476_v43 = vpop.f32.mrf.mxu0  ;;  %v3478_v44 = vpop.f32.mrf.mxu1 }
 0x2aa   : > { %2526 = vmatmul.msk.bf16.gmra.mxu2 %vm656_vm2, %v774_v42  ;;  %2542 = vmatmul.msk.bf16.gmra.mxu3 %vm656_vm2, %v774_v42 }
 0x2ab   : > { %2558 = vmatmul.msk.bf16.gmra.mxu0 %vm656_vm2, %v774_v42  ;;  %2574 = vmatmul.msk.bf16.gmra.mxu1 %vm656_vm2, %v774_v42 }
 0x2ad   : > { %v3484_v46 = vpop.f32.mrf.mxu2  ;;  %v3486_v47 = vpop.f32.mrf.mxu3 }
 0x2b0   : > { %v3488_v48 = vpop.f32.mrf.mxu0  ;;  %v3490_v49 = vpop.f32.mrf.mxu1 }
 0x2b1   : > { %4894 = vst [vmem:[#allocation33_spill] sm:$0xff] %v3488_v48 }
 0x2b2   : > { %4895 = vst [vmem:[#allocation34_spill] sm:$0xff] %v3490_v49 }
 0x2b5   : > { %v3492_v51 = vpop.f32.mrf.mxu2  ;;  %v3494_v52 = vpop.f32.mrf.mxu3 }
 0x2b6   : > { %4896 = vst [vmem:[#allocation35_spill] sm:$0xff] %v3492_v51 }
 0x2b7   : > { %4897 = vst [vmem:[#allocation36_spill] sm:$0xff] %v3494_v52 }
 0x2b8   : > { %v3496_v54 = vpop.f32.mrf.mxu0  ;;  %v3498_v55 = vpop.f32.mrf.mxu1 }
 0x2ba   : > { %2527 = vmatmul.msk.bf16.gmra.mxu2 %vm656_vm2, %v775_v53  ;;  %2543 = vmatmul.msk.bf16.gmra.mxu3 %vm656_vm2, %v775_v53 }
 0x2bb   : > { %2559 = vmatmul.msk.bf16.gmra.mxu0 %vm656_vm2, %v775_v53  ;;  %2575 = vmatmul.msk.bf16.gmra.mxu1 %vm656_vm2, %v775_v53 }
 0x2bd   : > { %v3504_v56 = vpop.f32.mrf.mxu2  ;;  %v3506_v57 = vpop.f32.mrf.mxu3 }
 0x2c0   : > { %v3508_v59 = vpop.f32.mrf.mxu0  ;;  %v3510_v60 = vpop.f32.mrf.mxu1 }
 0x2c5   : > { %v3512_v61 = vpop.f32.mrf.mxu2  ;;  %v3514_v62 = vpop.f32.mrf.mxu3 }
 0x2c8   : > { %v3516_v0 = vpop.f32.mrf.mxu0  ;;  %v3518_v1 = vpop.f32.mrf.mxu1 }
 0x2ca   : > { %2528 = vmatmul.msk.bf16.gmra.mxu2 %vm656_vm2, %v776_v63  ;;  %2544 = vmatmul.msk.bf16.gmra.mxu3 %vm656_vm2, %v776_v63 }
 0x2cb   : > { %2560 = vmatmul.msk.bf16.gmra.mxu0 %vm656_vm2, %v776_v63  ;;  %2576 = vmatmul.msk.bf16.gmra.mxu1 %vm656_vm2, %v776_v63  ;;  %v763_v63 = vpop.trf.xlu1 }
 0x2cc   : > { %v779_v15 = vpack.c.bf16 %v763_v63, %v762_v29 }
 0x2cd   : > { %v3524_v3 = vpop.f32.mrf.mxu2  ;;  %v3526_v4 = vpop.f32.mrf.mxu3 }
 0x2d0   : > { %v3528_v5 = vpop.f32.mrf.mxu0  ;;  %v3530_v6 = vpop.f32.mrf.mxu1 }
 0x2d5   : > { %v3532_v8 = vpop.f32.mrf.mxu2  ;;  %v3534_v9 = vpop.f32.mrf.mxu3 }
 0x2d8   : > { %v3536_v11 = vpop.f32.mrf.mxu0  ;;  %v3538_v12 = vpop.f32.mrf.mxu1 }
 0x2da   : > { %2529 = vmatmul.msk.bf16.gmra.mxu2 %vm656_vm2, %v777_v10  ;;  %2545 = vmatmul.msk.bf16.gmra.mxu3 %vm656_vm2, %v777_v10 }
 0x2db   : > { %2561 = vmatmul.msk.bf16.gmra.mxu0 %vm656_vm2, %v777_v10  ;;  %2577 = vmatmul.msk.bf16.gmra.mxu1 %vm656_vm2, %v777_v10 }
 0x2dd   : > { %v3544_v13 = vpop.f32.mrf.mxu2  ;;  %v3546_v14 = vpop.f32.mrf.mxu3 }
 0x2e0   : > { %v3548_v16 = vpop.f32.mrf.mxu0  ;;  %v3550_v17 = vpop.f32.mrf.mxu1 }
 0x2e1   : > { %4898 = vst [vmem:[#allocation37_spill] sm:$0xff] %v3548_v16 }
 0x2e2   : > { %4899 = vst [vmem:[#allocation38_spill] sm:$0xff] %v3550_v17 }
 0x2e5   : > { %v3552_v18 = vpop.f32.mrf.mxu2  ;;  %v3554_v19 = vpop.f32.mrf.mxu3 }
 0x2e6   : > { %4900 = vst [vmem:[#allocation39_spill] sm:$0xff] %v3552_v18 }
 0x2e7   : > { %4901 = vst [vmem:[#allocation40_spill] sm:$0xff] %v3554_v19 }
 0x2e8   : > { %v3556_v21 = vpop.f32.mrf.mxu0  ;;  %v3558_v24 = vpop.f32.mrf.mxu1 }
 0x2ea   : > { %2530 = vmatmul.msk.bf16.gmra.mxu2 %vm656_vm2, %v778_v20  ;;  %2546 = vmatmul.msk.bf16.gmra.mxu3 %vm656_vm2, %v778_v20 }
 0x2eb   : > { %2562 = vmatmul.msk.bf16.gmra.mxu0 %vm656_vm2, %v778_v20  ;;  %2578 = vmatmul.msk.bf16.gmra.mxu1 %vm656_vm2, %v778_v20 }
 0x2ed   : > { %v3564_v32 = vpop.f32.mrf.mxu2  ;;  %v3566_v37 = vpop.f32.mrf.mxu3 }
 0x2ee   : > { %v1269_v42 = vmax.f32 %v3564_v32, %v3566_v37 }
 0x2f0   : > { %v3570_v45 = vpop.f32.mrf.mxu0  ;;  %v3572_v50 = vpop.f32.mrf.mxu1  ;;  %v1270_v53 = vmax.f32 %v1269_v42, %v3556_v21  ;;  %v1259_v42 = vmax.f32 %v3544_v13, %v3546_v14 }
 0x2f1   : > { %4902 = vst [vmem:[#allocation41_spill] sm:$0xff] %v3570_v45 }
 0x2f2   : > { %4903 = vst [vmem:[#allocation42_spill] sm:$0xff] %v3572_v50  ;;  %v1271_v58 = vmax.f32 %v1270_v53, %v3558_v24 }
 0x2f4   : > { %1272 = vmax.xlane.f32.xlu2 %v1271_v58 }
 0x2f5   : > { %v3576_v2 = vpop.f32.mrf.mxu2  ;;  %v3578_v7 = vpop.f32.mrf.mxu3 }
 0x2f6   : > { %4904 = vst [vmem:[#allocation43_spill] sm:$0xff] %v3576_v2  ;;  %v1274_v10 = vmax.f32 %v3576_v2, %v3578_v7 }
 0x2f7   : > { %4905 = vst [vmem:[#allocation44_spill] sm:$0xff] %v3578_v7 }
 0x2f8   : > { %v3582_v20 = vpop.f32.mrf.mxu0  ;;  %v3584_v28 = vpop.f32.mrf.mxu1  ;;  %v1275_v27 = vmax.f32 %v1274_v10, %v3570_v45  ;;  %v1260_v10 = vmax.f32 %v1259_v42, %v3536_v11 }
 0x2f9   : > { %4906 = vst [vmem:[#allocation45_spill] sm:$0xff] %v3582_v20 }
 0x2fa   : > { %4907 = vst [vmem:[#allocation46_spill] sm:$0xff] %v3584_v28  ;;  %2531 = vmatmul.msk.bf16.gmra.mxu2 %vm656_vm2, %v779_v15  ;;  %2547 = vmatmul.msk.bf16.gmra.mxu3 %vm656_vm2, %v779_v15  ;;  %v1276_v53 = vmax.f32 %v1275_v27, %v3572_v50  ;;  %v1264_v50 = vmax.f32 %v3552_v18, %v3554_v19 }
 0x2fb   : > { %2563 = vmatmul.msk.bf16.gmra.mxu0 %vm656_vm2, %v779_v15  ;;  %2579 = vmatmul.msk.bf16.gmra.mxu1 %vm656_vm2, %v779_v15  ;;  %v1261_v15 = vmax.f32 %v1260_v10, %v3538_v12 }
 0x2fc   : > { %1277 = vmax.xlane.f32.xlu2 %v1276_v53  ;;  %v1265_v42 = vmax.f32 %v1264_v50, %v3548_v16 }
 0x2fd   : > { %v3594_v29 = vpop.f32.mrf.mxu2  ;;  %v3596_v58 = vpop.f32.mrf.mxu3 }
 0x2fe   : > { %4908 = vst [vmem:[#allocation47_spill] sm:$0xff] %v3594_v29  ;;  %v1279_v63 = vmax.f32 %v3594_v29, %v3596_v58  ;;  %v1266_v19 = vmax.f32 %v1265_v42, %v3550_v17 }
 0x2ff   : > { %4909 = vst [vmem:[#allocation48_spill] sm:$0xff] %v3596_v58 }
 0x300   : > { %v3601_v45 = vpop.f32.mrf.mxu0  ;;  %v3603_v7 = vpop.f32.mrf.mxu1  ;;  %v1280_v27 = vmax.f32 %v1279_v63, %v3582_v20 }
 0x301   : > { %4910 = vst [vmem:[#allocation49_spill] sm:$0xff] %v3601_v45 }
 0x302   : > { %4911 = vst [vmem:[#allocation50_spill] sm:$0xff] %v3603_v7  ;;  %v1281_v53 = vmax.f32 %v1280_v27, %v3584_v28 }
 0x304   : > { %1262 = vmax.xlane.f32.xlu2 %v1261_v15  ;;  %1282 = vmax.xlane.f32.xlu1 %v1281_v53 }
 0x305   : > { %v3610_v2 = vpop.f32.mrf.mxu2  ;;  %v3612_v58 = vpop.f32.mrf.mxu3 }
 0x306   : > { %4912 = vst [vmem:[#allocation51_spill] sm:$0xff] %v3610_v2  ;;  %v1284_v63 = vmax.f32 %v3610_v2, %v3612_v58 }
 0x307   : > { %4913 = vst [vmem:[#allocation52_spill] sm:$0xff] %v3612_v58 }
 0x308   : > { %v3615_v23 = vpop.f32.mrf.mxu0  ;;  %v3617_v29 = vpop.f32.mrf.mxu1  ;;  %v1285_v15 = vmax.f32 %v1284_v63, %v3601_v45 }
 0x309   : > { %4914 = vst [vmem:[#allocation53_spill] sm:$0xff] %v3615_v23 }
 0x30a   : > { %4915 = vst [vmem:[#allocation54_spill] sm:$0xff] %v3617_v29  ;;  %v1286_v50 = vmax.f32 %v1285_v15, %v3603_v7 }
 0x30c   : > { %1267 = vmax.xlane.f32.xlu2 %v1266_v19 }
 0x30d   : > { %v3622_v10 = vpop.f32.mrf.mxu2  ;;  %v3624_v27 = vpop.f32.mrf.mxu3 }
 0x30e   : > { %4916 = vst [vmem:[#allocation55_spill] sm:$0xff] %v3622_v10 }
 0x30f   : > { %4917 = vst [vmem:[#allocation56_spill] sm:$0xff] %v3624_v27 }
 0x310   : > { %v3627_v53 = vpop.f32.mrf.mxu0  ;;  %v3629_v18 = vpop.f32.mrf.mxu1 }
 0x311   : > { %4918 = vst [vmem:[#allocation57_spill] sm:$0xff] %v3627_v53 }
 0x312   : > { %4919 = vst [vmem:[#allocation58_spill] sm:$0xff] %v3629_v18 }
 0x314   : > { %1287 = vmax.xlane.f32.xlu2 %v1286_v50 }
 0x315   : > { %v3632_v16 = vpop.f32.mrf.mxu2  ;;  %v3634_v28 = vpop.f32.mrf.mxu3 }
 0x316   : > { %4920 = vst [vmem:[#allocation59_spill] sm:$0xff] %v3632_v16 }
 0x317   : > { %4921 = vst [vmem:[#allocation60_spill] sm:$0xff] %v3634_v28 }
 0x318   : > { %v3636_v58 = vpop.f32.mrf.mxu0  ;;  %v3638_v19 = vpop.f32.mrf.mxu1 }
 0x319   : > { %4922 = vst [vmem:[#allocation61_spill] sm:$0xff] %v3636_v58 }
 0x31a   : > { %4923 = vst [vmem:[#allocation62_spill] sm:$0xff] %v3638_v19 }
 0x31d   : > { %v3640_v42 = vpop.f32.mrf.mxu2  ;;  %v3642_v2 = vpop.f32.mrf.mxu3 }
 0x31e   : > { %4924 = vst [vmem:[#allocation63_spill] sm:$0xff] %v3640_v42  ;;  %v1299_v63 = vmax.f32 %v3640_v42, %v3642_v2 }
 0x31f   : > { %4925 = vst [vmem:[#allocation64_spill] sm:$0xff] %v3642_v2 }
 0x320   : > { %v3646_v45 = vpop.f32.mrf.mxu0  ;;  %v3648_v18 = vpop.f32.mrf.mxu1  ;;  %v1300_v15 = vmax.f32 %v1299_v63, %v3636_v58 }
 0x321   : > { %4926 = vst [vmem:[#allocation65_spill] sm:$0xff] %v3646_v45 }
 0x322   : > { %4927 = vst [vmem:[#allocation66_spill] sm:$0xff] %v3648_v18  ;;  %v1301_v50 = vmax.f32 %v1300_v15, %v3638_v19 }
 0x324   : > { %1302 = vmax.xlane.f32.xlu1 %v1301_v50 }
 0x325   : > { %v3652_v7 = vpop.f32.mrf.mxu2  ;;  %v3654_v53 = vpop.f32.mrf.mxu3 }
 0x326   : > { %4928 = vst [vmem:[#allocation67_spill] sm:$0xff] %v3652_v7 }
 0x327   : > { %4929 = vst [vmem:[#allocation68_spill] sm:$0xff] %v3654_v53 }
 0x328   : > { %v3656_v16 = vpop.f32.mrf.mxu0  ;;  %v3658_v28 = vpop.f32.mrf.mxu1 }
 0x329   : > { %4930 = vst [vmem:[#allocation69_spill] sm:$0xff] %v3656_v16 }
 0x32a   : > { %4931 = vst [vmem:[#allocation70_spill] sm:$0xff] %v3658_v28 }
 0x32d   : > { %v3660_v17 = vpop.f32.mrf.mxu2  ;;  %v3662_v2 = vpop.f32.mrf.mxu3 }
 0x32e   : > { %4932 = vst [vmem:[#allocation71_spill] sm:$0xff] %v3660_v17 }
 0x32f   : > { %4933 = vst [vmem:[#allocation72_spill] sm:$0xff] %v3662_v2 }
 0x330   : > { %v3664_v42 = vpop.f32.mrf.mxu0  ;;  %v3666_v18 = vpop.f32.mrf.mxu1 }
 0x331   : > { %4934 = vst [vmem:[#allocation73_spill] sm:$0xff] %v3664_v42 }
 0x332   : > { %4935 = vst [vmem:[#allocation74_spill] sm:$0xff] %v3666_v18 }
 0x335   : > { %v3668_v63 = vpop.f32.mrf.mxu2  ;;  %v3670_v15 = vpop.f32.mrf.mxu3 }
 0x336   : > { %4936 = vst [vmem:[#allocation75_spill] sm:$0xff] %v3668_v63 }
 0x337   : > { %4937 = vst [vmem:[#allocation76_spill] sm:$0xff] %v3670_v15 }
 0x338   : > { %v3672_v50 = vpop.f32.mrf.mxu0  ;;  %v3674_v19 = vpop.f32.mrf.mxu1 }
 0x339   : > { %4938 = vst [vmem:[#allocation77_spill] sm:$0xff] %v3672_v50 }
 0x33a   : > { %4939 = vst [vmem:[#allocation78_spill] sm:$0xff] %v3674_v19 }
 0x33d   : > { %v3676_v58 = vpop.f32.mrf.mxu2  ;;  %v3678_v45 = vpop.f32.mrf.mxu3 }
 0x33e   : > { %4940 = vst [vmem:[#allocation79_spill] sm:$0xff] %v3676_v58 }
 0x33f   : > { %4941 = vst [vmem:[#allocation80_spill] sm:$0xff] %v3678_v45 }
 0x340   : > { %v3680_v7 = vpop.f32.mrf.mxu0  ;;  %v3682_v53 = vpop.f32.mrf.mxu1 }
 0x341   : > { %4942 = vst [vmem:[#allocation81_spill] sm:$0xff] %v3680_v7 }
 0x342   : > { %4943 = vst [vmem:[#allocation82_spill] sm:$0xff] %v3682_v53 }
 0x345   : > { %v3684_v28 = vpop.f32.mrf.mxu2  ;;  %v3686_v42 = vpop.f32.mrf.mxu3 }
 0x346   : > { %4944 = vst [vmem:[#allocation83_spill] sm:$0xff] %v3684_v28 }
 0x347   : > { %4945 = vst [vmem:[#allocation84_spill] sm:$0xff] %v3686_v42 }
 0x348   : > { %v3688_v18 = vpop.f32.mrf.mxu0  ;;  %v3690_v63 = vpop.f32.mrf.mxu1 }
 0x349   : > { %4946 = vst [vmem:[#allocation85_spill] sm:$0xff] %v3688_v18 }
 0x34a   : > { %4947 = vst [vmem:[#allocation86_spill] sm:$0xff] %v3690_v63 }
 0x34d   : > { %v3692_v15 = vpop.f32.mrf.mxu2  ;;  %v3694_v16 = vpop.f32.mrf.mxu3 }
 0x350   : > { %v3696_v20 = vpop.f32.mrf.mxu0  ;;  %v3698_v17 = vpop.f32.mrf.mxu1 }
 0x351   : > { %4948 = vst [vmem:[#allocation87_spill] sm:$0xff] %v3696_v20 }
 0x352   : > { %4949 = vst [vmem:[#allocation88_spill] sm:$0xff] %v3698_v17 }
 0x355   : > { %v3700_v2 = vpop.f32.mrf.mxu2  ;;  %v3702_v30 = vpop.f32.mrf.mxu3 }
 0x356   : > { %4950 = vst [vmem:[#allocation89_spill] sm:$0xff] %v3700_v2 }
 0x357   : > { %4951 = vst [vmem:[#allocation90_spill] sm:$0xff] %v3702_v30 }
 0x358   : > { %v3704_v31 = vpop.f32.mrf.mxu0  ;;  %v3706_v22 = vpop.f32.mrf.mxu1 }
 0x359   : > { %4952 = vst [vmem:[#allocation91_spill] sm:$0xff] %v3704_v31 }
 0x35a   : > { %4953 = vst [vmem:[#allocation92_spill] sm:$0xff] %v3706_v22 }
 0x35d   : > { %v3708_v53 = vpop.f32.mrf.mxu2  ;;  %v3710_v25 = vpop.f32.mrf.mxu3 }
 0x35e   : > { %4954 = vst [vmem:[#allocation93_spill] sm:$0xff] %v3708_v53 }
 0x35f   : > { %4955 = vst [vmem:[#allocation94_spill] sm:$0xff] %v3710_v25 }
 0x360   : > { %v3712_v26 = vpop.f32.mrf.mxu0  ;;  %v3714_v7 = vpop.f32.mrf.mxu1 }
 0x365   : > { %v3716_v19 = vpop.f32.mrf.mxu2  ;;  %v3718_v28 = vpop.f32.mrf.mxu3 }
 0x367   : > { %v1273_v42 = vpop.xlane.xlu2 %1272 }
 0x368   : > { %v1417_v50 = vsub.f32 %v3564_v32, %v1273_v42  ;;  %v1418_v39 = vsub.f32 %v3566_v37, %v1273_v42  ;;  %v1419_v58 = vsub.f32 %v3556_v21, %v1273_v42  ;;  %v3723_v34 = vpop.f32.mrf.mxu0  ;;  %v1420_v40 = vsub.f32 %v3558_v24, %v1273_v42  ;;  %v3726_v33 = vpop.f32.mrf.mxu1 }
 0x36a   : > { %v1593_v45 = vmul.f32 1.442695, %v1417_v50  ;;  %v1595_v38 = vmul.f32 1.442695, %v1418_v39  ;;  %v1597_v41 = vmul.f32 1.442695, %v1419_v58 }
 0x36b   : > { %v1599_v32 = vmul.f32 1.442695, %v1420_v40 }
 0x36c   : > { %2698 = vpow2.f32 %v1593_v45 }
 0x36d   : > { %2700 = vpow2.f32 %v1595_v38  ;;  %v3728_v17 = vpop.f32.mrf.mxu2  ;;  %v3730_v35 = vpop.f32.mrf.mxu3 }
 0x36e   : > { %2702 = vpow2.f32 %v1597_v41 }
 0x36f   : > { %v3732_v37 = vpop.xlane.xlu2 %1277  ;;  %2704 = vpow2.f32 %v1599_v32 }
 0x370   : > { %4956 = vst [vmem:[#allocation95_spill] sm:$0xff] %v3732_v37  ;;  %v3738_v50 = vpop.f32.mrf.mxu0  ;;  %v3748_v41 = vpop.f32.mrf.mxu1 }
 0x371   : > { %4960 = vst [vmem:[#allocation99_spill] sm:$0xff] %v3748_v41 }
 0x372   : > { %v3734_v21 = vpop.eup %2698 }
 0x373   : > { %4957 = vst [vmem:[#allocation96_spill] sm:$0xff] %v3734_v21  ;;  %v3736_v39 = vpop.eup %2700 }
 0x374   : > { %4958 = vst [vmem:[#allocation97_spill] sm:$0xff] %v3736_v39  ;;  %v1813_v24 = vadd.f32 %v3736_v39, %v3734_v21  ;;  %v3742_v45 = vpop.eup %2702  ;;  %v1289_v39 = vmax.f32 %v3622_v10, %v3624_v27  ;;  %v4970_v10 = vld [vmem:[#allocation87_spill] sm:$0xff] }
 0x375   : > { %4959 = vst [vmem:[#allocation98_spill] sm:$0xff] %v3742_v45  ;;  %v3744_v38 = vpop.f32.mrf.mxu2  ;;  %v3746_v58 = vpop.f32.mrf.mxu3 }
 0x376   : > { %v1814_v40 = vadd.f32 %v3742_v45, %v1813_v24  ;;  %v3754_v20 = vpop.eup %2704 }
 0x377   : > { %v1263_v42 = vpop.xlane.xlu2 %1262  ;;  %4961 = vst [vmem:[#allocation100_spill] sm:$0xff] %v3754_v20 }
 0x378   : > { %v1409_v37 = vsub.f32 %v3544_v13, %v1263_v42  ;;  %v1410_v32 = vsub.f32 %v3546_v14, %v1263_v42  ;;  %v1411_v36 = vsub.f32 %v3536_v11, %v1263_v42  ;;  %v1412_v21 = vsub.f32 %v3538_v12, %v1263_v42  ;;  %v3764_v24 = vpop.f32.mrf.mxu0 }
 0x379   : > { %v1815_v30 = vadd.f32 %v3754_v20, %v1814_v40  ;;  %v1290_v12 = vmax.f32 %v1289_v39, %v3615_v23 }
 0x37a   : > { %v1577_v63 = vmul.f32 1.442695, %v1409_v37  ;;  %v1579_v2 = vmul.f32 1.442695, %v1410_v32  ;;  %v1581_v18 = vmul.f32 1.442695, %v1411_v36  ;;  %v3769_v37 = vpop.f32.mrf.mxu1 }
 0x37b   : > { %1816 = vadd.xlane.f32.xlu1 %v1815_v30  ;;  %v1583_v11 = vmul.f32 1.442695, %v1412_v21  ;;  %v1291_v30 = vmax.f32 %v1290_v12, %v3617_v29  ;;  %v1249_v21 = vmax.f32 %v3524_v3, %v3526_v4 }
 0x37c   : > { %2706 = vpow2.f32 %v1577_v63 }
 0x37d   : > { %2708 = vpow2.f32 %v1579_v2  ;;  %v3760_v13 = vpop.f32.mrf.mxu2  ;;  %v3762_v14 = vpop.f32.mrf.mxu3  ;;  %v1250_v12 = vmax.f32 %v1249_v21, %v3516_v0 }
 0x37e   : > { %v1359_v45 = vmax.f32 %v3760_v13, %v3762_v14  ;;  %2710 = vpow2.f32 %v1581_v18 }
 0x37f   : > { %2712 = vpow2.f32 %v1583_v11  ;;  %v1251_v29 = vmax.f32 %v1250_v12, %v3518_v1 }
 0x380   : > { %v1360_v36 = vmax.f32 %v1359_v45, %v3764_v24 }
 0x382   : > { %v3772_v63 = vpop.eup %2706  ;;  %v1361_v40 = vmax.f32 %v1360_v36, %v3769_v37  ;;  %v3794_v36 = vpop.f32.mrf.mxu0 }
 0x383   : > { %4962 = vst [vmem:[#allocation101_spill] sm:$0xff] %v3772_v63  ;;  %v3775_v2 = vpop.eup %2708  ;;  %1292 = vmax.xlane.f32.xlu1 %v1291_v30 }
 0x384   : > { %4963 = vst [vmem:[#allocation102_spill] sm:$0xff] %v3775_v2  ;;  %v1803_v18 = vadd.f32 %v3775_v2, %v3772_v63  ;;  %v3782_v39 = vpop.eup %2710  ;;  %1362 = vmax.xlane.f32.xlu2 %v1361_v40  ;;  %v3798_v40 = vpop.f32.mrf.mxu1  ;;  %v1254_v63 = vmax.f32 %v3532_v8, %v3534_v9 }
 0x385   : > { %4964 = vst [vmem:[#allocation103_spill] sm:$0xff] %v3782_v39  ;;  %v3784_v45 = vpop.f32.mrf.mxu2  ;;  %v3786_v42 = vpop.f32.mrf.mxu3 }
 0x386   : > { %v1364_v32 = vmax.f32 %v3784_v45, %v3786_v42  ;;  %v1804_v11 = vadd.f32 %v3782_v39, %v1803_v18  ;;  %v3792_v20 = vpop.eup %2712  ;;  %v1255_v21 = vmax.f32 %v1254_v63, %v3528_v5  ;;  %v1349_v18 = vmax.f32 %v3728_v17, %v3730_v35 }
 0x387   : > { %4965 = vst [vmem:[#allocation104_spill] sm:$0xff] %v3792_v20 }
 0x388   : > { %v1805_v30 = vadd.f32 %v3792_v20, %v1804_v11  ;;  %v1365_v2 = vmax.f32 %v1364_v32, %v3794_v36  ;;  %v1256_v11 = vmax.f32 %v1255_v21, %v3530_v6  ;;  %v1350_v32 = vmax.f32 %v1349_v18, %v3723_v34 }
 0x389   : > { %v1354_v20 = vmax.f32 %v3744_v38, %v3746_v58 }
 0x38a   : > { %v1366_v23 = vmax.f32 %v1365_v2, %v3798_v40  ;;  %v1351_v12 = vmax.f32 %v1350_v32, %v3726_v33 }
 0x38b   : > { %1806 = vadd.xlane.f32.xlu1 %v1805_v30  ;;  %v1355_v2 = vmax.f32 %v1354_v20, %v3738_v50  ;;  %v1244_v30 = vmax.f32 %v3512_v61, %v3514_v62 }
 0x38c   : > { %1252 = vmax.xlane.f32.xlu2 %v1251_v29  ;;  %1367 = vmax.xlane.f32.xlu0 %v1366_v23  ;;  %v1239_v23 = vmax.f32 %v3504_v56, %v3506_v57 }
 0x38d   : > { %v1356_v29 = vmax.f32 %v1355_v2, %v3748_v41  ;;  %v1245_v18 = vmax.f32 %v1244_v30, %v3508_v59 }
 0x38e   : > { %v1240_v63 = vmax.f32 %v1239_v23, %v3496_v54 }
 0x38f   : > { %v1246_v20 = vmax.f32 %v1245_v18, %v3510_v60 }
 0x390   : > { %v1241_v21 = vmax.f32 %v1240_v63, %v3498_v55 }
 0x394   : > { %1257 = vmax.xlane.f32.xlu2 %v1256_v11  ;;  %v1339_v11 = vmax.f32 %v3708_v53, %v3710_v25  ;;  %v4977_v25 = vld [vmem:[#allocation26_spill] sm:$0xff] }
 0x396   : > { %v1340_v32 = vmax.f32 %v1339_v11, %v3704_v31 }
 0x398   : > { %v1341_v2 = vmax.f32 %v1340_v32, %v3706_v22 }
 0x39c   : > { %1352 = vmax.xlane.f32.xlu2 %v1351_v12  ;;  %v1344_v12 = vmax.f32 %v3716_v19, %v3718_v28 }
 0x39e   : > { %v1345_v23 = vmax.f32 %v1344_v12, %v3712_v26  ;;  %v4966_v12 = vld [vmem:[#allocation85_spill] sm:$0xff] }
 0x3a0   : > { %v1346_v63 = vmax.f32 %v1345_v23, %v3714_v7  ;;  %v4967_v23 = vld [vmem:[#allocation90_spill] sm:$0xff] }
 0x3a4   : > { %1357 = vmax.xlane.f32.xlu2 %v1356_v29  ;;  %v1229_v29 = vmax.f32 %v3484_v46, %v3486_v47 }
 0x3a6   : > { %v1230_v30 = vmax.f32 %v1229_v29, %v3476_v43  ;;  %v4969_v29 = vld [vmem:[#allocation86_spill] sm:$0xff] }
 0x3a8   : > { %v1231_v18 = vmax.f32 %v1230_v30, %v3478_v44  ;;  %v4971_v30 = vld [vmem:[#allocation28_spill] sm:$0xff] }
 0x3ac   : > { %1242 = vmax.xlane.f32.xlu2 %v1241_v21  ;;  %v1234_v21 = vmax.f32 %v3492_v51, %v3494_v52  ;;  %v3848_v51 = vpop.xlane.xlu2 %1267 }
 0x3ae   : > { %v1235_v11 = vmax.f32 %v1234_v21, %v3488_v48  ;;  %v4973_v21 = vld [vmem:[#allocation88_spill] sm:$0xff] }
 0x3b0   : > { %v1236_v32 = vmax.f32 %v1235_v11, %v3490_v49  ;;  %v4974_v11 = vld [vmem:[#allocation25_spill] sm:$0xff]  ;;  %v4975_v49 = vld [vmem:[#allocation32_spill] sm:$0xff] }
 0x3b4   : > { %1247 = vmax.xlane.f32.xlu2 %v1246_v20  ;;  %v1329_v20 = vmax.f32 %v3692_v15, %v3694_v16 }
 0x3bc   : > { %1342 = vmax.xlane.f32.xlu2 %v1341_v2  ;;  %v1330_v2 = vmax.f32 %v1329_v20, %v4966_v12  ;;  %v4976_v20 = vld [vmem:[#allocation31_spill] sm:$0xff] }
 0x3bd   : > { %v1224_v31 = vmax.f32 %v4976_v20, %v4975_v49  ;;  %v4985_v20 = vld [vmem:[#allocation78_spill] sm:$0xff] }
 0x3be   : > { %v1331_v27 = vmax.f32 %v1330_v2, %v4969_v29  ;;  %v4978_v2 = vld [vmem:[#allocation29_spill] sm:$0xff] }
 0x3c4   : > { %1347 = vmax.xlane.f32.xlu2 %v1346_v63  ;;  %v4968_v63 = vld [vmem:[#allocation89_spill] sm:$0xff] }
 0x3c5   : > { %v1334_v39 = vmax.f32 %v4968_v63, %v4967_v23  ;;  %v3855_v63 = vpop.xlane.xlu2 %1287 }
 0x3c7   : > { %v1335_v22 = vmax.f32 %v1334_v39, %v4970_v10  ;;  %v4979_v39 = vld [vmem:[#allocation80_spill] sm:$0xff]  ;;  %v4980_v10 = vld [vmem:[#allocation79_spill] sm:$0xff] }
 0x3c9   : > { %v1336_v48 = vmax.f32 %v1335_v22, %v4973_v21 }
 0x3cc   : > { %1232 = vmax.xlane.f32.xlu2 %v1231_v18  ;;  %v4972_v18 = vld [vmem:[#allocation27_spill] sm:$0xff] }
 0x3cd   : > { %v1219_v52 = vmax.f32 %v4972_v18, %v4971_v30  ;;  %v1319_v30 = vmax.f32 %v4980_v10, %v4979_v39  ;;  %v4981_v18 = vld [vmem:[#allocation30_spill] sm:$0xff]  ;;  %v4988_v10 = vld [vmem:[#allocation19_spill] sm:$0xff] }
 0x3d4   : > { %1237 = vmax.xlane.f32.xlu2 %v1236_v32  ;;  %v1220_v32 = vmax.f32 %v1219_v52, %v4974_v11  ;;  %v4983_v52 = vld [vmem:[#allocation84_spill] sm:$0xff]  ;;  %v4984_v11 = vld [vmem:[#allocation83_spill] sm:$0xff] }
 0x3d5   : > { %v1324_v49 = vmax.f32 %v4984_v11, %v4983_v52  ;;  %v4989_v52 = vld [vmem:[#allocation82_spill] sm:$0xff] }
 0x3d6   : > { %v1221_v23 = vmax.f32 %v1220_v32, %v4977_v25 }
 0x3dc   : > { %1332 = vmax.xlane.f32.xlu2 %v1331_v27  ;;  %v1225_v27 = vmax.f32 %v1224_v31, %v4978_v2 }
 0x3de   : > { %v1226_v22 = vmax.f32 %v1225_v27, %v4981_v18 }
 0x3e4   : > { %1337 = vmax.xlane.f32.xlu2 %v1336_v48  ;;  %v4982_v48 = vld [vmem:[#allocation77_spill] sm:$0xff] }
 0x3e5   : > { %v1320_v21 = vmax.f32 %v1319_v30, %v4982_v48 }
 0x3e7   : > { %v1321_v32 = vmax.f32 %v1320_v21, %v4985_v20 }
 0x3ec   : > { %1222 = vmax.xlane.f32.xlu2 %v1221_v23  ;;  %v4986_v23 = vld [vmem:[#allocation81_spill] sm:$0xff] }
 0x3ed   : > { %v1325_v31 = vmax.f32 %v1324_v49, %v4986_v23  ;;  %v3874_v49 = vpop.xlane.xlu1 %1282  ;;  %v4991_v23 = vld [vmem:[#allocation24_spill] sm:$0xff] }
 0x3ef   : > { %v1326_v11 = vmax.f32 %v1325_v31, %v4989_v52 }
 0x3f4   : > { %1227 = vmax.xlane.f32.xlu2 %v1226_v22  ;;  %v4987_v22 = vld [vmem:[#allocation20_spill] sm:$0xff] }
 0x3f5   : > { %v1209_v30 = vmax.f32 %v4988_v10, %v4987_v22  ;;  %v4992_v22 = vld [vmem:[#allocation23_spill] sm:$0xff] }
 0x3f6   : > { %v1214_v10 = vmax.f32 %v4992_v22, %v4991_v23 }
 0x3f7   : > { %v3861_v53 = vpop.xlane.xlu2 %1362 }
 0x3fc   : > { %1322 = vmax.xlane.f32.xlu2 %v1321_v32  ;;  %v4990_v32 = vld [vmem:[#allocation17_spill] sm:$0xff] }
 0x3ff   : > { %v1253_v25 = vpop.xlane.xlu2 %1252 }
 0x400   : > { %v1401_v2 = vsub.f32 %v3524_v3, %v1253_v25  ;;  %v1402_v39 = vsub.f32 %v3526_v4, %v1253_v25  ;;  %v1403_v27 = vsub.f32 %v3516_v0, %v1253_v25  ;;  %v1404_v48 = vsub.f32 %v3518_v1, %v1253_v25  ;;  %v4993_v25 = vld [vmem:[#allocation47_spill] sm:$0xff] }
 0x401   : > { %v1210_v4 = vmax.f32 %v1209_v30, %v4990_v32  ;;  %v1425_v1 = vsub.f32 %v4993_v25, %v3874_v49  ;;  %v1489_v25 = vsub.f32 %v3760_v13, %v3861_v53 }
 0x402   : > { %v1561_v18 = vmul.f32 1.442695, %v1401_v2  ;;  %v1563_v41 = vmul.f32 1.442695, %v1402_v39  ;;  %v1565_v21 = vmul.f32 1.442695, %v1403_v27 }
 0x403   : > { %v1567_v3 = vmul.f32 1.442695, %v1404_v48  ;;  %v4997_v39 = vld [vmem:[#allocation48_spill] sm:$0xff]  ;;  %v1609_v30 = vmul.f32 1.442695, %v1425_v1 }
 0x404   : > { %2714 = vpow2.f32 %v1561_v18  ;;  %1327 = vmax.xlane.f32.xlu2 %v1326_v11  ;;  %v4995_v18 = vld [vmem:[#allocation18_spill] sm:$0xff]  ;;  %v1426_v48 = vsub.f32 %v4997_v39, %v3874_v49 }
 0x405   : > { %2716 = vpow2.f32 %v1563_v41  ;;  %v1211_v11 = vmax.f32 %v1210_v4, %v4995_v18 }
 0x406   : > { %2718 = vpow2.f32 %v1565_v21  ;;  %v4999_v21 = vld [vmem:[#allocation21_spill] sm:$0xff]  ;;  %v1611_v4 = vmul.f32 1.442695, %v1426_v48 }
 0x407   : > { %v3877_v0 = vpop.xlane.xlu2 %1257  ;;  %2720 = vpow2.f32 %v1567_v3  ;;  %v1215_v23 = vmax.f32 %v1214_v10, %v4999_v21  ;;  %v5002_v10 = vld [vmem:[#allocation71_spill] sm:$0xff] }
 0x408   : > { %2722 = vpow2.f32 %v1609_v30  ;;  %v1491_v30 = vsub.f32 %v3764_v24, %v3861_v53 }
 0x409   : > { %2724 = vpow2.f32 %v1611_v4 }
 0x40a   : > { %v3883_v2 = vpop.eup %2714 }
 0x40b   : > { %4994 = vst [vmem:[#allocation85_spill] sm:$0xff] %v3883_v2  ;;  %v3886_v41 = vpop.eup %2716 }
 0x40c   : > { %4996 = vst [vmem:[#allocation86_spill] sm:$0xff] %v3886_v41  ;;  %1212 = vmax.xlane.f32.xlu2 %v1211_v11  ;;  %v1793_v31 = vadd.f32 %v3886_v41, %v3883_v2  ;;  %v3892_v27 = vpop.eup %2718  ;;  %v1490_v11 = vsub.f32 %v3762_v14, %v3861_v53  ;;  %v5001_v2 = vld [vmem:[#allocation72_spill] sm:$0xff] }
 0x40d   : > { %4998 = vst [vmem:[#allocation47_spill] sm:$0xff] %v3892_v27  ;;  %v3898_v18 = vpop.eup %2720  ;;  %v1309_v21 = vmax.f32 %v5002_v10, %v5001_v2 }
 0x40e   : > { %v1794_v3 = vadd.f32 %v3892_v27, %v1793_v31  ;;  %5000 = vst [vmem:[#allocation48_spill] sm:$0xff] %v3898_v18  ;;  %v5003_v31 = vld [vmem:[#allocation22_spill] sm:$0xff]  ;;  %v1737_v27 = vmul.f32 1.442695, %v1489_v25  ;;  %v5005_v25 = vld [vmem:[#allocation69_spill] sm:$0xff] }
 0x40f   : > { %v1353_v22 = vpop.xlane.xlu2 %1352  ;;  %v1216_v48 = vmax.f32 %v1215_v23, %v5003_v31 }
 0x410   : > { %v1481_v39 = vsub.f32 %v3728_v17, %v1353_v22  ;;  %v1482_v41 = vsub.f32 %v3730_v35, %v1353_v22  ;;  %v1483_v1 = vsub.f32 %v3723_v34, %v1353_v22  ;;  %v1795_v13 = vadd.f32 %v3898_v18, %v1794_v3  ;;  %v5004_v34 = vld [vmem:[#allocation45_spill] sm:$0xff]  ;;  %v5014_v18 = vld [vmem:[#allocation95_spill] sm:$0xff] }
 0x411   : > { %v1484_v32 = vsub.f32 %v3726_v33, %v1353_v22  ;;  %v1739_v17 = vmul.f32 1.442695, %v1490_v11  ;;  %v1427_v35 = vsub.f32 %v5004_v34, %v3874_v49  ;;  %v1310_v3 = vmax.f32 %v1309_v21, %v5005_v25  ;;  %v3915_v33 = vpop.eup %2722  ;;  %v5006_v22 = vld [vmem:[#allocation76_spill] sm:$0xff]  ;;  %v5010_v21 = vld [vmem:[#allocation70_spill] sm:$0xff] }
 0x412   : > { %v1721_v52 = vmul.f32 1.442695, %v1481_v39  ;;  %v1723_v20 = vmul.f32 1.442695, %v1482_v41  ;;  %v1725_v14 = vmul.f32 1.442695, %v1483_v1  ;;  %1796 = vadd.xlane.f32.xlu1 %v1795_v13 }
 0x413   : > { %v1727_v23 = vmul.f32 1.442695, %v1484_v32  ;;  %v5007_v41 = vld [vmem:[#allocation75_spill] sm:$0xff]  ;;  %v1613_v1 = vmul.f32 1.442695, %v1427_v35  ;;  %v1492_v32 = vsub.f32 %v3769_v37, %v3861_v53  ;;  %v1311_v13 = vmax.f32 %v1310_v3, %v5010_v21  ;;  %v5018_v3 = vld [vmem:[#allocation44_spill] sm:$0xff] }
 0x414   : > { %2726 = vpow2.f32 %v1721_v52  ;;  %1217 = vmax.xlane.f32.xlu2 %v1216_v48  ;;  %v1314_v4 = vmax.f32 %v5007_v41, %v5006_v22  ;;  %v3921_v52 = vpop.eup %2724  ;;  %v5015_v22 = vld [vmem:[#allocation43_spill] sm:$0xff] }
 0x415   : > { %2728 = vpow2.f32 %v1723_v20  ;;  %v5008_v20 = vld [vmem:[#allocation46_spill] sm:$0xff]  ;;  %v1421_v41 = vsub.f32 %v5015_v22, %v5014_v18 }
 0x416   : > { %2730 = vpow2.f32 %v1737_v27  ;;  %v1428_v39 = vsub.f32 %v5008_v20, %v3874_v49  ;;  %v1741_v27 = vmul.f32 1.442695, %v1491_v30  ;;  %v1743_v30 = vmul.f32 1.442695, %v1492_v32 }
 0x417   : > { %2732 = vpow2.f32 %v1725_v14  ;;  %v3919_v11 = vpop.xlane.xlu2 %1357  ;;  %v5012_v14 = vld [vmem:[#allocation73_spill] sm:$0xff]  ;;  %v1601_v21 = vmul.f32 1.442695, %v1421_v41 }
 0x418   : > { %2734 = vpow2.f32 %v1739_v17  ;;  %v1315_v34 = vmax.f32 %v1314_v4, %v5012_v14  ;;  %v1615_v53 = vmul.f32 1.442695, %v1428_v39  ;;  %v1422_v4 = vsub.f32 %v5018_v3, %v5014_v18  ;;  %v5019_v14 = vld [vmem:[#allocation74_spill] sm:$0xff] }
 0x419   : > { %2736 = vpow2.f32 %v1727_v23 }
 0x41a   : > { %v3925_v24 = vpop.eup %2726  ;;  %2738 = vpow2.f32 %v1613_v1  ;;  %v1316_v22 = vmax.f32 %v1315_v34, %v5019_v14 }
 0x41b   : > { %5009 = vst [vmem:[#allocation72_spill] sm:$0xff] %v3925_v24  ;;  %v3930_v48 = vpop.eup %2728  ;;  %2740 = vpow2.f32 %v1741_v27 }
 0x41c   : > { %5011 = vst [vmem:[#allocation71_spill] sm:$0xff] %v3930_v48  ;;  %v3933_v17 = vpop.eup %2730  ;;  %1312 = vmax.xlane.f32.xlu2 %v1311_v13  ;;  %v1893_v49 = vadd.f32 %v3930_v48, %v3925_v24  ;;  %2742 = vpow2.f32 %v1615_v53  ;;  %v5022_v53 = vld [vmem:[#allocation41_spill] sm:$0xff] }
 0x41d   : > { %5013 = vst [vmem:[#allocation22_spill] sm:$0xff] %v3933_v17  ;;  %v3939_v35 = vpop.eup %2732  ;;  %2744 = vpow2.f32 %v1743_v30 }
 0x41e   : > { %5016 = vst [vmem:[#allocation45_spill] sm:$0xff] %v3939_v35  ;;  %v3941_v37 = vpop.eup %2734  ;;  %v1894_v23 = vadd.f32 %v3939_v35, %v1893_v49  ;;  %v1823_v49 = vadd.f32 %v3921_v52, %v3915_v33 }
 0x41f   : > { %5017 = vst [vmem:[#allocation69_spill] sm:$0xff] %v3941_v37  ;;  %v1243_v20 = vpop.xlane.xlu2 %1242  ;;  %v3947_v13 = vpop.eup %2736  ;;  %v1903_v27 = vadd.f32 %v3941_v37, %v3933_v17 }
 0x420   : > { %5020 = vst [vmem:[#allocation46_spill] sm:$0xff] %v3947_v13  ;;  %v1393_v48 = vsub.f32 %v3504_v56, %v1243_v20  ;;  %v1394_v1 = vsub.f32 %v3506_v57, %v1243_v20  ;;  %v1395_v39 = vsub.f32 %v3496_v54, %v1243_v20  ;;  %v1895_v32 = vadd.f32 %v3947_v13, %v1894_v23  ;;  %v3958_v35 = vpop.eup %2738 }
 0x421   : > { %v1396_v34 = vsub.f32 %v3498_v55, %v1243_v20  ;;  %v3960_v57 = vpop.eup %2740  ;;  %v1603_v54 = vmul.f32 1.442695, %v1422_v4  ;;  %v1423_v23 = vsub.f32 %v5022_v53, %v5014_v18  ;;  %v1824_v30 = vadd.f32 %v3958_v35, %v1823_v49  ;;  %v5023_v20 = vld [vmem:[#allocation68_spill] sm:$0xff]  ;;  %v5026_v49 = vld [vmem:[#allocation42_spill] sm:$0xff] }
 0x422   : > { %v1545_v3 = vmul.f32 1.442695, %v1393_v48  ;;  %v1547_v41 = vmul.f32 1.442695, %v1394_v1  ;;  %v1549_v56 = vmul.f32 1.442695, %v1395_v39  ;;  %1896 = vadd.xlane.f32.xlu1 %v1895_v32  ;;  %v1904_v13 = vadd.f32 %v3960_v57, %v1903_v27  ;;  %v3966_v48 = vpop.eup %2742 }
 0x423   : > { %5021 = vst [vmem:[#allocation95_spill] sm:$0xff] %v3960_v57  ;;  %v1551_v55 = vmul.f32 1.442695, %v1396_v34  ;;  %v5024_v1 = vld [vmem:[#allocation67_spill] sm:$0xff]  ;;  %v3970_v4 = vpop.eup %2744  ;;  %v1605_v34 = vmul.f32 1.442695, %v1423_v23  ;;  %v1825_v53 = vadd.f32 %v3966_v48, %v1824_v30 }
 0x424   : > { %2746 = vpow2.f32 %v1545_v3  ;;  %1317 = vmax.xlane.f32.xlu2 %v1316_v22  ;;  %v1304_v39 = vmax.f32 %v5024_v1, %v5023_v20  ;;  %5025 = vst [vmem:[#allocation43_spill] sm:$0xff] %v3970_v4  ;;  %v5030_v30 = vld [vmem:[#allocation65_spill] sm:$0xff] }
 0x425   : > { %2748 = vpow2.f32 %v1547_v41  ;;  %v1905_v41 = vadd.f32 %v3970_v4, %v1904_v13  ;;  %v5039_v4 = vld [vmem:[#allocation38_spill] sm:$0xff] }
 0x426   : > { %2750 = vpow2.f32 %v1601_v21  ;;  %v1424_v21 = vsub.f32 %v5026_v49, %v5014_v18  ;;  %v5033_v49 = vld [vmem:[#allocation40_spill] sm:$0xff]  ;;  %v1416_v37 = vsub.f32 %v5039_v4, %v3848_v51 }
 0x427   : > { %2752 = vpow2.f32 %v1549_v56  ;;  %v1248_v32 = vpop.xlane.xlu2 %1247  ;;  %v5042_v4 = vld [vmem:[#allocation60_spill] sm:$0xff] }
 0x428   : > { %2754 = vpow2.f32 %v1603_v54  ;;  %v1397_v22 = vsub.f32 %v3512_v61, %v1248_v32  ;;  %v1398_v3 = vsub.f32 %v3514_v62, %v1248_v32  ;;  %v1399_v27 = vsub.f32 %v3508_v59, %v1248_v32 }
 0x429   : > { %2756 = vpow2.f32 %v1551_v55  ;;  %v1400_v56 = vsub.f32 %v3510_v60, %v1248_v32  ;;  %v1607_v23 = vmul.f32 1.442695, %v1424_v21  ;;  %v1305_v55 = vmax.f32 %v1304_v39, %v5030_v30  ;;  %v5032_v32 = vld [vmem:[#allocation39_spill] sm:$0xff] }
 0x42a   : > { %v3979_v24 = vpop.eup %2746  ;;  %v1553_v54 = vmul.f32 1.442695, %v1397_v22  ;;  %v1555_v57 = vmul.f32 1.442695, %v1398_v3  ;;  %v1557_v62 = vmul.f32 1.442695, %v1399_v27  ;;  %1906 = vadd.xlane.f32.xlu1 %v1905_v41  ;;  %v1413_v22 = vsub.f32 %v5032_v32, %v3848_v51 }
 0x42b   : > { %5027 = vst [vmem:[#allocation44_spill] sm:$0xff] %v3979_v24  ;;  %v3982_v61 = vpop.eup %2748  ;;  %v1559_v3 = vmul.f32 1.442695, %v1400_v56  ;;  %v1414_v41 = vsub.f32 %v5033_v49, %v3848_v51  ;;  %v5037_v32 = vld [vmem:[#allocation66_spill] sm:$0xff] }
 0x42c   : > { %5028 = vst [vmem:[#allocation74_spill] sm:$0xff] %v3982_v61  ;;  %v3984_v59 = vpop.eup %2750  ;;  %2758 = vpow2.f32 %v1553_v54  ;;  %1826 = vadd.xlane.f32.xlu2 %v1825_v53  ;;  %v1783_v18 = vadd.f32 %v3982_v61, %v3979_v24  ;;  %v1306_v49 = vmax.f32 %v1305_v55, %v5037_v32  ;;  %v1405_v55 = vsub.f32 %v3532_v8, %v3877_v0 }
 0x42d   : > { %v3988_v13 = vpop.eup %2752  ;;  %2760 = vpow2.f32 %v1555_v57  ;;  %v5035_v57 = vld [vmem:[#allocation37_spill] sm:$0xff] }
 0x42e   : > { %5029 = vst [vmem:[#allocation41_spill] sm:$0xff] %v3988_v13  ;;  %v3991_v60 = vpop.eup %2754  ;;  %2762 = vpow2.f32 %v1605_v34  ;;  %v1784_v27 = vadd.f32 %v3988_v13, %v1783_v18  ;;  %v1415_v39 = vsub.f32 %v5035_v57, %v3848_v51  ;;  %v1585_v18 = vmul.f32 1.442695, %v1413_v22 }
 0x42f   : > { %5031 = vst [vmem:[#allocation68_spill] sm:$0xff] %v3991_v60  ;;  %2764 = vpow2.f32 %v1557_v62  ;;  %v3998_v53 = vpop.xlane.xlu2 %1342  ;;  %v4000_v54 = vpop.eup %2756  ;;  %v1818_v34 = vadd.f32 %v3991_v60, %v3984_v59 }
 0x430   : > { %5034 = vst [vmem:[#allocation67_spill] sm:$0xff] %v4000_v54  ;;  %2766 = vpow2.f32 %v1607_v23  ;;  %v1785_v21 = vadd.f32 %v4000_v54, %v1784_v27  ;;  %v1587_v23 = vmul.f32 1.442695, %v1414_v41  ;;  %v1589_v54 = vmul.f32 1.442695, %v1415_v39  ;;  %v5043_v41 = vld [vmem:[#allocation59_spill] sm:$0xff] }
 0x431   : > { %2768 = vpow2.f32 %v1559_v3  ;;  %v1406_v39 = vsub.f32 %v3534_v9, %v3877_v0  ;;  %v5045_v9 = vld [vmem:[#allocation52_spill] sm:$0xff] }
 0x432   : > { %v4007_v56 = vpop.eup %2758  ;;  %1786 = vadd.xlane.f32.xlu0 %v1785_v21  ;;  %2770 = vpow2.f32 %v1585_v18  ;;  %v1294_v21 = vmax.f32 %v5043_v41, %v5042_v4 }
 0x433   : > { %5036 = vst [vmem:[#allocation42_spill] sm:$0xff] %v4007_v56  ;;  %v4010_v62 = vpop.eup %2760  ;;  %2772 = vpow2.f32 %v1587_v23  ;;  %v1569_v23 = vmul.f32 1.442695, %v1405_v55 }
 0x434   : > { %5038 = vst [vmem:[#allocation65_spill] sm:$0xff] %v4010_v62  ;;  %v4014_v17 = vpop.eup %2762  ;;  %1307 = vmax.xlane.f32.xlu2 %v1306_v49  ;;  %v1788_v27 = vadd.f32 %v4010_v62, %v4007_v56  ;;  %v1591_v49 = vmul.f32 1.442695, %v1416_v37  ;;  %2774 = vpow2.f32 %v1589_v54 }
 0x435   : > { %5040 = vst [vmem:[#allocation39_spill] sm:$0xff] %v4014_v17  ;;  %v4018_v57 = vpop.eup %2764  ;;  %v1819_v22 = vadd.f32 %v4014_v17, %v1818_v34 }
 0x436   : > { %5041 = vst [vmem:[#allocation40_spill] sm:$0xff] %v4018_v57  ;;  %v1789_v3 = vadd.f32 %v4018_v57, %v1788_v27  ;;  %v4024_v51 = vpop.eup %2766  ;;  %v5044_v27 = vld [vmem:[#allocation51_spill] sm:$0xff]  ;;  %2776 = vpow2.f32 %v1591_v49 }
 0x437   : > { %v1348_v13 = vpop.xlane.xlu2 %1347  ;;  %v4028_v61 = vpop.eup %2768  ;;  %v1429_v24 = vsub.f32 %v5044_v27, %v3855_v63  ;;  %v1820_v37 = vadd.f32 %v4024_v51, %v1819_v22  ;;  %v1571_v27 = vmul.f32 1.442695, %v1406_v39 }
 0x438   : > { %v1477_v34 = vsub.f32 %v3716_v19, %v1348_v13  ;;  %v1478_v18 = vsub.f32 %v3718_v28, %v1348_v13  ;;  %v1479_v8 = vsub.f32 %v3712_v26, %v1348_v13  ;;  %v1790_v57 = vadd.f32 %v4028_v61, %v1789_v3  ;;  %v5046_v26 = vld [vmem:[#allocation57_spill] sm:$0xff]  ;;  %v4043_v60 = vpop.eup %2770 }
 0x439   : > { %v1480_v62 = vsub.f32 %v3714_v7, %v1348_v13  ;;  %v1430_v19 = vsub.f32 %v5045_v9, %v3855_v63  ;;  %v1295_v54 = vmax.f32 %v1294_v21, %v5046_v26  ;;  %v4045_v3 = vpop.eup %2772  ;;  %v1617_v22 = vmul.f32 1.442695, %v1429_v24  ;;  %v5047_v21 = vld [vmem:[#allocation58_spill] sm:$0xff] }
 0x43a   : > { %v1713_v56 = vmul.f32 1.442695, %v1477_v34  ;;  %v1715_v17 = vmul.f32 1.442695, %v1478_v18  ;;  %v1717_v28 = vmul.f32 1.442695, %v1479_v8  ;;  %1791 = vadd.xlane.f32.xlu1 %v1790_v57  ;;  %v1407_v7 = vsub.f32 %v3528_v5, %v3877_v0  ;;  %v4049_v55 = vpop.eup %2774 }
 0x43b   : > { %v1719_v13 = vmul.f32 1.442695, %v1480_v62  ;;  %v1619_v49 = vmul.f32 1.442695, %v1430_v19  ;;  %v1296_v34 = vmax.f32 %v1295_v54, %v5047_v21  ;;  %v1408_v5 = vsub.f32 %v3530_v6, %v3877_v0  ;;  %v5050_v6 = vld [vmem:[#allocation49_spill] sm:$0xff] }
 0x43c   : > { %2778 = vpow2.f32 %v1713_v56  ;;  %1821 = vadd.xlane.f32.xlu2 %v1820_v37  ;;  %v4055_v18 = vpop.eup %2776  ;;  %v1808_v62 = vadd.f32 %v4045_v3, %v4043_v60  ;;  %v1431_v0 = vsub.f32 %v5050_v6, %v3855_v63 }
 0x43d   : > { %2780 = vpow2.f32 %v1715_v17  ;;  %v1573_v17 = vmul.f32 1.442695, %v1407_v7 }
 0x43e   : > { %2782 = vpow2.f32 %v1569_v23  ;;  %v1809_v7 = vadd.f32 %v4049_v55, %v1808_v62 }
 0x43f   : > { %2784 = vpow2.f32 %v1717_v28  ;;  %v1233_v57 = vpop.xlane.xlu2 %1232  ;;  %v5051_v28 = vld [vmem:[#allocation50_spill] sm:$0xff] }
 0x440   : > { %2786 = vpow2.f32 %v1571_v27  ;;  %v1385_v56 = vsub.f32 %v3484_v46, %v1233_v57  ;;  %v1386_v39 = vsub.f32 %v3486_v47, %v1233_v57  ;;  %v1387_v24 = vsub.f32 %v3476_v43, %v1233_v57  ;;  %v4066_v43 = vpop.xlane.xlu0 %1367 }
 0x441   : > { %2788 = vpow2.f32 %v1617_v22  ;;  %v1388_v37 = vsub.f32 %v3478_v44, %v1233_v57  ;;  %v1432_v54 = vsub.f32 %v5051_v28, %v3855_v63  ;;  %v1575_v22 = vmul.f32 1.442695, %v1408_v5 }
 0x442   : > { %v4061_v8 = vpop.eup %2778  ;;  %2790 = vpow2.f32 %v1719_v13  ;;  %v1529_v46 = vmul.f32 1.442695, %v1385_v56  ;;  %v1531_v23 = vmul.f32 1.442695, %v1386_v39  ;;  %v1533_v9 = vmul.f32 1.442695, %v1387_v24 }
 0x443   : > { %5048 = vst [vmem:[#allocation37_spill] sm:$0xff] %v4061_v8  ;;  %v4064_v47 = vpop.eup %2780  ;;  %2792 = vpow2.f32 %v1619_v49  ;;  %v1493_v49 = vsub.f32 %v3784_v45, %v4066_v43  ;;  %v1535_v57 = vmul.f32 1.442695, %v1388_v37  ;;  %v1621_v5 = vmul.f32 1.442695, %v1431_v0 }
 0x444   : > { %5049 = vst [vmem:[#allocation66_spill] sm:$0xff] %v4064_v47  ;;  %v4068_v19 = vpop.eup %2782  ;;  %2794 = vpow2.f32 %v1529_v46  ;;  %1297 = vmax.xlane.f32.xlu2 %v1296_v34  ;;  %v1888_v44 = vadd.f32 %v4064_v47, %v4061_v8  ;;  %v1485_v34 = vsub.f32 %v3744_v38, %v3919_v11  ;;  %v1623_v62 = vmul.f32 1.442695, %v1432_v54 }
 0x445   : > { %v4076_v27 = vpop.eup %2784  ;;  %2796 = vpow2.f32 %v1531_v23  ;;  %v1486_v46 = vsub.f32 %v3746_v58, %v3919_v11  ;;  %v1810_v6 = vadd.f32 %v4055_v18, %v1809_v7  ;;  %v1495_v58 = vsub.f32 %v3794_v36, %v4066_v43 }
 0x446   : > { %5052 = vst [vmem:[#allocation38_spill] sm:$0xff] %v4076_v27  ;;  %v4079_v13 = vpop.eup %2786  ;;  %2798 = vpow2.f32 %v1573_v17  ;;  %v1889_v63 = vadd.f32 %v4076_v27, %v1888_v44  ;;  %v1494_v17 = vsub.f32 %v3786_v42, %v4066_v43  ;;  %v1729_v28 = vmul.f32 1.442695, %v1485_v34 }
 0x447   : > { %v4084_v56 = vpop.eup %2788  ;;  %2800 = vpow2.f32 %v1533_v9  ;;  %v4088_v39 = vpop.xlane.xlu2 %1237  ;;  %v1798_v38 = vadd.f32 %v4079_v13, %v4068_v19  ;;  %v1745_v9 = vmul.f32 1.442695, %v1493_v49  ;;  %v1731_v54 = vmul.f32 1.442695, %v1486_v46 }
 0x448   : > { %v4090_v24 = vpop.eup %2790  ;;  %2802 = vpow2.f32 %v1575_v22  ;;  %v1747_v49 = vmul.f32 1.442695, %v1494_v17  ;;  %v1487_v36 = vsub.f32 %v3738_v50, %v3919_v11  ;;  %v1749_v34 = vmul.f32 1.442695, %v1495_v58 }
 0x449   : > { %5053 = vst [vmem:[#allocation60_spill] sm:$0xff] %v4090_v24  ;;  %v4094_v45 = vpop.eup %2792  ;;  %v1890_v37 = vadd.f32 %v4090_v24, %v1889_v63  ;;  %2804 = vpow2.f32 %v1535_v57  ;;  %v1496_v50 = vsub.f32 %v3798_v40, %v4066_v43 }
 0x44a   : > { %v4101_v23 = vpop.eup %2794  ;;  %2806 = vpow2.f32 %v1621_v5  ;;  %v1828_v46 = vadd.f32 %v4094_v45, %v4084_v56 }
 0x44b   : > { %v4104_v0 = vpop.eup %2796  ;;  %1891 = vadd.xlane.f32.xlu0 %v1890_v37  ;;  %2808 = vpow2.f32 %v1623_v62 }
 0x44c   : > { %v4108_v42 = vpop.eup %2798  ;;  %1811 = vadd.xlane.f32.xlu2 %v1810_v6  ;;  %v1773_v44 = vadd.f32 %v4104_v0, %v4101_v23  ;;  %2810 = vpow2.f32 %v1745_v9 }
 0x44d   : > { %v4112_v22 = vpop.eup %2800  ;;  %v1799_v7 = vadd.f32 %v4108_v42, %v1798_v38  ;;  %2812 = vpow2.f32 %v1729_v28  ;;  %v1733_v28 = vmul.f32 1.442695, %v1487_v36 }
 0x44e   : > { %v1774_v57 = vadd.f32 %v4112_v22, %v1773_v44  ;;  %v4118_v63 = vpop.eup %2802  ;;  %2814 = vpow2.f32 %v1731_v54 }
 0x44f   : > { %v1333_v5 = vpop.xlane.xlu2 %1332  ;;  %v4122_v37 = vpop.eup %2804  ;;  %2816 = vpow2.f32 %v1747_v49  ;;  %v1800_v6 = vadd.f32 %v4118_v63, %v1799_v7  ;;  %v1751_v49 = vmul.f32 1.442695, %v1496_v50  ;;  %v5057_v7 = vld [vmem:[#allocation93_spill] sm:$0xff] }
 0x450   : > { %v1465_v62 = vsub.f32 %v3692_v15, %v1333_v5  ;;  %v1466_v17 = vsub.f32 %v3694_v16, %v1333_v5  ;;  %v1467_v38 = vsub.f32 %v4966_v12, %v1333_v5  ;;  %v1775_v9 = vadd.f32 %v4122_v37, %v1774_v57  ;;  %v4131_v58 = vpop.eup %2806  ;;  %v5054_v16 = vld [vmem:[#allocation99_spill] sm:$0xff] }
 0x451   : > { %v1468_v44 = vsub.f32 %v4969_v29, %v1333_v5  ;;  %v4134_v15 = vpop.eup %2808  ;;  %2818 = vpow2.f32 %v1749_v34  ;;  %v1488_v12 = vsub.f32 %v5054_v16, %v3919_v11  ;;  %v1473_v29 = vsub.f32 %v5057_v7, %v3998_v53  ;;  %v5063_v16 = vld [vmem:[#allocation87_spill] sm:$0xff] }
 0x452   : > { %v1689_v54 = vmul.f32 1.442695, %v1465_v62  ;;  %v1691_v24 = vmul.f32 1.442695, %v1466_v17  ;;  %v1693_v27 = vmul.f32 1.442695, %v1467_v38  ;;  %1776 = vadd.xlane.f32.xlu1 %v1775_v9  ;;  %v4138_v40 = vpop.eup %2810  ;;  %v1829_v36 = vadd.f32 %v4131_v58, %v1828_v46 }
 0x453   : > { %5055 = vst [vmem:[#allocation59_spill] sm:$0xff] %v4138_v40  ;;  %v4140_v43 = vpop.eup %2812  ;;  %v1695_v34 = vmul.f32 1.442695, %v1468_v44  ;;  %v1735_v5 = vmul.f32 1.442695, %v1488_v12  ;;  %v5060_v17 = vld [vmem:[#allocation94_spill] sm:$0xff] }
 0x454   : > { %2820 = vpow2.f32 %v1689_v54  ;;  %1801 = vadd.xlane.f32.xlu2 %v1800_v6  ;;  %5056 = vst [vmem:[#allocation51_spill] sm:$0xff] %v4140_v43  ;;  %v4145_v57 = vpop.eup %2814  ;;  %v1474_v38 = vsub.f32 %v5060_v17, %v3998_v53  ;;  %v5061_v9 = vld [vmem:[#allocation89_spill] sm:$0xff]  ;;  %v5062_v6 = vld [vmem:[#allocation90_spill] sm:$0xff]  ;;  %v1705_v46 = vmul.f32 1.442695, %v1473_v29  ;;  %v5066_v12 = vld [vmem:[#allocation88_spill] sm:$0xff] }
 0x455   : > { %2822 = vpow2.f32 %v1691_v24  ;;  %5058 = vst [vmem:[#allocation52_spill] sm:$0xff] %v4145_v57  ;;  %v4147_v11 = vpop.eup %2816  ;;  %v1898_v44 = vadd.f32 %v4145_v57, %v4140_v43 }
 0x456   : > { %2824 = vpow2.f32 %v1733_v28  ;;  %5059 = vst [vmem:[#allocation57_spill] sm:$0xff] %v4147_v11  ;;  %v1830_v28 = vadd.f32 %v4134_v15, %v1829_v36 }
 0x457   : > { %2826 = vpow2.f32 %v1693_v27  ;;  %v1338_v62 = vpop.xlane.xlu2 %1337  ;;  %v4154_v7 = vpop.eup %2818 }
 0x458   : > { %v1469_v50 = vsub.f32 %v5061_v9, %v1338_v62  ;;  %v1470_v54 = vsub.f32 %v5062_v6, %v1338_v62  ;;  %v1471_v24 = vsub.f32 %v5063_v16, %v1338_v62  ;;  %5064 = vst [vmem:[#allocation58_spill] sm:$0xff] %v4154_v7  ;;  %2828 = vpow2.f32 %v1751_v49 }
 0x459   : > { %2830 = vpow2.f32 %v1695_v34  ;;  %v1472_v17 = vsub.f32 %v5066_v12, %v1338_v62  ;;  %v1707_v49 = vmul.f32 1.442695, %v1474_v38  ;;  %v5070_v34 = vld [vmem:[#allocation91_spill] sm:$0xff] }
 0x45a   : > { %v4159_v27 = vpop.eup %2820  ;;  %v1697_v47 = vmul.f32 1.442695, %v1469_v50  ;;  %v1699_v9 = vmul.f32 1.442695, %v1470_v54  ;;  %2832 = vpow2.f32 %v1735_v5  ;;  %v1701_v6 = vmul.f32 1.442695, %v1471_v24 }
 0x45b   : > { %5065 = vst [vmem:[#allocation49_spill] sm:$0xff] %v4159_v27  ;;  %v4162_v8 = vpop.eup %2822  ;;  %v1475_v57 = vsub.f32 %v5070_v34, %v3998_v53  ;;  %v5071_v5 = vld [vmem:[#allocation35_spill] sm:$0xff]  ;;  %v1703_v54 = vmul.f32 1.442695, %v1472_v17  ;;  %v5073_v24 = vld [vmem:[#allocation36_spill] sm:$0xff] }
 0x45c   : > { %5067 = vst [vmem:[#allocation50_spill] sm:$0xff] %v4162_v8  ;;  %v4164_v16 = vpop.eup %2824  ;;  %2834 = vpow2.f32 %v1697_v47  ;;  %1831 = vadd.xlane.f32.xlu2 %v1830_v28  ;;  %v1873_v29 = vadd.f32 %v4162_v8, %v4159_v27  ;;  %v1389_v50 = vsub.f32 %v5071_v5, %v4088_v39  ;;  %v1390_v28 = vsub.f32 %v5073_v24, %v4088_v39  ;;  %v5079_v27 = vld [vmem:[#allocation33_spill] sm:$0xff] }
 0x45d   : > { %5068 = vst [vmem:[#allocation99_spill] sm:$0xff] %v4164_v16  ;;  %v4168_v36 = vpop.eup %2826  ;;  %2836 = vpow2.f32 %v1699_v9  ;;  %v1899_v62 = vadd.f32 %v4164_v16, %v1898_v44  ;;  %v1908_v9 = vadd.f32 %v4147_v11, %v4138_v40  ;;  %v5076_v44 = vld [vmem:[#allocation92_spill] sm:$0xff]  ;;  %v1391_v16 = vsub.f32 %v5079_v27, %v4088_v39 }
 0x45e   : > { %5069 = vst [vmem:[#allocation93_spill] sm:$0xff] %v4168_v36  ;;  %2838 = vpow2.f32 %v1705_v46  ;;  %v1874_v38 = vadd.f32 %v4168_v36, %v1873_v29  ;;  %v4176_v47 = vpop.eup %2828  ;;  %v1476_v17 = vsub.f32 %v5076_v44, %v3998_v53  ;;  %v1709_v29 = vmul.f32 1.442695, %v1475_v57 }
 0x45f   : > { %5072 = vst [vmem:[#allocation94_spill] sm:$0xff] %v4176_v47  ;;  %2840 = vpow2.f32 %v1701_v6  ;;  %v4180_v12 = vpop.xlane.xlu2 %1222  ;;  %v4184_v34 = vpop.eup %2830  ;;  %v1537_v24 = vmul.f32 1.442695, %v1389_v50  ;;  %v1909_v43 = vadd.f32 %v4154_v7, %v1908_v9 }
 0x460   : > { %5074 = vst [vmem:[#allocation89_spill] sm:$0xff] %v4184_v34  ;;  %2842 = vpow2.f32 %v1707_v49  ;;  %v4186_v46 = vpop.eup %2832  ;;  %v1875_v5 = vadd.f32 %v4184_v34, %v1874_v38  ;;  %v1539_v49 = vmul.f32 1.442695, %v1390_v28  ;;  %v1711_v50 = vmul.f32 1.442695, %v1476_v17 }
 0x461   : > { %5075 = vst [vmem:[#allocation90_spill] sm:$0xff] %v4186_v46  ;;  %2844 = vpow2.f32 %v1703_v54  ;;  %v1900_v6 = vadd.f32 %v4186_v46, %v1899_v62  ;;  %v5083_v54 = vld [vmem:[#allocation34_spill] sm:$0xff]  ;;  %v1541_v28 = vmul.f32 1.442695, %v1391_v16  ;;  %v1910_v44 = vadd.f32 %v4176_v47, %v1909_v43  ;;  %v5088_v46 = vld [vmem:[#allocation29_spill] sm:$0xff] }
 0x462   : > { %v4191_v36 = vpop.eup %2834  ;;  %1876 = vadd.xlane.f32.xlu0 %v1875_v5  ;;  %2846 = vpow2.f32 %v1709_v29  ;;  %v1392_v38 = vsub.f32 %v5083_v54, %v4088_v39  ;;  %v5086_v29 = vld [vmem:[#allocation31_spill] sm:$0xff]  ;;  %v5089_v39 = vld [vmem:[#allocation28_spill] sm:$0xff] }
 0x463   : > { %5077 = vst [vmem:[#allocation87_spill] sm:$0xff] %v4191_v36  ;;  %v4194_v8 = vpop.eup %2836  ;;  %2848 = vpow2.f32 %v1537_v24  ;;  %v1378_v24 = vsub.f32 %v5089_v39, %v4180_v12 }
 0x464   : > { %5078 = vst [vmem:[#allocation88_spill] sm:$0xff] %v4194_v8  ;;  %v4199_v11 = vpop.eup %2838  ;;  %1901 = vadd.xlane.f32.xlu2 %v1900_v6  ;;  %v1878_v53 = vadd.f32 %v4194_v8, %v4191_v36  ;;  %2850 = vpow2.f32 %v1539_v49  ;;  %v5085_v6 = vld [vmem:[#allocation27_spill] sm:$0xff]  ;;  %v5087_v8 = vld [vmem:[#allocation32_spill] sm:$0xff]  ;;  %v1543_v49 = vmul.f32 1.442695, %v1392_v38 }
 0x465   : > { %5080 = vst [vmem:[#allocation91_spill] sm:$0xff] %v4199_v11  ;;  %v4203_v57 = vpop.eup %2840  ;;  %v1377_v34 = vsub.f32 %v5085_v6, %v4180_v12  ;;  %2852 = vpow2.f32 %v1711_v50  ;;  %v1515_v38 = vmul.f32 1.442695, %v1378_v24 }
 0x466   : > { %5081 = vst [vmem:[#allocation35_spill] sm:$0xff] %v4203_v57  ;;  %v4205_v62 = vpop.eup %2842  ;;  %v1879_v27 = vadd.f32 %v4203_v57, %v1878_v53  ;;  %v5090_v53 = vld [vmem:[#allocation30_spill] sm:$0xff]  ;;  %2854 = vpow2.f32 %v1541_v28  ;;  %v5094_v28 = vld [vmem:[#allocation79_spill] sm:$0xff] }
 0x467   : > { %5082 = vst [vmem:[#allocation36_spill] sm:$0xff] %v4205_v62  ;;  %v1228_v9 = vpop.xlane.xlu2 %1227  ;;  %v4211_v5 = vpop.eup %2844  ;;  %v1883_v43 = vadd.f32 %v4205_v62, %v4199_v11  ;;  %v1513_v50 = vmul.f32 1.442695, %v1377_v34 }
 0x468   : > { %5084 = vst [vmem:[#allocation92_spill] sm:$0xff] %v4211_v5  ;;  %v1381_v17 = vsub.f32 %v5086_v29, %v1228_v9  ;;  %v1382_v36 = vsub.f32 %v5087_v8, %v1228_v9  ;;  %v1383_v7 = vsub.f32 %v5088_v46, %v1228_v9  ;;  %v1880_v16 = vadd.f32 %v4211_v5, %v1879_v27  ;;  %v4224_v47 = vpop.eup %2846  ;;  %v5092_v27 = vld [vmem:[#allocation25_spill] sm:$0xff] }
 0x469   : > { %v1384_v54 = vsub.f32 %v5090_v53, %v1228_v9  ;;  %5091 = vst [vmem:[#allocation33_spill] sm:$0xff] %v4224_v47  ;;  %v4226_v46 = vpop.eup %2848  ;;  %v1379_v39 = vsub.f32 %v5092_v27, %v4180_v12  ;;  %v1884_v9 = vadd.f32 %v4224_v47, %v1883_v43 }
 0x46a   : > { %v1521_v57 = vmul.f32 1.442695, %v1381_v17  ;;  %v1523_v6 = vmul.f32 1.442695, %v1382_v36  ;;  %v1525_v8 = vmul.f32 1.442695, %v1383_v7  ;;  %1881 = vadd.xlane.f32.xlu1 %v1880_v16  ;;  %v4228_v29 = vpop.eup %2850 }
 0x46b   : > { %v1527_v36 = vmul.f32 1.442695, %v1384_v54  ;;  %v4233_v17 = vpop.eup %2852  ;;  %v5096_v16 = vld [vmem:[#allocation77_spill] sm:$0xff]  ;;  %v1517_v24 = vmul.f32 1.442695, %v1379_v39  ;;  %v1778_v43 = vadd.f32 %v4228_v29, %v4226_v46  ;;  %v5098_v54 = vld [vmem:[#allocation78_spill] sm:$0xff] }
 0x46c   : > { %2856 = vpow2.f32 %v1521_v57  ;;  %1911 = vadd.xlane.f32.xlu2 %v1910_v44  ;;  %5093 = vst [vmem:[#allocation34_spill] sm:$0xff] %v4233_v17  ;;  %v5095_v57 = vld [vmem:[#allocation80_spill] sm:$0xff]  ;;  %v4238_v5 = vpop.eup %2854 }
 0x46d   : > { %2858 = vpow2.f32 %v1523_v6  ;;  %v1885_v6 = vadd.f32 %v4233_v17, %v1884_v9  ;;  %v5105_v17 = vld [vmem:[#allocation84_spill] sm:$0xff] }
 0x46e   : > { %2860 = vpow2.f32 %v1543_v49 }
 0x46f   : > { %2862 = vpow2.f32 %v1525_v8  ;;  %v1323_v7 = vpop.xlane.xlu2 %1322 }
 0x470   : > { %2864 = vpow2.f32 %v1513_v50  ;;  %v1457_v34 = vsub.f32 %v5094_v28, %v1323_v7  ;;  %v1458_v44 = vsub.f32 %v5095_v57, %v1323_v7  ;;  %v1459_v53 = vsub.f32 %v5096_v16, %v1323_v7  ;;  %v5100_v57 = vld [vmem:[#allocation26_spill] sm:$0xff] }
 0x471   : > { %2866 = vpow2.f32 %v1515_v38  ;;  %v1460_v8 = vsub.f32 %v5098_v54, %v1323_v7  ;;  %v1380_v16 = vsub.f32 %v5100_v57, %v4180_v12 }
 0x472   : > { %v4243_v49 = vpop.eup %2856  ;;  %2868 = vpow2.f32 %v1527_v36  ;;  %v1673_v50 = vmul.f32 1.442695, %v1457_v34  ;;  %v1675_v27 = vmul.f32 1.442695, %v1458_v44  ;;  %v1677_v47 = vmul.f32 1.442695, %v1459_v53 }
 0x473   : > { %5097 = vst [vmem:[#allocation27_spill] sm:$0xff] %v4243_v49  ;;  %v4246_v28 = vpop.eup %2858  ;;  %v1779_v36 = vadd.f32 %v4238_v5, %v1778_v43  ;;  %v1679_v34 = vmul.f32 1.442695, %v1460_v8  ;;  %v1519_v53 = vmul.f32 1.442695, %v1380_v16 }
 0x474   : > { %5099 = vst [vmem:[#allocation31_spill] sm:$0xff] %v4246_v28  ;;  %v4250_v38 = vpop.eup %2860  ;;  %2870 = vpow2.f32 %v1673_v50  ;;  %1886 = vadd.xlane.f32.xlu2 %v1885_v6  ;;  %v1768_v39 = vadd.f32 %v4246_v28, %v4243_v49  ;;  %v5104_v50 = vld [vmem:[#allocation83_spill] sm:$0xff] }
 0x475   : > { %v4254_v9 = vpop.eup %2862  ;;  %2872 = vpow2.f32 %v1675_v27  ;;  %v5106_v27 = vld [vmem:[#allocation81_spill] sm:$0xff] }
 0x476   : > { %5101 = vst [vmem:[#allocation32_spill] sm:$0xff] %v4254_v9  ;;  %v4257_v7 = vpop.eup %2864  ;;  %2874 = vpow2.f32 %v1517_v24  ;;  %v1769_v44 = vadd.f32 %v4254_v9, %v1768_v39  ;;  %v1780_v24 = vadd.f32 %v4250_v38, %v1779_v36 }
 0x477   : > { %v4260_v12 = vpop.eup %2866  ;;  %2876 = vpow2.f32 %v1677_v47  ;;  %v1328_v54 = vpop.xlane.xlu2 %1327 }
 0x478   : > { %5102 = vst [vmem:[#allocation29_spill] sm:$0xff] %v4260_v12  ;;  %v4262_v6 = vpop.eup %2868  ;;  %v1461_v57 = vsub.f32 %v5104_v50, %v1328_v54  ;;  %v1462_v62 = vsub.f32 %v5105_v17, %v1328_v54  ;;  %v1463_v11 = vsub.f32 %v5106_v27, %v1328_v54  ;;  %2878 = vpow2.f32 %v1679_v34  ;;  %v5109_v50 = vld [vmem:[#allocation82_spill] sm:$0xff] }
 0x479   : > { %5103 = vst [vmem:[#allocation28_spill] sm:$0xff] %v4262_v6  ;;  %v1770_v43 = vadd.f32 %v4262_v6, %v1769_v44  ;;  %v1763_v47 = vadd.f32 %v4260_v12, %v4257_v7  ;;  %2880 = vpow2.f32 %v1519_v53  ;;  %v1464_v9 = vsub.f32 %v5109_v50, %v1328_v54  ;;  %v5114_v50 = vld [vmem:[#allocation20_spill] sm:$0xff]  ;;  %v5129_v12 = vld [vmem:[#allocation62_spill] sm:$0xff] }
 0x47a   : > { %v4269_v8 = vpop.eup %2870  ;;  %v1681_v39 = vmul.f32 1.442695, %v1461_v57  ;;  %v1683_v40 = vmul.f32 1.442695, %v1462_v62  ;;  %v1685_v17 = vmul.f32 1.442695, %v1463_v11 }
 0x47b   : > { %5107 = vst [vmem:[#allocation30_spill] sm:$0xff] %v4269_v8  ;;  %v4273_v16 = vpop.eup %2872  ;;  %1771 = vadd.xlane.f32.xlu0 %v1770_v43  ;;  %v1687_v53 = vmul.f32 1.442695, %v1464_v9  ;;  %v5113_v11 = vld [vmem:[#allocation19_spill] sm:$0xff] }
 0x47c   : > { %5108 = vst [vmem:[#allocation25_spill] sm:$0xff] %v4273_v16  ;;  %v4276_v27 = vpop.eup %2874  ;;  %2882 = vpow2.f32 %v1681_v39  ;;  %1781 = vadd.xlane.f32.xlu2 %v1780_v24  ;;  %v1863_v36 = vadd.f32 %v4273_v16, %v4269_v8  ;;  %v5115_v24 = vld [vmem:[#allocation17_spill] sm:$0xff]  ;;  %v1303_v16 = vpop.xlane.xlu1 %1302  ;;  %v5117_v8 = vld [vmem:[#allocation18_spill] sm:$0xff] }
 0x47d   : > { %5110 = vst [vmem:[#allocation79_spill] sm:$0xff] %v4276_v27  ;;  %v4280_v34 = vpop.eup %2876  ;;  %2884 = vpow2.f32 %v1683_v40  ;;  %v1764_v44 = vadd.f32 %v4276_v27, %v1763_v47 }
 0x47e   : > { %5111 = vst [vmem:[#allocation80_spill] sm:$0xff] %v4280_v34  ;;  %v1864_v62 = vadd.f32 %v4280_v34, %v1863_v36  ;;  %2886 = vpow2.f32 %v1685_v17  ;;  %v4284_v54 = vpop.eup %2878 }
 0x47f   : > { %v1213_v57 = vpop.xlane.xlu2 %1212  ;;  %5112 = vst [vmem:[#allocation77_spill] sm:$0xff] %v4284_v54  ;;  %v4289_v28 = vpop.eup %2880  ;;  %2888 = vpow2.f32 %v1687_v53  ;;  %v5123_v53 = vld [vmem:[#allocation23_spill] sm:$0xff] }
 0x480   : > { %v1369_v43 = vsub.f32 %v5113_v11, %v1213_v57  ;;  %v1370_v39 = vsub.f32 %v5114_v50, %v1213_v57  ;;  %v1371_v6 = vsub.f32 %v5115_v24, %v1213_v57  ;;  %5116 = vst [vmem:[#allocation78_spill] sm:$0xff] %v4289_v28  ;;  %v1372_v40 = vsub.f32 %v5117_v8, %v1213_v57  ;;  %v5121_v8 = vld [vmem:[#allocation63_spill] sm:$0xff] }
 0x481   : > { %v1865_v36 = vadd.f32 %v4284_v54, %v1864_v62  ;;  %v1765_v17 = vadd.f32 %v4289_v28, %v1764_v44  ;;  %v1441_v62 = vsub.f32 %v5121_v8, %v1303_v16 }
 0x482   : > { %v4293_v34 = vpop.eup %2882  ;;  %v1497_v47 = vmul.f32 1.442695, %v1369_v43  ;;  %v1499_v9 = vmul.f32 1.442695, %v1370_v39  ;;  %v1501_v11 = vmul.f32 1.442695, %v1371_v6 }
 0x483   : > { %5118 = vst [vmem:[#allocation26_spill] sm:$0xff] %v4293_v34  ;;  %v4296_v49 = vpop.eup %2884  ;;  %1866 = vadd.xlane.f32.xlu1 %v1865_v36  ;;  %v1503_v57 = vmul.f32 1.442695, %v1372_v40  ;;  %v5122_v39 = vld [vmem:[#allocation64_spill] sm:$0xff] }
 0x484   : > { %5119 = vst [vmem:[#allocation83_spill] sm:$0xff] %v4296_v49  ;;  %2890 = vpow2.f32 %v1497_v47  ;;  %1766 = vadd.xlane.f32.xlu2 %v1765_v17  ;;  %v1868_v50 = vadd.f32 %v4296_v49, %v4293_v34  ;;  %v4300_v24 = vpop.eup %2886  ;;  %v1442_v54 = vsub.f32 %v5122_v39, %v1303_v16  ;;  %v5124_v36 = vld [vmem:[#allocation24_spill] sm:$0xff]  ;;  %v5125_v17 = vld [vmem:[#allocation21_spill] sm:$0xff]  ;;  %v1641_v49 = vmul.f32 1.442695, %v1441_v62  ;;  %v4310_v34 = vpop.xlane.xlu1 %1816 }
 0x485   : > { %5120 = vst [vmem:[#allocation84_spill] sm:$0xff] %v4300_v24  ;;  %2892 = vpow2.f32 %v1499_v9  ;;  %v4308_v27 = vpop.eup %2888 }
 0x486   : > { %v1869_v43 = vadd.f32 %v4300_v24, %v1868_v50  ;;  %2894 = vpow2.f32 %v1501_v11  ;;  %5126 = vst [vmem:[#allocation81_spill] sm:$0xff] %v4308_v27 }
 0x487   : > { %v1218_v44 = vpop.xlane.xlu2 %1217  ;;  %2896 = vpow2.f32 %v1503_v57 }
 0x488   : > { %v1373_v6 = vsub.f32 %v5123_v53, %v1218_v44  ;;  %v1374_v47 = vsub.f32 %v5124_v36, %v1218_v44  ;;  %v1375_v28 = vsub.f32 %v5125_v17, %v1218_v44  ;;  %v1376_v40 = vsub.f32 %v5003_v31, %v1218_v44  ;;  %v5127_v53 = vld [vmem:[#allocation61_spill] sm:$0xff] }
 0x489   : > { %v1870_v8 = vadd.f32 %v4308_v27, %v1869_v43  ;;  %v1443_v36 = vsub.f32 %v5127_v53, %v1303_v16  ;;  %v1643_v17 = vmul.f32 1.442695, %v1442_v54  ;;  %v1444_v31 = vsub.f32 %v5129_v12, %v1303_v16  ;;  %v5131_v53 = vld [vmem:[#allocation70_spill] sm:$0xff]  ;;  %v5140_v27 = vld [vmem:[#allocation76_spill] sm:$0xff] }
 0x48a   : > { %v4312_v9 = vpop.eup %2890  ;;  %v1505_v11 = vmul.f32 1.442695, %v1373_v6  ;;  %v1507_v50 = vmul.f32 1.442695, %v1374_v47  ;;  %v1509_v24 = vmul.f32 1.442695, %v1375_v28 }
 0x48b   : > { %v4316_v39 = vpop.eup %2892  ;;  %v1511_v44 = vmul.f32 1.442695, %v1376_v40  ;;  %v1645_v47 = vmul.f32 1.442695, %v1443_v36  ;;  %v1647_v16 = vmul.f32 1.442695, %v1444_v31 }
 0x48c   : > { %2898 = vpow2.f32 %v1505_v11  ;;  %1871 = vadd.xlane.f32.xlu2 %v1870_v8  ;;  %v1753_v62 = vadd.f32 %v4316_v39, %v4312_v9  ;;  %v4321_v57 = vpop.eup %2894 }
 0x48d   : > { %5128 = vst [vmem:[#allocation82_spill] sm:$0xff] %v4321_v57  ;;  %2900 = vpow2.f32 %v1507_v50  ;;  %v4325_v6 = vpop.eup %2896 }
 0x48e   : > { %2902 = vpow2.f32 %v1641_v49  ;;  %v1754_v43 = vadd.f32 %v4321_v57, %v1753_v62  ;;  %5130 = vst [vmem:[#allocation19_spill] sm:$0xff] %v4325_v6  ;;  %v5141_v57 = vld [vmem:[#allocation73_spill] sm:$0xff] }
 0x48f   : > { %2904 = vpow2.f32 %v1509_v24  ;;  %v1313_v28 = vpop.xlane.xlu2 %1312  ;;  %v1293_v24 = vpop.xlane.xlu1 %1292 }
 0x490   : > { %2906 = vpow2.f32 %v1643_v17  ;;  %v1449_v54 = vsub.f32 %v5002_v10, %v1313_v28  ;;  %v1450_v11 = vsub.f32 %v5001_v2, %v1313_v28  ;;  %v1451_v8 = vsub.f32 %v5005_v25, %v1313_v28 }
 0x491   : > { %v1452_v50 = vsub.f32 %v5131_v53, %v1313_v28  ;;  %v1755_v12 = vadd.f32 %v4325_v6, %v1754_v43  ;;  %2908 = vpow2.f32 %v1511_v44  ;;  %v5137_v44 = vld [vmem:[#allocation55_spill] sm:$0xff] }
 0x492   : > { %v4332_v49 = vpop.eup %2898  ;;  %v1657_v40 = vmul.f32 1.442695, %v1449_v54  ;;  %v1659_v62 = vmul.f32 1.442695, %v1450_v11  ;;  %2910 = vpow2.f32 %v1645_v47  ;;  %v1661_v17 = vmul.f32 1.442695, %v1451_v8 }
 0x493   : > { %5132 = vst [vmem:[#allocation20_spill] sm:$0xff] %v4332_v49  ;;  %v4334_v36 = vpop.eup %2900  ;;  %1756 = vadd.xlane.f32.xlu0 %v1755_v12  ;;  %v1663_v43 = vmul.f32 1.442695, %v1452_v50  ;;  %v1433_v28 = vsub.f32 %v5137_v44, %v1293_v24  ;;  %v5138_v8 = vld [vmem:[#allocation56_spill] sm:$0xff]  ;;  %v5139_v12 = vld [vmem:[#allocation75_spill] sm:$0xff] }
 0x494   : > { %5133 = vst [vmem:[#allocation17_spill] sm:$0xff] %v4334_v36  ;;  %v4336_v10 = vpop.eup %2902  ;;  %2912 = vpow2.f32 %v1657_v40  ;;  %v1758_v2 = vadd.f32 %v4334_v36, %v4332_v49  ;;  %v1434_v53 = vsub.f32 %v5138_v8, %v1293_v24 }
 0x495   : > { %5134 = vst [vmem:[#allocation18_spill] sm:$0xff] %v4336_v10  ;;  %v4340_v25 = vpop.eup %2904  ;;  %2914 = vpow2.f32 %v1659_v62  ;;  %v1625_v44 = vmul.f32 1.442695, %v1433_v28 }
 0x496   : > { %5135 = vst [vmem:[#allocation63_spill] sm:$0xff] %v4340_v25  ;;  %v4342_v31 = vpop.eup %2906  ;;  %2916 = vpow2.f32 %v1647_v16  ;;  %v1759_v47 = vadd.f32 %v4340_v25, %v1758_v2  ;;  %v1627_v49 = vmul.f32 1.442695, %v1434_v53 }
 0x497   : > { %5136 = vst [vmem:[#allocation64_spill] sm:$0xff] %v4342_v31  ;;  %2918 = vpow2.f32 %v1661_v17  ;;  %v1318_v54 = vpop.xlane.xlu2 %1317  ;;  %v4346_v11 = vpop.eup %2908  ;;  %v1843_v2 = vadd.f32 %v4342_v31, %v4336_v10  ;;  %v5144_v31 = vld [vmem:[#allocation53_spill] sm:$0xff] }
 0x498   : > { %v1453_v40 = vsub.f32 %v5139_v12, %v1318_v54  ;;  %v1454_v6 = vsub.f32 %v5140_v27, %v1318_v54  ;;  %v1455_v62 = vsub.f32 %v5141_v57, %v1318_v54  ;;  %v4352_v50 = vpop.eup %2910  ;;  %2920 = vpow2.f32 %v1663_v43 }
 0x499   : > { %5142 = vst [vmem:[#allocation23_spill] sm:$0xff] %v4352_v50  ;;  %v1760_v16 = vadd.f32 %v4346_v11, %v1759_v47  ;;  %v1456_v25 = vsub.f32 %v5019_v14, %v1318_v54  ;;  %v1844_v28 = vadd.f32 %v4352_v50, %v1843_v2  ;;  %v1435_v14 = vsub.f32 %v5144_v31, %v1293_v24 }
 0x49a   : > { %v4357_v17 = vpop.eup %2912  ;;  %v1665_v8 = vmul.f32 1.442695, %v1453_v40  ;;  %v1667_v36 = vmul.f32 1.442695, %v1454_v6  ;;  %v1669_v27 = vmul.f32 1.442695, %v1455_v62 }
 0x49b   : > { %v4360_v12 = vpop.eup %2914  ;;  %1761 = vadd.xlane.f32.xlu1 %v1760_v16  ;;  %v1671_v6 = vmul.f32 1.442695, %v1456_v25  ;;  %v1629_v50 = vmul.f32 1.442695, %v1435_v14 }
 0x49c   : > { %v4362_v57 = vpop.eup %2916  ;;  %2922 = vpow2.f32 %v1665_v8  ;;  %v1853_v43 = vadd.f32 %v4360_v12, %v4357_v17 }
 0x49d   : > { %5143 = vst [vmem:[#allocation24_spill] sm:$0xff] %v4362_v57  ;;  %v4366_v47 = vpop.eup %2918  ;;  %2924 = vpow2.f32 %v1667_v36  ;;  %v1845_v16 = vadd.f32 %v4362_v57, %v1844_v28  ;;  %v5145_v36 = vld [vmem:[#allocation54_spill] sm:$0xff] }
 0x49e   : > { %2926 = vpow2.f32 %v1625_v44  ;;  %v1854_v54 = vadd.f32 %v4366_v47, %v1853_v43  ;;  %v4371_v40 = vpop.eup %2920  ;;  %v1436_v2 = vsub.f32 %v5145_v36, %v1293_v24 }
 0x49f   : > { %2928 = vpow2.f32 %v1669_v27  ;;  %v4373_v62 = vpop.xlane.xlu2 %1826 }
 0x4a0   : > { %2930 = vpow2.f32 %v1627_v49  ;;  %v1855_v53 = vadd.f32 %v4371_v40, %v1854_v54  ;;  %v1631_v43 = vmul.f32 1.442695, %v1436_v2 }
 0x4a1   : > { %2932 = vpow2.f32 %v1671_v6 }
 0x4a2   : > { %v4377_v8 = vpop.eup %2922  ;;  %1856 = vadd.xlane.f32.xlu2 %v1855_v53  ;;  %2934 = vpow2.f32 %v1629_v50 }
 0x4a3   : > { %v4380_v25 = vpop.eup %2924  ;;  %1846 = vadd.xlane.f32.xlu1 %v1845_v16  ;;  %2936 = vpow2.f32 %v1631_v43 }
 0x4a4   : > { %v4382_v31 = vpop.eup %2926  ;;  %v1858_v44 = vadd.f32 %v4380_v25, %v4377_v8 }
 0x4a5   : > { %5146 = vst [vmem:[#allocation21_spill] sm:$0xff] %v4382_v31  ;;  %v4386_v49 = vpop.eup %2928 }
 0x4a6   : > { %v4388_v27 = vpop.eup %2930  ;;  %v1859_v28 = vadd.f32 %v4386_v49, %v1858_v44 }
 0x4a7   : > { %5147 = vst [vmem:[#allocation61_spill] sm:$0xff] %v4388_v27  ;;  %v1308_v24 = vpop.xlane.xlu2 %1307  ;;  %v4391_v14 = vpop.eup %2932  ;;  %v1833_v36 = vadd.f32 %v4388_v27, %v4382_v31 }
 0x4a8   : > { %v1445_v6 = vsub.f32 %v5024_v1, %v1308_v24  ;;  %v1446_v54 = vsub.f32 %v5023_v20, %v1308_v24  ;;  %v1447_v53 = vsub.f32 %v5030_v30, %v1308_v24  ;;  %v1860_v16 = vadd.f32 %v4391_v14, %v1859_v28  ;;  %v4400_v10 = vpop.eup %2934 }
 0x4a9   : > { %v1448_v50 = vsub.f32 %v5037_v32, %v1308_v24  ;;  %5148 = vst [vmem:[#allocation62_spill] sm:$0xff] %v4400_v10  ;;  %v1834_v20 = vadd.f32 %v4400_v10, %v1833_v36  ;;  %v4403_v28 = vpop.eup %2936 }
 0x4aa   : > { %v1649_v2 = vmul.f32 1.442695, %v1445_v6  ;;  %v1651_v57 = vmul.f32 1.442695, %v1446_v54  ;;  %v1653_v44 = vmul.f32 1.442695, %v1447_v53  ;;  %1861 = vadd.xlane.f32.xlu0 %v1860_v16 }
 0x4ab   : > { %v1655_v1 = vmul.f32 1.442695, %v1448_v50  ;;  %5149 = vst [vmem:[#allocation70_spill] sm:$0xff] %v4403_v28  ;;  %v1835_v27 = vadd.f32 %v4403_v28, %v1834_v20 }
 0x4ac   : > { %2938 = vpow2.f32 %v1649_v2 }
 0x4ad   : > { %2940 = vpow2.f32 %v1651_v57 }
 0x4ae   : > { %2942 = vpow2.f32 %v1653_v44 }
 0x4af   : > { %v1822_v30 = vpop.xlane.xlu2 %1821  ;;  %2944 = vpow2.f32 %v1655_v1 }
 0x4b2   : > { %v4406_v43 = vpop.eup %2938  ;;  %1836 = vadd.xlane.f32.xlu0 %v1835_v27 }
 0x4b3   : > { %v4408_v32 = vpop.eup %2940 }
 0x4b4   : > { %v1848_v24 = vadd.f32 %v4408_v32, %v4406_v43  ;;  %v4412_v6 = vpop.eup %2942 }
 0x4b5   : > { %v4415_v53 = vpop.eup %2944 }
 0x4b6   : > { %v1849_v57 = vadd.f32 %v4412_v6, %v1848_v24 }
 0x4b7   : > { %v1298_v54 = vpop.xlane.xlu2 %1297 }
 0x4b8   : > { %v1437_v16 = vsub.f32 %v5043_v41, %v1298_v54  ;;  %v1438_v36 = vsub.f32 %v5042_v4, %v1298_v54  ;;  %v1439_v50 = vsub.f32 %v5046_v26, %v1298_v54  ;;  %v1440_v2 = vsub.f32 %v5047_v21, %v1298_v54  ;;  %v1807_v54 = vpop.xlane.xlu1 %1806 }
 0x4b9   : > { %v1850_v27 = vadd.f32 %v4415_v53, %v1849_v57 }
 0x4ba   : > { %v1633_v44 = vmul.f32 1.442695, %v1437_v16  ;;  %v1635_v20 = vmul.f32 1.442695, %v1438_v36  ;;  %v1637_v1 = vmul.f32 1.442695, %v1439_v50 }
 0x4bb   : > { %1851 = vadd.xlane.f32.xlu2 %v1850_v27  ;;  %v1639_v24 = vmul.f32 1.442695, %v1440_v2 }
 0x4bc   : > { %2946 = vpow2.f32 %v1633_v44 }
 0x4bd   : > { %2948 = vpow2.f32 %v1635_v20 }
 0x4be   : > { %2950 = vpow2.f32 %v1637_v1 }
 0x4bf   : > { %v1812_v28 = vpop.xlane.xlu2 %1811  ;;  %2952 = vpow2.f32 %v1639_v24 }
 0x4c0   : > { %2954 = vrcp.f32 %v4373_v62  ;;  %v1797_v50 = vpop.xlane.xlu1 %1796 }
 0x4c2   : > { %v4422_v10 = vpop.eup %2946 }
 0x4c3   : > { %v4424_v41 = vpop.eup %2948 }
 0x4c4   : > { %5150 = vst [vmem:[#allocation55_spill] sm:$0xff] %v4424_v41  ;;  %v1838_v4 = vadd.f32 %v4424_v41, %v4422_v10  ;;  %v4428_v26 = vpop.eup %2950 }
 0x4c5   : > { %5151 = vst [vmem:[#allocation56_spill] sm:$0xff] %v4428_v26  ;;  %v4431_v57 = vpop.eup %2952 }
 0x4c6   : > { %v1839_v21 = vadd.f32 %v4428_v26, %v1838_v4  ;;  %5152 = vst [vmem:[#allocation75_spill] sm:$0xff] %v4431_v57  ;;  %v2955_v27 = vpop.eup %2954 }
 0x4c7   : > { %v1802_v16 = vpop.xlane.xlu2 %1801  ;;  %v2001_v20 = vmul.f32 %v2955_v27, %v3915_v33  ;;  %v2002_v1 = vmul.f32 %v2955_v27, %v3921_v52 }
 0x4c8   : > { %v1840_v36 = vadd.f32 %v4431_v57, %v1839_v21  ;;  %v4438_v24 = vpop.xlane.xlu1 %1896 }
 0x4ca   : > { %1841 = vadd.xlane.f32.xlu1 %v1840_v36  ;;  %v2003_v36 = vmul.f32 %v2955_v27, %v3958_v35  ;;  %v5153_v35 = vld [vmem:[#allocation68_spill] sm:$0xff] }
 0x4cf   : > { %v1832_v2 = vpop.xlane.xlu2 %1831 }
 0x4d0   : > { %2956 = vrcp.f32 %v1832_v2 }
 0x4d1   : > { %2958 = vrcp.f32 %v1822_v30  ;;  %v2004_v30 = vmul.f32 %v2955_v27, %v3966_v48 }
 0x4d2   : > { %2960 = vrcp.f32 %v4310_v34 }
 0x4d3   : > { %2962 = vrcp.f32 %v1812_v28  ;;  %v5158_v28 = vld [vmem:[#allocation100_spill] sm:$0xff] }
 0x4d4   : > { %2964 = vrcp.f32 %v1807_v54 }
 0x4d5   : > { %2966 = vrcp.f32 %v1802_v16  ;;  %v5162_v16 = vld [vmem:[#allocation104_spill] sm:$0xff] }
 0x4d6   : > { %v2957_v44 = vpop.eup %2956  ;;  %2968 = vrcp.f32 %v1797_v50 }
 0x4d7   : > { %v4440_v4 = vpop.xlane.xlu2 %1901  ;;  %v2005_v21 = vmul.f32 %v2957_v44, %v4084_v56  ;;  %v2006_v62 = vmul.f32 %v2957_v44, %v4094_v45  ;;  %v2007_v2 = vmul.f32 %v2957_v44, %v4131_v58  ;;  %v2008_v34 = vmul.f32 %v2957_v44, %v4134_v15  ;;  %v2959_v52 = vpop.eup %2958  ;;  %v5154_v58 = vld [vmem:[#allocation39_spill] sm:$0xff]  ;;  %v5155_v44 = vld [vmem:[#allocation96_spill] sm:$0xff] }
 0x4d8   : > { %v2961_v41 = vpop.eup %2960  ;;  %v1997_v56 = vmul.f32 %v2959_v52, %v3984_v59  ;;  %v1998_v45 = vmul.f32 %v2959_v52, %v5153_v35  ;;  %v1999_v48 = vmul.f32 %v2959_v52, %v5154_v58  ;;  %v2000_v15 = vmul.f32 %v2959_v52, %v4024_v51 }
 0x4d9   : > { %v2101_v31 = vpack.c.bf16 %v2005_v21, %v2001_v20  ;;  %v2102_v33 = vpack.c.bf16 %v2006_v62, %v2002_v1  ;;  %v2103_v57 = vpack.c.bf16 %v2007_v2, %v2003_v36  ;;  %v2104_v26 = vpack.c.bf16 %v2008_v34, %v2004_v30  ;;  %v5156_v1 = vld [vmem:[#allocation97_spill] sm:$0xff]  ;;  %v5157_v21 = vld [vmem:[#allocation98_spill] sm:$0xff]  ;;  %v2963_v2 = vpop.eup %2962  ;;  %v1787_v34 = vpop.xlane.xlu0 %1786 }
 0x4da   : > { %v1993_v20 = vmul.f32 %v2961_v41, %v5155_v44  ;;  %v1995_v62 = vmul.f32 %v2961_v41, %v5157_v21  ;;  %v2965_v51 = vpop.eup %2964  ;;  %v1990_v52 = vmul.f32 %v2963_v2, %v4045_v3  ;;  %v5161_v44 = vld [vmem:[#allocation103_spill] sm:$0xff] }
 0x4db   : > { %2153 = vmatpush.bf16.xpose.msrb.mxu2 %v2101_v31  ;;  %2166 = vmatpush.bf16.xpose.msrb.mxu3 %v2102_v33  ;;  %v1994_v31 = vmul.f32 %v2961_v41, %v5156_v1  ;;  %v1989_v33 = vmul.f32 %v2963_v2, %v4043_v60  ;;  %v1988_v1 = vmul.f32 %v2965_v51, %v5162_v16  ;;  %v5168_v16 = vld [vmem:[#allocation65_spill] sm:$0xff] }
 0x4dc   : > { %2179 = vmatpush.bf16.xpose.msra.mxu0 %v2103_v57  ;;  %2192 = vmatpush.bf16.xpose.msra.mxu1 %v2104_v26  ;;  %v1996_v57 = vmul.f32 %v2961_v41, %v5158_v28  ;;  %v4458_v26 = vpop.xlane.xlu1 %1906  ;;  %v2097_v59 = vpack.c.bf16 %v1997_v56, %v1993_v20  ;;  %v2099_v54 = vpack.c.bf16 %v1999_v48, %v1995_v62  ;;  %v5160_v48 = vld [vmem:[#allocation102_spill] sm:$0xff]  ;;  %v2967_v62 = vpop.eup %2966 }
 0x4dd   : > { %v2098_v36 = vpack.c.bf16 %v1998_v45, %v1994_v31  ;;  %v1991_v41 = vmul.f32 %v2963_v2, %v4049_v55  ;;  %v1992_v56 = vmul.f32 %v2963_v2, %v4055_v18  ;;  %v5159_v45 = vld [vmem:[#allocation101_spill] sm:$0xff]  ;;  %v1987_v20 = vmul.f32 %v2965_v51, %v5161_v44  ;;  %v2969_v55 = vpop.eup %2968 }
 0x4de   : > { %v2100_v30 = vpack.c.bf16 %v2000_v15, %v1996_v57  ;;  %v1985_v58 = vmul.f32 %v2965_v51, %v5159_v45  ;;  %v1986_v15 = vmul.f32 %v2965_v51, %v5160_v48  ;;  %v1981_v18 = vmul.f32 %v2967_v62, %v4068_v19  ;;  %v5164_v51 = vld [vmem:[#allocation86_spill] sm:$0xff] }
 0x4df   : > { %v4452_v27 = vpop.xlane.xlu2 %1911  ;;  %v2095_v3 = vpack.c.bf16 %v1991_v41, %v1987_v20  ;;  %v2096_v50 = vpack.c.bf16 %v1992_v56, %v1988_v1  ;;  %v1982_v57 = vmul.f32 %v2967_v62, %v4079_v13  ;;  %v5166_v56 = vld [vmem:[#allocation48_spill] sm:$0xff] }
 0x4e0   : > { %v2093_v21 = vpack.c.bf16 %v1989_v33, %v1985_v58  ;;  %v2094_v60 = vpack.c.bf16 %v1990_v52, %v1986_v15  ;;  %v1978_v33 = vmul.f32 %v2969_v55, %v5164_v51  ;;  %v5165_v52 = vld [vmem:[#allocation47_spill] sm:$0xff]  ;;  %v1980_v45 = vmul.f32 %v2969_v55, %v5166_v56 }
 0x4e1   : > { %v4470_v28 = vpop.xlane.xlu0 %1891  ;;  %v1979_v41 = vmul.f32 %v2969_v55, %v5165_v52 }
 0x4e2   : > { %v2090_v48 = vpack.c.bf16 %v1982_v57, %v1978_v33 }
 0x4e3   : > { %2154 = vmatpush.bf16.xpose.msrb.mxu2 %v2097_v59  ;;  %2167 = vmatpush.bf16.xpose.msrb.mxu3 %v2098_v36  ;;  %v1983_v59 = vmul.f32 %v2967_v62, %v4108_v42  ;;  %v1984_v36 = vmul.f32 %v2967_v62, %v4118_v63  ;;  %v5167_v63 = vld [vmem:[#allocation42_spill] sm:$0xff]  ;;  %v5170_v62 = vld [vmem:[#allocation44_spill] sm:$0xff] }
 0x4e4   : > { %2180 = vmatpush.bf16.xpose.msra.mxu0 %v2099_v54  ;;  %2193 = vmatpush.bf16.xpose.msra.mxu1 %v2100_v30  ;;  %v1792_v31 = vpop.xlane.xlu1 %1791  ;;  %v5163_v54 = vld [vmem:[#allocation85_spill] sm:$0xff] }
 0x4e5   : > { %2970 = vrcp.f32 %v1792_v31  ;;  %v1977_v30 = vmul.f32 %v2969_v55, %v5163_v54  ;;  %v2091_v19 = vpack.c.bf16 %v1983_v59, %v1979_v41  ;;  %v2092_v44 = vpack.c.bf16 %v1984_v36, %v1980_v45  ;;  %v5169_v31 = vld [vmem:[#allocation40_spill] sm:$0xff]  ;;  %v5173_v59 = vld [vmem:[#allocation67_spill] sm:$0xff] }
 0x4e6   : > { %2972 = vrcp.f32 %v1787_v34 }
 0x4e7   : > { %v4464_v35 = vpop.xlane.xlu2 %1886  ;;  %v2089_v58 = vpack.c.bf16 %v1981_v18, %v1977_v30  ;;  %v5172_v18 = vld [vmem:[#allocation41_spill] sm:$0xff] }
 0x4e9   : > { %v4480_v34 = vpop.xlane.xlu0 %1876 }
 0x4eb   : > { %2155 = vmatpush.bf16.xpose.msrb.mxu2 %v2093_v21  ;;  %2168 = vmatpush.bf16.xpose.msrb.mxu3 %v2094_v60  ;;  %v2971_v15 = vpop.eup %2970 }
 0x4ec   : > { %2181 = vmatpush.bf16.xpose.msra.mxu0 %v2095_v3  ;;  %2194 = vmatpush.bf16.xpose.msra.mxu1 %v2096_v50  ;;  %v1777_v13 = vpop.xlane.xlu1 %1776  ;;  %v2973_v42 = vpop.eup %2972  ;;  %v1973_v20 = vmul.f32 %v2971_v15, %v5167_v63  ;;  %v1974_v1 = vmul.f32 %v2971_v15, %v5168_v16  ;;  %v1975_v21 = vmul.f32 %v2971_v15, %v5169_v31  ;;  %v5171_v50 = vld [vmem:[#allocation74_spill] sm:$0xff] }
 0x4ed   : > { %v1976_v60 = vmul.f32 %v2971_v15, %v4028_v61  ;;  %v1969_v3 = vmul.f32 %v2973_v42, %v5170_v62  ;;  %v1970_v55 = vmul.f32 %v2973_v42, %v5171_v50  ;;  %v1971_v57 = vmul.f32 %v2973_v42, %v5172_v18 }
 0x4ee   : > { %v1972_v36 = vmul.f32 %v2973_v42, %v5173_v59 }
 0x4ef   : > { %v1782_v2 = vpop.xlane.xlu2 %1781  ;;  %v2085_v54 = vpack.c.bf16 %v1973_v20, %v1969_v3  ;;  %v2086_v30 = vpack.c.bf16 %v1974_v1, %v1970_v55  ;;  %v2087_v33 = vpack.c.bf16 %v1975_v21, %v1971_v57  ;;  %v5176_v21 = vld [vmem:[#allocation78_spill] sm:$0xff]  ;;  %v5178_v3 = vld [vmem:[#allocation31_spill] sm:$0xff]  ;;  %v5179_v55 = vld [vmem:[#allocation32_spill] sm:$0xff] }
 0x4f0   : > { %2974 = vrcp.f32 %v1782_v2  ;;  %v2088_v52 = vpack.c.bf16 %v1976_v60, %v1972_v36  ;;  %v5177_v60 = vld [vmem:[#allocation27_spill] sm:$0xff]  ;;  %v5180_v57 = vld [vmem:[#allocation28_spill] sm:$0xff] }
 0x4f1   : > { %2976 = vrcp.f32 %v1777_v13  ;;  %v1772_v41 = vpop.xlane.xlu0 %1771 }
 0x4f3   : > { %2156 = vmatpush.bf16.xpose.msrb.mxu2 %v2089_v58  ;;  %2169 = vmatpush.bf16.xpose.msrb.mxu3 %v2090_v48 }
 0x4f4   : > { %2182 = vmatpush.bf16.xpose.msra.mxu0 %v2091_v19  ;;  %2195 = vmatpush.bf16.xpose.msra.mxu1 %v2092_v44  ;;  %v4492_v58 = vpop.xlane.xlu1 %1881 }
 0x4f6   : > { %v2975_v51 = vpop.eup %2974 }
 0x4f7   : > { %v1767_v2 = vpop.xlane.xlu2 %1766  ;;  %v2977_v56 = vpop.eup %2976  ;;  %v1965_v61 = vmul.f32 %v2975_v51, %v4226_v46  ;;  %v1966_v45 = vmul.f32 %v2975_v51, %v4228_v29  ;;  %v1967_v48 = vmul.f32 %v2975_v51, %v4238_v5  ;;  %v1968_v15 = vmul.f32 %v2975_v51, %v4250_v38  ;;  %v5174_v38 = vld [vmem:[#allocation29_spill] sm:$0xff] }
 0x4f8   : > { %2978 = vrcp.f32 %v1767_v2  ;;  %v1961_v19 = vmul.f32 %v2977_v56, %v4101_v23  ;;  %v1962_v44 = vmul.f32 %v2977_v56, %v4104_v0  ;;  %v1963_v13 = vmul.f32 %v2977_v56, %v4112_v22  ;;  %v5175_v0 = vld [vmem:[#allocation79_spill] sm:$0xff] }
 0x4f9   : > { %2980 = vrcp.f32 %v1772_v41  ;;  %v1964_v42 = vmul.f32 %v2977_v56, %v4122_v37  ;;  %v5181_v56 = vld [vmem:[#allocation22_spill] sm:$0xff] }
 0x4fa   : > { %v2081_v63 = vpack.c.bf16 %v1965_v61, %v1961_v19  ;;  %v2082_v20 = vpack.c.bf16 %v1966_v45, %v1962_v44  ;;  %v2083_v16 = vpack.c.bf16 %v1967_v48, %v1963_v13  ;;  %2982 = vrcp.f32 %v4458_v26  ;;  %v5182_v48 = vld [vmem:[#allocation59_spill] sm:$0xff]  ;;  %v5183_v19 = vld [vmem:[#allocation57_spill] sm:$0xff]  ;;  %v5184_v13 = vld [vmem:[#allocation20_spill] sm:$0xff] }
 0x4fb   : > { %2157 = vmatpush.bf16.xpose.msrb.mxu2 %v2085_v54  ;;  %2170 = vmatpush.bf16.xpose.msrb.mxu3 %v2086_v30  ;;  %v2084_v29 = vpack.c.bf16 %v1968_v15, %v1964_v42  ;;  %2984 = vrcp.f32 %v4452_v27 }
 0x4fc   : > { %2183 = vmatpush.bf16.xpose.msra.mxu0 %v2087_v33  ;;  %2196 = vmatpush.bf16.xpose.msra.mxu1 %v2088_v52  ;;  %v4502_v31 = vpop.xlane.xlu1 %1866 }
 0x4fe   : > { %v2979_v46 = vpop.eup %2978 }
 0x4ff   : > { %v2981_v1 = vpop.eup %2980  ;;  %v1953_v5 = vmul.f32 %v2979_v46, %v4257_v7  ;;  %v1954_v23 = vmul.f32 %v2979_v46, %v5174_v38  ;;  %v1955_v22 = vmul.f32 %v2979_v46, %v5175_v0  ;;  %v1956_v37 = vmul.f32 %v2979_v46, %v5176_v21  ;;  %v5186_v46 = vld [vmem:[#allocation82_spill] sm:$0xff] }
 0x500   : > { %v1957_v62 = vmul.f32 %v2981_v1, %v5177_v60  ;;  %v1958_v50 = vmul.f32 %v2981_v1, %v5178_v3  ;;  %v1959_v18 = vmul.f32 %v2981_v1, %v5179_v55  ;;  %v1960_v59 = vmul.f32 %v2981_v1, %v5180_v57  ;;  %v2983_v33 = vpop.eup %2982  ;;  %v5189_v38 = vld [vmem:[#allocation58_spill] sm:$0xff] }
 0x501   : > { %v2985_v52 = vpop.eup %2984  ;;  %v2065_v26 = vmul.f32 %v2983_v33, %v5181_v56  ;;  %v5197_v56 = vld [vmem:[#allocation90_spill] sm:$0xff] }
 0x502   : > { %v2077_v2 = vpack.c.bf16 %v1957_v62, %v1953_v5  ;;  %v2078_v54 = vpack.c.bf16 %v1958_v50, %v1954_v23  ;;  %v2079_v7 = vpack.c.bf16 %v1959_v18, %v1955_v22  ;;  %v2080_v30 = vpack.c.bf16 %v1960_v59, %v1956_v37  ;;  %v5190_v23 = vld [vmem:[#allocation94_spill] sm:$0xff]  ;;  %v5191_v37 = vld [vmem:[#allocation69_spill] sm:$0xff]  ;;  %v5192_v50 = vld [vmem:[#allocation95_spill] sm:$0xff] }
 0x503   : > { %2158 = vmatpush.bf16.xpose.msrb.mxu2 %v2081_v63  ;;  %2171 = vmatpush.bf16.xpose.msrb.mxu3 %v2082_v20  ;;  %v2069_v15 = vmul.f32 %v2985_v52, %v5182_v48  ;;  %v2070_v44 = vmul.f32 %v2985_v52, %v5183_v19  ;;  %v5185_v63 = vld [vmem:[#allocation17_spill] sm:$0xff]  ;;  %v2066_v60 = vmul.f32 %v2983_v33, %v5191_v37  ;;  %v5193_v18 = vld [vmem:[#allocation43_spill] sm:$0xff] }
 0x504   : > { %2184 = vmatpush.bf16.xpose.msra.mxu0 %v2083_v16  ;;  %2197 = vmatpush.bf16.xpose.msra.mxu1 %v2084_v29  ;;  %v2067_v55 = vmul.f32 %v2983_v33, %v5192_v50  ;;  %v2068_v57 = vmul.f32 %v2983_v33, %v5193_v18  ;;  %v5196_v33 = vld [vmem:[#allocation99_spill] sm:$0xff]  ;;  %v5206_v37 = vld [vmem:[#allocation37_spill] sm:$0xff]  ;;  %v1872_v18 = vpop.xlane.xlu2 %1871 }
 0x506   : > { %v1757_v36 = vpop.xlane.xlu0 %1756 }
 0x507   : > { %2986 = vrcp.f32 %v1757_v36  ;;  %v2133_v36 = vpack.c.bf16 %v2069_v15, %v2065_v26  ;;  %v5200_v15 = vld [vmem:[#allocation45_spill] sm:$0xff] }
 0x50b   : > { %2159 = vmatpush.bf16.xpose.msrb.mxu2 %v2077_v2  ;;  %2172 = vmatpush.bf16.xpose.msrb.mxu3 %v2078_v54 }
 0x50c   : > { %2185 = vmatpush.bf16.xpose.msra.mxu0 %v2079_v7  ;;  %2198 = vmatpush.bf16.xpose.msra.mxu1 %v2080_v30  ;;  %v5194_v7 = vld [vmem:[#allocation51_spill] sm:$0xff] }
 0x50d   : > { %v2987_v41 = vpop.eup %2986 }
 0x50e   : > { %v1762_v51 = vpop.xlane.xlu1 %1761  ;;  %v1945_v45 = vmul.f32 %v2987_v41, %v4312_v9  ;;  %v1946_v27 = vmul.f32 %v2987_v41, %v4316_v39  ;;  %v1947_v16 = vmul.f32 %v2987_v41, %v5186_v46  ;;  %v2071_v9 = vmul.f32 %v2985_v52, %v5189_v38 }
 0x50f   : > { %2988 = vrcp.f32 %v1762_v51  ;;  %v2072_v39 = vmul.f32 %v2985_v52, %v5190_v23  ;;  %v5195_v51 = vld [vmem:[#allocation52_spill] sm:$0xff] }
 0x510   : > { %2990 = vrcp.f32 %v4438_v24  ;;  %v5187_v24 = vld [vmem:[#allocation63_spill] sm:$0xff]  ;;  %v2135_v2 = vpack.c.bf16 %v2071_v9, %v2067_v55  ;;  %v5204_v9 = vld [vmem:[#allocation33_spill] sm:$0xff]  ;;  %v5209_v55 = vld [vmem:[#allocation60_spill] sm:$0xff] }
 0x511   : > { %2992 = vrcp.f32 %v4440_v4  ;;  %v5188_v4 = vld [vmem:[#allocation19_spill] sm:$0xff]  ;;  %v2136_v54 = vpack.c.bf16 %v2072_v39, %v2068_v57  ;;  %v5205_v39 = vld [vmem:[#allocation34_spill] sm:$0xff] }
 0x512   : > { %v1948_v1 = vmul.f32 %v2987_v41, %v5188_v4  ;;  %2994 = vrcp.f32 %v4464_v35  ;;  %v5202_v4 = vld [vmem:[#allocation91_spill] sm:$0xff] }
 0x513   : > { %2996 = vrcp.f32 %v4470_v28  ;;  %v2137_v28 = vld [vmem:[#allocation3 + $0x8] sm:$0xff] }
 0x514   : > { %2998 = vrcp.f32 %v4492_v58 }
 0x515   : > { %v2989_v61 = vpop.eup %2988  ;;  %3000 = vrcp.f32 %v4480_v34 }
 0x516   : > { %v1949_v42 = vmul.f32 %v2989_v61, %v5184_v13  ;;  %v1950_v20 = vmul.f32 %v2989_v61, %v5185_v63  ;;  %v1951_v29 = vmul.f32 %v2989_v61, %v5187_v24  ;;  %v1952_v5 = vmul.f32 %v2989_v61, %v4346_v11  ;;  %v2991_v62 = vpop.eup %2990  ;;  %v5198_v61 = vld [vmem:[#allocation72_spill] sm:$0xff] }
 0x517   : > { %v2993_v59 = vpop.eup %2992  ;;  %v2134_v11 = vpack.c.bf16 %v2070_v44, %v2066_v60  ;;  %v2059_v19 = vmul.f32 %v2991_v62, %v5200_v15  ;;  %v5201_v44 = vld [vmem:[#allocation46_spill] sm:$0xff]  ;;  %v2141_v24 = vunpack.c.l.b16 %v2137_v28  ;;  %3002 = vrcp.f32 %v1872_v18  ;;  %v5214_v15 = vld [vmem:[#allocation49_spill] sm:$0xff] }
 0x518   : > { %v2073_v0 = vpack.c.bf16 %v1949_v42, %v1945_v45  ;;  %v2074_v22 = vpack.c.bf16 %v1950_v20, %v1946_v27  ;;  %v2075_v21 = vpack.c.bf16 %v1951_v29, %v1947_v16  ;;  %v2076_v3 = vpack.c.bf16 %v1952_v5, %v1948_v1  ;;  %v5199_v27 = vld [vmem:[#allocation71_spill] sm:$0xff]  ;;  %v2995_v63 = vpop.eup %2994  ;;  %v5203_v5 = vld [vmem:[#allocation36_spill] sm:$0xff]  ;;  %v5207_v60 = vld [vmem:[#allocation66_spill] sm:$0xff] }
 0x519   : > { %v2061_v30 = vmul.f32 %v2993_v59, %v5194_v7  ;;  %v2062_v52 = vmul.f32 %v2993_v59, %v5195_v51  ;;  %v2063_v41 = vmul.f32 %v2993_v59, %v5196_v33  ;;  %v2064_v26 = vmul.f32 %v2993_v59, %v5197_v56  ;;  %v2997_v16 = vpop.eup %2996  ;;  %v2138_v7 = vld [vmem:[#allocation3] sm:$0xff]  ;;  %v5211_v33 = vld [vmem:[#allocation88_spill] sm:$0xff] }
 0x51a   : > { %2160 = vmatpush.bf16.xpose.msrb.mxu2 %v2073_v0  ;;  %2173 = vmatpush.bf16.xpose.msrb.mxu3 %v2074_v22  ;;  %v2057_v45 = vmul.f32 %v2991_v62, %v5198_v61  ;;  %v2058_v48 = vmul.f32 %v2991_v62, %v5199_v27  ;;  %v2060_v35 = vmul.f32 %v2991_v62, %v5201_v44  ;;  %v2142_v29 = vunpack.c.h.b16 %v2137_v28  ;;  %v5210_v51 = vld [vmem:[#allocation87_spill] sm:$0xff]  ;;  %v5213_v61 = vld [vmem:[#allocation92_spill] sm:$0xff]  ;;  %v5215_v44 = vld [vmem:[#allocation50_spill] sm:$0xff]  ;;  %v1857_v28 = vpop.xlane.xlu2 %1856 }
 0x51b   : > { %2186 = vmatpush.bf16.xpose.msra.mxu0 %v2075_v21  ;;  %2199 = vmatpush.bf16.xpose.msra.mxu1 %v2076_v3  ;;  %v2131_v20 = vpack.c.bf16 %v2063_v41, %v2059_v19  ;;  %v2049_v1 = vmul.f32 %v2995_v63, %v5202_v4  ;;  %v2050_v38 = vmul.f32 %v2995_v63, %v5203_v5  ;;  %v5208_v3 = vld [vmem:[#allocation38_spill] sm:$0xff]  ;;  %v5212_v56 = vld [vmem:[#allocation35_spill] sm:$0xff]  ;;  %3004 = vrcp.f32 %v4502_v31 }
 0x51c   : > { %v2129_v13 = vpack.c.bf16 %v2061_v30, %v2057_v45  ;;  %v2130_v42 = vpack.c.bf16 %v2062_v52, %v2058_v48  ;;  %v2132_v46 = vpack.c.bf16 %v2064_v26, %v2060_v35  ;;  %v2051_v23 = vmul.f32 %v2995_v63, %v5204_v9 }
 0x51d   : > { %v2052_v0 = vmul.f32 %v2995_v63, %v5205_v39  ;;  %v4546_v22 = vpack.c.b16 %v2141_v24, %v2141_v24  ;;  %v4548_v21 = vpack.c.b16 %v2142_v29, %v2142_v29  ;;  %v2053_v58 = vmul.f32 %v2997_v16, %v5206_v37  ;;  %v5217_v63 = vld [vmem:[#allocation89_spill] sm:$0xff] }
 0x51e   : > { %v2054_v62 = vmul.f32 %v2997_v16, %v5207_v60  ;;  %v2055_v50 = vmul.f32 %v2997_v16, %v5208_v3  ;;  %v2056_v34 = vmul.f32 %v2997_v16, %v5209_v55  ;;  %v2143_v30 = vunpack.c.l.b16 %v2138_v7  ;;  %v1862_v16 = vpop.xlane.xlu0 %1861 }
 0x51f   : > { %v2125_v57 = vpack.c.bf16 %v2053_v58, %v2049_v1  ;;  %v2144_v48 = vunpack.c.h.b16 %v2138_v7  ;;  %3006 = vrcp.f32 %v1862_v16  ;;  %v5221_v58 = vld [vmem:[#allocation81_spill] sm:$0xff]  ;;  %v5228_v16 = vld [vmem:[#allocation23_spill] sm:$0xff] }
 0x520   : > { %v2126_v59 = vpack.c.bf16 %v2054_v62, %v2050_v38  ;;  %v4561_v27 = vpack.c.b16 %v2143_v30, %v2143_v30  ;;  %v5218_v38 = vld [vmem:[#allocation26_spill] sm:$0xff]  ;;  %3008 = vrcp.f32 %v1857_v28 }
 0x521   : > { %2161 = vmatmul.bf16.vlgmr.msrb.gmra.mxu2 %v4546_v22  ;;  %2174 = vmatmul.bf16.vlgmr.msrb.gmra.mxu3 %v4548_v21  ;;  %v5222_v62 = vld [vmem:[#allocation30_spill] sm:$0xff] }
 0x522   : > { %2205 = vmatpush.bf16.xpose.msra.mxu2 %v2133_v36  ;;  %2218 = vmatpush.bf16.xpose.msra.mxu3 %v2134_v11  ;;  %v2999_v36 = vpop.eup %2998  ;;  %v2127_v11 = vpack.c.bf16 %v2055_v50, %v2051_v23  ;;  %v5219_v23 = vld [vmem:[#allocation83_spill] sm:$0xff]  ;;  %v5223_v50 = vld [vmem:[#allocation25_spill] sm:$0xff] }
 0x523   : > { %2231 = vmatpush.bf16.xpose.msrb.mxu0 %v2135_v2  ;;  %2244 = vmatpush.bf16.xpose.msrb.mxu1 %v2136_v54  ;;  %v2128_v2 = vpack.c.bf16 %v2056_v34, %v2052_v0  ;;  %v3001_v54 = vpop.eup %3000  ;;  %v2045_v52 = vmul.f32 %v2999_v36, %v5210_v51  ;;  %v2046_v41 = vmul.f32 %v2999_v36, %v5211_v33  ;;  %v5220_v0 = vld [vmem:[#allocation84_spill] sm:$0xff] }
 0x524   : > { %v2047_v26 = vmul.f32 %v2999_v36, %v5212_v56  ;;  %v2048_v45 = vmul.f32 %v2999_v36, %v5213_v61  ;;  %v2041_v19 = vmul.f32 %v3001_v54, %v5214_v15  ;;  %v2042_v35 = vmul.f32 %v3001_v54, %v5215_v44  ;;  %2187 = vmatmul.bf16.vlgmr.msra.gmra.mxu0 %v4561_v27  ;;  %v3003_v29 = vpop.eup %3002  ;;  %v5224_v34 = vld [vmem:[#allocation80_spill] sm:$0xff]  ;;  %v1847_v36 = vpop.xlane.xlu1 %1846 }
 0x525   : > { %v3005_v5 = vpop.eup %3004  ;;  %v2037_v9 = vmul.f32 %v3003_v29, %v5218_v38  ;;  %v2038_v39 = vmul.f32 %v3003_v29, %v5219_v23  ;;  %v2039_v37 = vmul.f32 %v3003_v29, %v5220_v0  ;;  %v2040_v60 = vmul.f32 %v3003_v29, %v5221_v58  ;;  %v5231_v23 = vld [vmem:[#allocation56_spill] sm:$0xff]  ;;  %v5232_v0 = vld [vmem:[#allocation75_spill] sm:$0xff]  ;;  %v5233_v58 = vld [vmem:[#allocation21_spill] sm:$0xff] }
 0x526   : > { %v2121_v31 = vpack.c.bf16 %v2045_v52, %v2041_v19  ;;  %v2122_v24 = vpack.c.bf16 %v2046_v41, %v2042_v35  ;;  %v2033_v3 = vmul.f32 %v3005_v5, %v5222_v62  ;;  %v2034_v55 = vmul.f32 %v3005_v5, %v5223_v50  ;;  %v3007_v7 = vpop.eup %3006  ;;  %v5234_v62 = vld [vmem:[#allocation61_spill] sm:$0xff]  ;;  %v5235_v50 = vld [vmem:[#allocation62_spill] sm:$0xff] }
 0x527   : > { %v2035_v18 = vmul.f32 %v3005_v5, %v5224_v34  ;;  %v3009_v52 = vpop.eup %3008  ;;  %v2029_v33 = vmul.f32 %v3007_v7, %v4377_v8  ;;  %v2030_v41 = vmul.f32 %v3007_v7, %v4380_v25  ;;  %v2031_v56 = vmul.f32 %v3007_v7, %v4386_v49  ;;  %v1837_v25 = vpop.xlane.xlu0 %1836  ;;  %v5236_v34 = vld [vmem:[#allocation70_spill] sm:$0xff] }
 0x528   : > { %v2025_v61 = vmul.f32 %v3009_v52, %v4357_v17  ;;  %v2028_v15 = vmul.f32 %v3009_v52, %v4371_v40 }
 0x529   : > { %v2119_v30 = vpack.c.bf16 %v2039_v37, %v2035_v18 }
 0x52a   : > { %2206 = vmatpush.bf16.xpose.msra.mxu2 %v2129_v13  ;;  %2219 = vmatpush.bf16.xpose.msra.mxu3 %v2130_v42  ;;  %v5216_v13 = vld [vmem:[#allocation93_spill] sm:$0xff]  ;;  %v2113_v44 = vpack.c.bf16 %v2029_v33, %v2025_v61 }
 0x52b   : > { %2232 = vmatpush.bf16.xpose.msrb.mxu0 %v2131_v20  ;;  %2245 = vmatpush.bf16.xpose.msrb.mxu1 %v2132_v46  ;;  %v2043_v42 = vmul.f32 %v3001_v54, %v5216_v13  ;;  %v2044_v20 = vmul.f32 %v3001_v54, %v5217_v63  ;;  %v4568_v46 = vpack.c.b16 %v2144_v48, %v2144_v48 }
 0x52c   : > { %v2118_v54 = vpack.c.bf16 %v2038_v39, %v2034_v55  ;;  %v2027_v48 = vmul.f32 %v3009_v52, %v4366_v47 }
 0x52d   : > { %v2123_v4 = vpack.c.bf16 %v2047_v26, %v2043_v42  ;;  %v2124_v1 = vpack.c.bf16 %v2048_v45, %v2044_v20  ;;  %2200 = vmatmul.bf16.vlgmr.msra.gmra.mxu1 %v4568_v46  ;;  %v2032_v26 = vmul.f32 %v3007_v7, %v4391_v14  ;;  %v2026_v45 = vmul.f32 %v3009_v52, %v4360_v12  ;;  %v5226_v14 = vld [vmem:[#allocation18_spill] sm:$0xff]  ;;  %v5227_v20 = vld [vmem:[#allocation64_spill] sm:$0xff] }
 0x52e   : > { %v2115_v8 = vpack.c.bf16 %v2031_v56, %v2027_v48 }
 0x52f   : > { %v2114_v35 = vpack.c.bf16 %v2030_v41, %v2026_v45  ;;  %v2116_v42 = vpack.c.bf16 %v2032_v26, %v2028_v15 }
 0x532   : > { %2207 = vmatpush.bf16.xpose.msra.mxu2 %v2125_v57  ;;  %2220 = vmatpush.bf16.xpose.msra.mxu3 %v2126_v59  ;;  %v5225_v57 = vld [vmem:[#allocation77_spill] sm:$0xff] }
 0x533   : > { %2233 = vmatpush.bf16.xpose.msrb.mxu0 %v2127_v11  ;;  %2246 = vmatpush.bf16.xpose.msrb.mxu1 %v2128_v2  ;;  %v2036_v59 = vmul.f32 %v3005_v5, %v5225_v57  ;;  %v1852_v11 = vpop.xlane.xlu2 %1851  ;;  %v2117_v2 = vpack.c.bf16 %v2037_v9, %v2033_v3 }
 0x534   : > { %3010 = vrcp.f32 %v1852_v11 }
 0x535   : > { %v2120_v51 = vpack.c.bf16 %v2040_v60, %v2036_v59  ;;  %3012 = vrcp.f32 %v1847_v36 }
 0x53a   : > { %2208 = vmatpush.bf16.xpose.msra.mxu2 %v2121_v31  ;;  %2221 = vmatpush.bf16.xpose.msra.mxu3 %v2122_v24  ;;  %v3011_v13 = vpop.eup %3010  ;;  %v5229_v24 = vld [vmem:[#allocation24_spill] sm:$0xff] }
 0x53b   : > { %2234 = vmatpush.bf16.xpose.msrb.mxu0 %v2123_v4  ;;  %2247 = vmatpush.bf16.xpose.msrb.mxu1 %v2124_v1  ;;  %v3013_v49 = vpop.eup %3012  ;;  %v2021_v17 = vmul.f32 %v3011_v13, %v4406_v43  ;;  %v2022_v12 = vmul.f32 %v3011_v13, %v4408_v32  ;;  %v2023_v47 = vmul.f32 %v3011_v13, %v4412_v6 }
 0x53c   : > { %v2024_v40 = vmul.f32 %v3011_v13, %v4415_v53  ;;  %v2017_v63 = vmul.f32 %v3013_v49, %v5226_v14  ;;  %v2018_v28 = vmul.f32 %v3013_v49, %v5227_v20  ;;  %v2019_v31 = vmul.f32 %v3013_v49, %v5228_v16  ;;  %v5230_v53 = vld [vmem:[#allocation55_spill] sm:$0xff] }
 0x53d   : > { %v1842_v19 = vpop.xlane.xlu1 %1841  ;;  %v2020_v29 = vmul.f32 %v3013_v49, %v5229_v24 }
 0x53e   : > { %3014 = vrcp.f32 %v1842_v19  ;;  %v2109_v4 = vpack.c.bf16 %v2021_v17, %v2017_v63  ;;  %v2110_v1 = vpack.c.bf16 %v2022_v12, %v2018_v28  ;;  %v2111_v38 = vpack.c.bf16 %v2023_v47, %v2019_v31 }
 0x53f   : > { %3016 = vrcp.f32 %v1837_v25  ;;  %v2112_v43 = vpack.c.bf16 %v2024_v40, %v2020_v29 }
 0x542   : > { %2209 = vmatpush.bf16.xpose.msra.mxu2 %v2117_v2  ;;  %2222 = vmatpush.bf16.xpose.msra.mxu3 %v2118_v54 }
 0x543   : > { %2235 = vmatpush.bf16.xpose.msrb.mxu0 %v2119_v30  ;;  %2248 = vmatpush.bf16.xpose.msrb.mxu1 %v2120_v51 }
 0x544   : > { %v3015_v5 = vpop.eup %3014 }
 0x545   : > { %v3017_v32 = vpop.eup %3016  ;;  %v2013_v6 = vmul.f32 %v3015_v5, %v4422_v10  ;;  %v2014_v9 = vmul.f32 %v3015_v5, %v5230_v53  ;;  %v2015_v39 = vmul.f32 %v3015_v5, %v5231_v23  ;;  %v2016_v37 = vmul.f32 %v3015_v5, %v5232_v0 }
 0x546   : > { %v2009_v60 = vmul.f32 %v3017_v32, %v5233_v58  ;;  %v2010_v3 = vmul.f32 %v3017_v32, %v5234_v62  ;;  %v2011_v55 = vmul.f32 %v3017_v32, %v5235_v50  ;;  %v2012_v18 = vmul.f32 %v3017_v32, %v5236_v34 }
 0x548   : > { %v2105_v57 = vpack.c.bf16 %v2013_v6, %v2009_v60  ;;  %v2106_v59 = vpack.c.bf16 %v2014_v9, %v2010_v3  ;;  %v2107_v36 = vpack.c.bf16 %v2015_v39, %v2011_v55  ;;  %v2108_v11 = vpack.c.bf16 %v2016_v37, %v2012_v18 }
 0x54a   : > { %2210 = vmatpush.bf16.xpose.msra.mxu2 %v2113_v44  ;;  %2223 = vmatpush.bf16.xpose.msra.mxu3 %v2114_v35 }
 0x54b   : > { %2236 = vmatpush.bf16.xpose.msrb.mxu0 %v2115_v8  ;;  %2249 = vmatpush.bf16.xpose.msrb.mxu1 %v2116_v42 }
 0x552   : > { %2211 = vmatpush.bf16.xpose.msra.mxu2 %v2109_v4  ;;  %2224 = vmatpush.bf16.xpose.msra.mxu3 %v2110_v1 }
 0x553   : > { %2237 = vmatpush.bf16.xpose.msrb.mxu0 %v2111_v38  ;;  %2250 = vmatpush.bf16.xpose.msrb.mxu1 %v2112_v43 }
 0x55a   : > { %2212 = vmatpush.bf16.xpose.msra.mxu2 %v2105_v57  ;;  %2225 = vmatpush.bf16.xpose.msra.mxu3 %v2106_v59 }
 0x55b   : > { %2238 = vmatpush.bf16.xpose.msrb.mxu0 %v2107_v36  ;;  %2251 = vmatpush.bf16.xpose.msrb.mxu1 %v2108_v11 }
 0x561   : > { %2213 = vmatmul.bf16.vlgmr.msra.gmra.mxu2 %v4546_v22  ;;  %2226 = vmatmul.bf16.vlgmr.msra.gmra.mxu3 %v4548_v21  ;;  %v2257_v22 = vld [vmem:[%s5237_s20] sm:$0xff] }
 0x562   : > { %2239 = vmatmul.bf16.vlgmr.msrb.gmra.mxu0 %v4561_v27  ;;  %2252 = vmatmul.bf16.vlgmr.msrb.gmra.mxu1 %v4568_v46  ;;  %v2258_v21 = vld [vmem:[%s5238_s16] sm:$0xff]  ;;  %s2350_s16 = sshll.u32 %s2346_s29, 4  ;;  %s2351_s16 = int_to_ptr.hbm [resolvable:$true] %s2350_s16 }
 0x563   : > { %2261 = vperm.xlu2 %2697, %v2258_v21   ;;  %s3062_s24 = sshra.s32 %s2351_s16, 4  ;;  %s3063_s24 = int_to_ptr.hbm [resolvable:$true] %s3062_s24 }
 0x564   : > { %s3064_s2 = scalar_lea.hbm %s3063_s24, 16  ;;  %p3069_p13 = scmp.lt.s32.totalorder %s3063_s24, %s5240_s13 }
 0x565   : > { %p3065_p9 = scmp.ne.s32.totalorder %s3063_s24, %s3064_s2  ;;  %p3070_p0 = scmp.lt.s32.totalorder %s3068_s15, %s3064_s2 }
 0x567   : > { %p3066_p10 = pnand %p3065_p9, %p3317_p12  ;;  %p3071_p1 = por %p3070_p0, %p3069_p13 }
 0x569   : > { %p3067_p11 = pneg %p3066_p10 }
 0x56b   : > { %p3072_p4 = pnand %p3071_p1, %p3067_p11 }
 0x5a1   : > { %v2188_v7 = vpop.f32.mrf.mxu0 }
 0x5a4   : > { %v2162_v10 = vpop.f32.mrf.mxu2  ;;  %v2175_v2 = vpop.f32.mrf.mxu3 }
 0x5a5   : > { %v2176_v54 = vadd.f32 %v2175_v2, %v2162_v10 }
 0x5a7   : > { %v2189_v30 = vadd.f32 %v2188_v7, %v2176_v54 }
 0x5a9   : > { %v2190_v56 = vpop.f32.mrf.mxu0 }
 0x5aa   : > { %v2201_v51 = vpop.f32.mrf.mxu1 }
 0x5ab   : > { %v2202_v52 = vadd.f32 %v2201_v51, %v2189_v30 }
 0x5ac   : > { %v2164_v33 = vpop.f32.mrf.mxu2  ;;  %v2177_v41 = vpop.f32.mrf.mxu3 }
 0x5ad   : > { %2282 = vmatpush.msrb.mxu2 %v2202_v52 }
 0x5ae   : > { %2580 = vmatmul.msk.f32.vlgmr.msrb.gmra.mxu2 %vm656_vm2, %v2257_v22 }
 0x5b2   : > { %v2203_v26 = vpop.f32.mrf.mxu1 }
 0x5bd   : > { %v2262_v42 = vpop.permute.xlu2 %2261 }
 0x5df   : > { %v2240_v27 = vpop.f32.mrf.mxu0  ;;  %v2253_v46 = vpop.f32.mrf.mxu1 }
 0x5e4   : > { %v2214_v61 = vpop.f32.mrf.mxu2  ;;  %v2227_v45 = vpop.f32.mrf.mxu3 }
 0x5e5   : > { %v2228_v48 = vadd.f32 %v2227_v45, %v2214_v61 }
 0x5e7   : > { %v2241_v15 = vadd.f32 %v2240_v27, %v2228_v48  ;;  %v2242_v19 = vpop.f32.mrf.mxu0  ;;  %v2255_v44 = vpop.f32.mrf.mxu1 }
 0x5e9   : > { %v2254_v35 = vadd.f32 %v2253_v46, %v2241_v15 }
 0x5eb   : > { %2302 = vmatpush.msrb.mxu3 %v2254_v35 }
 0x5ec   : > { %v2216_v13 = vpop.f32.mrf.mxu2  ;;  %v2229_v8 = vpop.f32.mrf.mxu3  ;;  %2581 = vmatmul.msk.f32.vlgmr.msrb.gmra.mxu3 %vm656_vm2, %v2257_v22 }
 0x631   : > { %v2284_v25 = vpop.f32.mrf.mxu2 }
 0x632   : > { %v2285_v49 = vadd.f32 %v2284_v25, %v2262_v42 }
 0x634   : > { %2307 = vst [vmem:[%s3365_s22] sm:$0xff] %v2285_v49  ;;  %v2312_v47 = vmul.f32 %v2285_v49, %v2285_v49 }
 0x66f   : > { %v2304_v17 = vpop.f32.mrf.mxu3 }
 0x670   : > { %v2305_v12 = vadd.f32 %v2304_v17, %v2262_v42 }
 0x672   : > { %2308 = vst [vmem:[%s3365_s22 + $0x8] sm:$0xff] %v2305_v12  ;;  %v2309_v40 = vadd.f32 %v2305_v12, %v2285_v49  ;;  %v2313_v14 = vmul.f32 %v2305_v12, %v2305_v12 }
 0x673   : > { %3075 = shalt.err (!%p3072_p4)
}
 0x674   : > { %2591 = dma.vmem_to_hbm [thread:$0]  (%p3317_p12), %s2349_s14, 256, %s2351_s16, %s2325_s23   ;;  %2310 = vadd.xlane.f32.xlu0 %v2309_v40  ;;  %v2314_v63 = vadd.f32 %v2313_v14, %v2312_v47  ;;  %v2317_v20 = vld [vmem:[%s3358_s26] sm:$0xff]  ;;  %vm2319_vm4 = vcmask 7168  }
 0x675   : > { %v2321_v16 = vld [vmem:[%s3363_s9] sm:$0xff] }
 0x676   : > { %2315 = vadd.xlane.f32.xlu1 %v2314_v63 }
 0x6e7   : > { %v2311_v28 = vpop.xlane.xlu0 %2310 }
 0x6e8   : > { %v2318_v31 = vadd.f32 %v2317_v20, %v2311_v28 }
 0x6e9   : > { %v2316_v24 = vpop.xlane.xlu1 %2315 }
 0x6ea   : > { %2320 = vst.msk [vmem:[%s3358_s26] sm:$0xff] %vm2319_vm4, %v2318_v31  ;;  %v2322_v29 = vadd.f32 %v2321_v16, %v2316_v24 }
 0x6ec   : > { %2323 = vst.msk [vmem:[%s3363_s9] sm:$0xff] %vm2319_vm4, %v2322_v29 }
 0x6ed PF: > { %p2602_p5 = scmp.ge.s32.totalorder %s3170_s27, 2  ;;  %s2368_s7 = sand.u32 1, %s3130_s17  }
 0x6ee   : > { %s2369_s22 = scalar_lea.sflag [#allocation6], %s2368_s7 }
 0x6ef   : > { %p2598_p12 = pnand %p2602_p5, %p3330_p2 }
 0x6f1   : > { %p2599_p6 = pneg %p2598_p12 }
 0x6f3   : > { %3125 = dma.done.wait (%p2599_p6), %s2369_s22, 256  }
 0x6f4   : > { %3127 = vsyncadd (%p2599_p6), %s2369_s22, 4294967040  ;;  %s28_s27 = sadd.s32 1, %s3170_s27   ;;  %s5241_s26 = sld [smem:[#allocation10_spill]] }
 0x6f5   : > { %p25_p8 = scmp.ge.s32.totalorder %s28_s27, 6   ;;  %s5242_s22 = sld [smem:[#allocation16_spill]] }
 0x6f6   : > { %s5243_s23 = sld [smem:[#allocation11_spill]]  ;;  %s5247_s17 = smov %s3134_s18 }
 0x6f7   : > { %s5244_s24 = sld [smem:[#allocation12_spill]]  ;;  %s5248_s18 = smov %s3138_s19 }
 0x6f8   : > { %s5245_s9 = sld [smem:[#allocation13_spill]]  ;;  %s5249_s19 = smov %s3325_s25 }
 0x6f9   : > { %s5246_s14 = sld [smem:[#allocation14_spill]]  ;;  %s5250_s20 = smov %s3146_s21 }
 0x6fa   : > { %s5251_s21 = smov %s5241_s26 }
 0x6fb   :  { %27 = sbr.rel (!%p25_p8) target bundleno = 15 (0xf), region = 130 }
 0x6fe   : > { %s5252_s25 = smov %s5245_s9 }
 0x6ff   : > { %s5253_s26 = smov %s5246_s14 }
 0x700   :  { %2389 = vsyncpa [#allocation5], 1 }
 0x701   :  { %2391 = vsyncpa [#allocation5 + $0x1], 1 }
 0x702   :  { %2392 = vsyncpa [#allocation6], 1 }
 0x703   :  { %2394 = vsyncpa [#allocation6 + $0x1], 1 }

</bundles_post_ra>
